<compile_context>
chip_gen: v7x
topology: tpu7x:2x2x1
jax: 0.10.0
libtpu: 0.0.40
codegen_flags: <defaults>
</compile_context>

<pallas_src>
import jax
import jax.numpy as jnp
from jax import lax
from jax.experimental import pallas as pl
from jax.experimental.pallas import tpu as pltpu

LRELU_SLOPE = 0.2


def _round_up(x, m):
    return (x + m - 1) // m * m


def _lrelu(v):
    return jnp.where(v >= 0, v, LRELU_SLOPE * v)


def _pick_nb(n, max_nb=8):
    """Largest batch-pack factor dividing n that still keeps >= 2 grid steps."""
    nb = 1
    for cand in range(1, min(max_nb, n) + 1):
        if n % cand == 0 and n // cand >= 2:
            nb = cand
    return nb


def _reorder_weight(w, group_sizes):
    """OIHW (cout, cin, 3, 3) -> (cout, 9*cin) matching the im2col slab's
    group-major / tap / channel-within-group row order."""
    cout = w.shape[0]
    parts, c0 = [], 0
    for g in group_sizes:
        blk = w[:, c0:c0 + g].reshape(cout, g, 9)            # [o, local_ch, tap]
        parts.append(jnp.transpose(blk, (0, 2, 1)).reshape(cout, 9 * g))
        c0 += g
    return jnp.concatenate(parts, axis=1)


def _make_kernel(H, W, C, G, C_out, NB, PSEG, SLACK):
    Hp, Wp = H + 2, W + 2
    P = Hp * Wp
    C_total = C + 4 * G
    NBW = NB * PSEG

    def kernel(x_ref, w_ref, b_ref, o_ref, feat, col):
        # feat: (C_total, 2*SLACK + NBW) f32.  Lanes [SLACK, SLACK+NBW) hold the
        #   zero-ring-padded, channel-concatenated feature stack, one PSEG-wide
        #   segment per packed image.  The slack lanes are never initialised:
        #   anything read from them only lands on ring / pad output positions,
        #   which are select-masked to 0 (c1..c4) or stripped by the wrapper.
        # col: (9*C_total, NBW) f32 im2col slab, row = 9*c0 + tap*g + local_ch.
        #   Conv k's RHS is rows [0, 9*cin_k) -> ONE MXU matmul per conv.

        # Interior mask from a lane iota; compares only (hidden under matmuls).
        q = lax.broadcasted_iota(jnp.int32, (1, NBW), 1)
        interior = None
        for img in range(NB):
            for i in range(1, H + 1):
                lo = img * PSEG + i * Wp + 1
                term = (q >= lo) & (q <= lo + W - 1)
                interior = term if interior is None else (interior | term)

        # x (zero-ring padded + flattened by the wrapper) -> its feat rows.
        feat[0:C, SLACK:SLACK + NBW] = x_ref[0].astype(jnp.float32)

        def append(c0, g):
            # Append 9 shifted copies of feat rows [c0, c0+g) to the slab.
            r0 = 9 * c0
            for t in range(9):
                off = (t // 3 - 1) * Wp + (t % 3 - 1)
                col[r0 + t * g:r0 + (t + 1) * g, :] = (
                    feat[c0:c0 + g, SLACK + off:SLACK + off + NBW])

        def conv(r0, cout, cin):
            # Single fused matmul: (cout, 9*cin) x (9*cin, NBW) -> (cout, NBW).
            K = 9 * cin
            acc = lax.dot_general(
                w_ref[r0:r0 + cout, 0:K], col[0:K, :],
                dimension_numbers=(((1,), (0,)), ((), ())),
                preferred_element_type=jnp.float32)
            return acc + b_ref[r0:r0 + cout, :]

        append(0, C)
        c0, r0 = C, 0
        for _ in range(4):                            # c1 .. c4
            act = _lrelu(conv(r0, G, c0))
            act = jnp.where(interior, act, 0.0)       # re-impose the zero ring
            feat[c0:c0 + G, SLACK:SLACK + NBW] = act
            append(c0, G)
            c0 += G
            r0 += G
        out = conv(r0, C_out, C_total)                # final conv, no activation
        o_ref[0] = out.astype(o_ref.dtype)

    return kernel


def dense_block_pallas(x, params, max_pack=8):
    """x: (N, C, H, W) float32 NCHW.  params: 5 (weight, bias) pairs,
    weight (cout, cin, 3, 3) OIHW, bias (cout,).  Returns (N, C, H, W)."""
    N, C, H, W = x.shape
    G = params[0][0].shape[0]
    C_out = params[4][0].shape[0]
    Hp, Wp = H + 2, W + 2
    P = Hp * Wp
    C_total = C + 4 * G
    KTOT = 9 * C_total

    NB = _pick_nb(N, max_pack)                 # images packed per grid step
    n_steps = N // NB
    SLACK = _round_up(Wp + 1, 32)              # >= largest tap reach (Wp + 1)
    PSEG = _round_up(P, 128)                   # 128-aligned per-image segment
    NBW = NB * PSEG
    WIDTH = SLACK + NBW + SLACK
    CO_SUM = 4 * G + C_out

    # Input: zero-ring pad, flatten spatial, pad each image to PSEG lanes,
    # pack NB images per grid step side-by-side along the lane axis.
    x_pad = jnp.pad(x, ((0, 0), (0, 0), (1, 1), (1, 1))).reshape(N, C, P)
    x_seg = jnp.pad(x_pad, ((0, 0), (0, 0), (0, PSEG - P)))
    x_seg = (x_seg.reshape(n_steps, NB, C, PSEG)
             .transpose(0, 2, 1, 3).reshape(n_steps, C, NBW))

    # Fold the five conv weights / biases into one matrix / vector.
    group_sizes = [C, G, G, G, G]
    row_off = [0, G, 2 * G, 3 * G, 4 * G]
    w_all = jnp.zeros((CO_SUM, KTOT), jnp.float32)
    b_all = jnp.zeros((CO_SUM, 1), jnp.float32)
    total_flops = 0
    for idx, (w, b) in enumerate(params):
        cout, cin = w.shape[0], w.shape[1]
        wre = _reorder_weight(w.astype(jnp.float32), group_sizes[:idx + 1])
        w_all = w_all.at[row_off[idx]:row_off[idx] + cout, 0:9 * cin].set(wre)
        b_all = b_all.at[row_off[idx]:row_off[idx] + cout, 0].set(b)
        total_flops += 2 * H * W * 9 * cin * cout
    total_flops *= N

    kernel = _make_kernel(H, W, C, G, C_out, NB, PSEG, SLACK)

    # VMEM budget from the actual working set (scratch + double-buffered IO),
    # with headroom — NOT the whole machine.
    def tile_bytes(r, c, itemsize=4):
        return _round_up(r, 8) * _round_up(c, 128) * itemsize
    scratch_bytes = tile_bytes(C_total, WIDTH) + tile_bytes(KTOT, NBW)
    io_bytes = 2 * (tile_bytes(C, NBW) + tile_bytes(CO_SUM, KTOT)
                    + tile_bytes(CO_SUM, 1) + tile_bytes(C_out, NBW))
    vmem_limit = int(_round_up(scratch_bytes + io_bytes + (4 << 20), 1 << 20))

    cost = pl.CostEstimate(
        flops=total_flops,
        transcendentals=0,
        bytes_accessed=(x_seg.size + w_all.size + b_all.size
                        + n_steps * C_out * NBW) * 4,
    )

    out_flat = pl.pallas_call(
        kernel,
        out_shape=jax.ShapeDtypeStruct((n_steps, C_out, NBW), x.dtype),
        grid_spec=pltpu.PrefetchScalarGridSpec(
            num_scalar_prefetch=0,
            grid=(n_steps,),
            in_specs=[
                pl.BlockSpec((1, C, NBW), lambda g: (g, 0, 0)),
                pl.BlockSpec((CO_SUM, KTOT), lambda g: (0, 0)),
                pl.BlockSpec((CO_SUM, 1), lambda g: (0, 0)),
            ],
            out_specs=pl.BlockSpec((1, C_out, NBW), lambda g: (g, 0, 0)),
            scratch_shapes=[
                pltpu.VMEM((C_total, WIDTH), jnp.float32),   # feature stack
                pltpu.VMEM((KTOT, NBW), jnp.float32),        # im2col slab
            ],
        ),
        compiler_params=pltpu.CompilerParams(
            dimension_semantics=("parallel",),
            vmem_limit_bytes=vmem_limit,
        ),
        cost_estimate=cost,
    )(x_seg, w_all, b_all)

    # Unpack lanes -> NCHW, strip the per-image lane pad and the padding ring.
    out = (out_flat.reshape(n_steps, C_out, NB, PSEG)
           .transpose(0, 2, 1, 3).reshape(N, C_out, PSEG))
    return out[:, :, :P].reshape(N, C_out, Hp, Wp)[:, :, 1:H + 1, 1:W + 1]


def dense_block_reference(x, params):
    """Pure-JAX reference (NCHW / OIHW), mirrors the PyTorch forward."""
    def conv(h, w, b):
        y = lax.conv_general_dilated(
            h, w, window_strides=(1, 1), padding=((1, 1), (1, 1)),
            dimension_numbers=("NCHW", "OIHW", "NCHW"))
        return y + b.reshape(1, -1, 1, 1)

    (w1, b1), (w2, b2), (w3, b3), (w4, b4), (wf, bf) = params
    c1 = _lrelu(conv(x, w1, b1))
    c2 = _lrelu(conv(jnp.concatenate([x, c1], 1), w2, b2))
    c3 = _lrelu(conv(jnp.concatenate([x, c1, c2], 1), w3, b3))
    c4 = _lrelu(conv(jnp.concatenate([x, c1, c2, c3], 1), w4, b4))
    return conv(jnp.concatenate([x, c1, c2, c3, c4], 1), wf, bf)


def init_params(key, kernels, growth):
    """Deterministic init. Conv weights OIHW (cout, cin, 3, 3), bias (cout,)."""
    cins = [kernels, kernels + growth, kernels + 2 * growth,
            kernels + 3 * growth, kernels + 4 * growth]
    couts = [growth, growth, growth, growth, kernels]
    params = []
    for cin, cout in zip(cins, couts):
        key, kw, kb = jax.random.split(key, 3)
        w = 0.1 * jax.random.normal(kw, (cout, cin, 3, 3), jnp.float32)
        b = 0.1 * jax.random.normal(kb, (cout,), jnp.float32)
        params.append((w, b))
    return params


if __name__ == "__main__":
    # opt = {'mode': '2D', 'kernel_size': 3, 'stride': 1, 'padding': 1}
    kernels, growth = 4, 4
    N, H, W = 4, 16, 16      # N=4 -> NB=2 images packed per step, grid of 2

    key = jax.random.PRNGKey(0)
    key, kx = jax.random.split(key)
    x = jax.random.normal(kx, (N, kernels, H, W), jnp.float32)   # NCHW
    params = init_params(key, kernels, growth)

    out = dense_block_pallas(x, params)
    out = jax.block_until_ready(out)

    ref = dense_block_reference(x, params)
    assert out.shape == (N, kernels, H, W), out.shape
    max_err = float(jnp.max(jnp.abs(out - ref)))
    assert jnp.allclose(out, ref, atol=1e-3, rtol=1e-3), max_err

    print("KERNEL_OK")
</pallas_src>

<mosaic_0001>
module attributes {stable_mosaic.version = 11 : i64} {
  func.func @kernel(%arg0: i32, %arg1: memref<1x4x768xf32, #tpu.memory_space<vmem>>, %arg2: memref<20x180xf32, #tpu.memory_space<vmem>>, %arg3: memref<20x1xf32, #tpu.memory_space<vmem>>, %arg4: memref<1x4x768xf32, #tpu.memory_space<vmem>>, %arg5: memref<20x832xf32, #tpu.memory_space<vmem>>, %arg6: memref<180x768xf32, #tpu.memory_space<vmem>>) attributes {dimension_semantics = [#tpu.dimension_semantics<parallel>], iteration_bounds = array<i64: 2>, scalar_prefetch = 0 : i64, scratch_operands = 2 : i64, tpu.core_type = #tpu.core_type<tc>, window_params = [{transform_indices = @transform_0, window_bounds = array<i64: 1, 4, 768>}, {pipeline_mode = #tpu.pipeline_mode<synchronous>, transform_indices = @transform_1, window_bounds = array<i64: 20, 180>}, {pipeline_mode = #tpu.pipeline_mode<synchronous>, transform_indices = @transform_2, window_bounds = array<i64: 20, 1>}, {transform_indices = @transform_3, window_bounds = array<i64: 1, 4, 768>}]} {
    %0 = tpu.iota {dimensions = array<i32: 1>} : vector<1x768xi32>
    %c19_i32 = arith.constant 19 : i32
    %1 = vector.broadcast %c19_i32 : i32 to vector<1x768xi32>
    %2 = arith.cmpi sge, %0, %1 : vector<1x768xi32>
    %c34_i32 = arith.constant 34 : i32
    %3 = vector.broadcast %c34_i32 : i32 to vector<1x768xi32>
    %4 = arith.cmpi sle, %0, %3 : vector<1x768xi32>
    %5 = arith.andi %2, %4 : vector<1x768xi1>
    %c37_i32 = arith.constant 37 : i32
    %6 = vector.broadcast %c37_i32 : i32 to vector<1x768xi32>
    %7 = arith.cmpi sge, %0, %6 : vector<1x768xi32>
    %c52_i32 = arith.constant 52 : i32
    %8 = vector.broadcast %c52_i32 : i32 to vector<1x768xi32>
    %9 = arith.cmpi sle, %0, %8 : vector<1x768xi32>
    %10 = arith.andi %7, %9 : vector<1x768xi1>
    %11 = arith.ori %5, %10 : vector<1x768xi1>
    %c55_i32 = arith.constant 55 : i32
    %12 = vector.broadcast %c55_i32 : i32 to vector<1x768xi32>
    %13 = arith.cmpi sge, %0, %12 : vector<1x768xi32>
    %c70_i32 = arith.constant 70 : i32
    %14 = vector.broadcast %c70_i32 : i32 to vector<1x768xi32>
    %15 = arith.cmpi sle, %0, %14 : vector<1x768xi32>
    %16 = arith.andi %13, %15 : vector<1x768xi1>
    %17 = arith.ori %11, %16 : vector<1x768xi1>
    %c73_i32 = arith.constant 73 : i32
    %18 = vector.broadcast %c73_i32 : i32 to vector<1x768xi32>
    %19 = arith.cmpi sge, %0, %18 : vector<1x768xi32>
    %c88_i32 = arith.constant 88 : i32
    %20 = vector.broadcast %c88_i32 : i32 to vector<1x768xi32>
    %21 = arith.cmpi sle, %0, %20 : vector<1x768xi32>
    %22 = arith.andi %19, %21 : vector<1x768xi1>
    %23 = arith.ori %17, %22 : vector<1x768xi1>
    %c91_i32 = arith.constant 91 : i32
    %24 = vector.broadcast %c91_i32 : i32 to vector<1x768xi32>
    %25 = arith.cmpi sge, %0, %24 : vector<1x768xi32>
    %c106_i32 = arith.constant 106 : i32
    %26 = vector.broadcast %c106_i32 : i32 to vector<1x768xi32>
    %27 = arith.cmpi sle, %0, %26 : vector<1x768xi32>
    %28 = arith.andi %25, %27 : vector<1x768xi1>
    %29 = arith.ori %23, %28 : vector<1x768xi1>
    %c109_i32 = arith.constant 109 : i32
    %30 = vector.broadcast %c109_i32 : i32 to vector<1x768xi32>
    %31 = arith.cmpi sge, %0, %30 : vector<1x768xi32>
    %c124_i32 = arith.constant 124 : i32
    %32 = vector.broadcast %c124_i32 : i32 to vector<1x768xi32>
    %33 = arith.cmpi sle, %0, %32 : vector<1x768xi32>
    %34 = arith.andi %31, %33 : vector<1x768xi1>
    %35 = arith.ori %29, %34 : vector<1x768xi1>
    %c127_i32 = arith.constant 127 : i32
    %36 = vector.broadcast %c127_i32 : i32 to vector<1x768xi32>
    %37 = arith.cmpi sge, %0, %36 : vector<1x768xi32>
    %c142_i32 = arith.constant 142 : i32
    %38 = vector.broadcast %c142_i32 : i32 to vector<1x768xi32>
    %39 = arith.cmpi sle, %0, %38 : vector<1x768xi32>
    %40 = arith.andi %37, %39 : vector<1x768xi1>
    %41 = arith.ori %35, %40 : vector<1x768xi1>
    %c145_i32 = arith.constant 145 : i32
    %42 = vector.broadcast %c145_i32 : i32 to vector<1x768xi32>
    %43 = arith.cmpi sge, %0, %42 : vector<1x768xi32>
    %c160_i32 = arith.constant 160 : i32
    %44 = vector.broadcast %c160_i32 : i32 to vector<1x768xi32>
    %45 = arith.cmpi sle, %0, %44 : vector<1x768xi32>
    %46 = arith.andi %43, %45 : vector<1x768xi1>
    %47 = arith.ori %41, %46 : vector<1x768xi1>
    %c163_i32 = arith.constant 163 : i32
    %48 = vector.broadcast %c163_i32 : i32 to vector<1x768xi32>
    %49 = arith.cmpi sge, %0, %48 : vector<1x768xi32>
    %c178_i32 = arith.constant 178 : i32
    %50 = vector.broadcast %c178_i32 : i32 to vector<1x768xi32>
    %51 = arith.cmpi sle, %0, %50 : vector<1x768xi32>
    %52 = arith.andi %49, %51 : vector<1x768xi1>
    %53 = arith.ori %47, %52 : vector<1x768xi1>
    %c181_i32 = arith.constant 181 : i32
    %54 = vector.broadcast %c181_i32 : i32 to vector<1x768xi32>
    %55 = arith.cmpi sge, %0, %54 : vector<1x768xi32>
    %c196_i32 = arith.constant 196 : i32
    %56 = vector.broadcast %c196_i32 : i32 to vector<1x768xi32>
    %57 = arith.cmpi sle, %0, %56 : vector<1x768xi32>
    %58 = arith.andi %55, %57 : vector<1x768xi1>
    %59 = arith.ori %53, %58 : vector<1x768xi1>
    %c199_i32 = arith.constant 199 : i32
    %60 = vector.broadcast %c199_i32 : i32 to vector<1x768xi32>
    %61 = arith.cmpi sge, %0, %60 : vector<1x768xi32>
    %c214_i32 = arith.constant 214 : i32
    %62 = vector.broadcast %c214_i32 : i32 to vector<1x768xi32>
    %63 = arith.cmpi sle, %0, %62 : vector<1x768xi32>
    %64 = arith.andi %61, %63 : vector<1x768xi1>
    %65 = arith.ori %59, %64 : vector<1x768xi1>
    %c217_i32 = arith.constant 217 : i32
    %66 = vector.broadcast %c217_i32 : i32 to vector<1x768xi32>
    %67 = arith.cmpi sge, %0, %66 : vector<1x768xi32>
    %c232_i32 = arith.constant 232 : i32
    %68 = vector.broadcast %c232_i32 : i32 to vector<1x768xi32>
    %69 = arith.cmpi sle, %0, %68 : vector<1x768xi32>
    %70 = arith.andi %67, %69 : vector<1x768xi1>
    %71 = arith.ori %65, %70 : vector<1x768xi1>
    %c235_i32 = arith.constant 235 : i32
    %72 = vector.broadcast %c235_i32 : i32 to vector<1x768xi32>
    %73 = arith.cmpi sge, %0, %72 : vector<1x768xi32>
    %c250_i32 = arith.constant 250 : i32
    %74 = vector.broadcast %c250_i32 : i32 to vector<1x768xi32>
    %75 = arith.cmpi sle, %0, %74 : vector<1x768xi32>
    %76 = arith.andi %73, %75 : vector<1x768xi1>
    %77 = arith.ori %71, %76 : vector<1x768xi1>
    %c253_i32 = arith.constant 253 : i32
    %78 = vector.broadcast %c253_i32 : i32 to vector<1x768xi32>
    %79 = arith.cmpi sge, %0, %78 : vector<1x768xi32>
    %c268_i32 = arith.constant 268 : i32
    %80 = vector.broadcast %c268_i32 : i32 to vector<1x768xi32>
    %81 = arith.cmpi sle, %0, %80 : vector<1x768xi32>
    %82 = arith.andi %79, %81 : vector<1x768xi1>
    %83 = arith.ori %77, %82 : vector<1x768xi1>
    %c271_i32 = arith.constant 271 : i32
    %84 = vector.broadcast %c271_i32 : i32 to vector<1x768xi32>
    %85 = arith.cmpi sge, %0, %84 : vector<1x768xi32>
    %c286_i32 = arith.constant 286 : i32
    %86 = vector.broadcast %c286_i32 : i32 to vector<1x768xi32>
    %87 = arith.cmpi sle, %0, %86 : vector<1x768xi32>
    %88 = arith.andi %85, %87 : vector<1x768xi1>
    %89 = arith.ori %83, %88 : vector<1x768xi1>
    %c289_i32 = arith.constant 289 : i32
    %90 = vector.broadcast %c289_i32 : i32 to vector<1x768xi32>
    %91 = arith.cmpi sge, %0, %90 : vector<1x768xi32>
    %c304_i32 = arith.constant 304 : i32
    %92 = vector.broadcast %c304_i32 : i32 to vector<1x768xi32>
    %93 = arith.cmpi sle, %0, %92 : vector<1x768xi32>
    %94 = arith.andi %91, %93 : vector<1x768xi1>
    %95 = arith.ori %89, %94 : vector<1x768xi1>
    %c403_i32 = arith.constant 403 : i32
    %96 = vector.broadcast %c403_i32 : i32 to vector<1x768xi32>
    %97 = arith.cmpi sge, %0, %96 : vector<1x768xi32>
    %c418_i32 = arith.constant 418 : i32
    %98 = vector.broadcast %c418_i32 : i32 to vector<1x768xi32>
    %99 = arith.cmpi sle, %0, %98 : vector<1x768xi32>
    %100 = arith.andi %97, %99 : vector<1x768xi1>
    %101 = arith.ori %95, %100 : vector<1x768xi1>
    %c421_i32 = arith.constant 421 : i32
    %102 = vector.broadcast %c421_i32 : i32 to vector<1x768xi32>
    %103 = arith.cmpi sge, %0, %102 : vector<1x768xi32>
    %c436_i32 = arith.constant 436 : i32
    %104 = vector.broadcast %c436_i32 : i32 to vector<1x768xi32>
    %105 = arith.cmpi sle, %0, %104 : vector<1x768xi32>
    %106 = arith.andi %103, %105 : vector<1x768xi1>
    %107 = arith.ori %101, %106 : vector<1x768xi1>
    %c439_i32 = arith.constant 439 : i32
    %108 = vector.broadcast %c439_i32 : i32 to vector<1x768xi32>
    %109 = arith.cmpi sge, %0, %108 : vector<1x768xi32>
    %c454_i32 = arith.constant 454 : i32
    %110 = vector.broadcast %c454_i32 : i32 to vector<1x768xi32>
    %111 = arith.cmpi sle, %0, %110 : vector<1x768xi32>
    %112 = arith.andi %109, %111 : vector<1x768xi1>
    %113 = arith.ori %107, %112 : vector<1x768xi1>
    %c457_i32 = arith.constant 457 : i32
    %114 = vector.broadcast %c457_i32 : i32 to vector<1x768xi32>
    %115 = arith.cmpi sge, %0, %114 : vector<1x768xi32>
    %c472_i32 = arith.constant 472 : i32
    %116 = vector.broadcast %c472_i32 : i32 to vector<1x768xi32>
    %117 = arith.cmpi sle, %0, %116 : vector<1x768xi32>
    %118 = arith.andi %115, %117 : vector<1x768xi1>
    %119 = arith.ori %113, %118 : vector<1x768xi1>
    %c475_i32 = arith.constant 475 : i32
    %120 = vector.broadcast %c475_i32 : i32 to vector<1x768xi32>
    %121 = arith.cmpi sge, %0, %120 : vector<1x768xi32>
    %c490_i32 = arith.constant 490 : i32
    %122 = vector.broadcast %c490_i32 : i32 to vector<1x768xi32>
    %123 = arith.cmpi sle, %0, %122 : vector<1x768xi32>
    %124 = arith.andi %121, %123 : vector<1x768xi1>
    %125 = arith.ori %119, %124 : vector<1x768xi1>
    %c493_i32 = arith.constant 493 : i32
    %126 = vector.broadcast %c493_i32 : i32 to vector<1x768xi32>
    %127 = arith.cmpi sge, %0, %126 : vector<1x768xi32>
    %c508_i32 = arith.constant 508 : i32
    %128 = vector.broadcast %c508_i32 : i32 to vector<1x768xi32>
    %129 = arith.cmpi sle, %0, %128 : vector<1x768xi32>
    %130 = arith.andi %127, %129 : vector<1x768xi1>
    %131 = arith.ori %125, %130 : vector<1x768xi1>
    %c511_i32 = arith.constant 511 : i32
    %132 = vector.broadcast %c511_i32 : i32 to vector<1x768xi32>
    %133 = arith.cmpi sge, %0, %132 : vector<1x768xi32>
    %c526_i32 = arith.constant 526 : i32
    %134 = vector.broadcast %c526_i32 : i32 to vector<1x768xi32>
    %135 = arith.cmpi sle, %0, %134 : vector<1x768xi32>
    %136 = arith.andi %133, %135 : vector<1x768xi1>
    %137 = arith.ori %131, %136 : vector<1x768xi1>
    %c529_i32 = arith.constant 529 : i32
    %138 = vector.broadcast %c529_i32 : i32 to vector<1x768xi32>
    %139 = arith.cmpi sge, %0, %138 : vector<1x768xi32>
    %c544_i32 = arith.constant 544 : i32
    %140 = vector.broadcast %c544_i32 : i32 to vector<1x768xi32>
    %141 = arith.cmpi sle, %0, %140 : vector<1x768xi32>
    %142 = arith.andi %139, %141 : vector<1x768xi1>
    %143 = arith.ori %137, %142 : vector<1x768xi1>
    %c547_i32 = arith.constant 547 : i32
    %144 = vector.broadcast %c547_i32 : i32 to vector<1x768xi32>
    %145 = arith.cmpi sge, %0, %144 : vector<1x768xi32>
    %c562_i32 = arith.constant 562 : i32
    %146 = vector.broadcast %c562_i32 : i32 to vector<1x768xi32>
    %147 = arith.cmpi sle, %0, %146 : vector<1x768xi32>
    %148 = arith.andi %145, %147 : vector<1x768xi1>
    %149 = arith.ori %143, %148 : vector<1x768xi1>
    %c565_i32 = arith.constant 565 : i32
    %150 = vector.broadcast %c565_i32 : i32 to vector<1x768xi32>
    %151 = arith.cmpi sge, %0, %150 : vector<1x768xi32>
    %c580_i32 = arith.constant 580 : i32
    %152 = vector.broadcast %c580_i32 : i32 to vector<1x768xi32>
    %153 = arith.cmpi sle, %0, %152 : vector<1x768xi32>
    %154 = arith.andi %151, %153 : vector<1x768xi1>
    %155 = arith.ori %149, %154 : vector<1x768xi1>
    %c583_i32 = arith.constant 583 : i32
    %156 = vector.broadcast %c583_i32 : i32 to vector<1x768xi32>
    %157 = arith.cmpi sge, %0, %156 : vector<1x768xi32>
    %c598_i32 = arith.constant 598 : i32
    %158 = vector.broadcast %c598_i32 : i32 to vector<1x768xi32>
    %159 = arith.cmpi sle, %0, %158 : vector<1x768xi32>
    %160 = arith.andi %157, %159 : vector<1x768xi1>
    %161 = arith.ori %155, %160 : vector<1x768xi1>
    %c601_i32 = arith.constant 601 : i32
    %162 = vector.broadcast %c601_i32 : i32 to vector<1x768xi32>
    %163 = arith.cmpi sge, %0, %162 : vector<1x768xi32>
    %c616_i32 = arith.constant 616 : i32
    %164 = vector.broadcast %c616_i32 : i32 to vector<1x768xi32>
    %165 = arith.cmpi sle, %0, %164 : vector<1x768xi32>
    %166 = arith.andi %163, %165 : vector<1x768xi1>
    %167 = arith.ori %161, %166 : vector<1x768xi1>
    %c619_i32 = arith.constant 619 : i32
    %168 = vector.broadcast %c619_i32 : i32 to vector<1x768xi32>
    %169 = arith.cmpi sge, %0, %168 : vector<1x768xi32>
    %c634_i32 = arith.constant 634 : i32
    %170 = vector.broadcast %c634_i32 : i32 to vector<1x768xi32>
    %171 = arith.cmpi sle, %0, %170 : vector<1x768xi32>
    %172 = arith.andi %169, %171 : vector<1x768xi1>
    %173 = arith.ori %167, %172 : vector<1x768xi1>
    %c637_i32 = arith.constant 637 : i32
    %174 = vector.broadcast %c637_i32 : i32 to vector<1x768xi32>
    %175 = arith.cmpi sge, %0, %174 : vector<1x768xi32>
    %c652_i32 = arith.constant 652 : i32
    %176 = vector.broadcast %c652_i32 : i32 to vector<1x768xi32>
    %177 = arith.cmpi sle, %0, %176 : vector<1x768xi32>
    %178 = arith.andi %175, %177 : vector<1x768xi1>
    %179 = arith.ori %173, %178 : vector<1x768xi1>
    %c655_i32 = arith.constant 655 : i32
    %180 = vector.broadcast %c655_i32 : i32 to vector<1x768xi32>
    %181 = arith.cmpi sge, %0, %180 : vector<1x768xi32>
    %c670_i32 = arith.constant 670 : i32
    %182 = vector.broadcast %c670_i32 : i32 to vector<1x768xi32>
    %183 = arith.cmpi sle, %0, %182 : vector<1x768xi32>
    %184 = arith.andi %181, %183 : vector<1x768xi1>
    %185 = arith.ori %179, %184 : vector<1x768xi1>
    %c673_i32 = arith.constant 673 : i32
    %186 = vector.broadcast %c673_i32 : i32 to vector<1x768xi32>
    %187 = arith.cmpi sge, %0, %186 : vector<1x768xi32>
    %c688_i32 = arith.constant 688 : i32
    %188 = vector.broadcast %c688_i32 : i32 to vector<1x768xi32>
    %189 = arith.cmpi sle, %0, %188 : vector<1x768xi32>
    %190 = arith.andi %187, %189 : vector<1x768xi1>
    %191 = arith.ori %185, %190 : vector<1x768xi1>
    %c0 = arith.constant 0 : index
    %c0_0 = arith.constant 0 : index
    %c0_1 = arith.constant 0 : index
    %192 = vector.load %arg1[%c0, %c0_0, %c0_1] : memref<1x4x768xf32, #tpu.memory_space<vmem>>, vector<1x4x768xf32>
    %193 = vector.shape_cast %192 : vector<1x4x768xf32> to vector<4x768xf32>
    %c0_2 = arith.constant 0 : index
    %c32 = arith.constant 32 : index
    %194 = vector.load %arg5[%c0_2, %c32] : memref<20x832xf32, #tpu.memory_space<vmem>>, vector<4x768xf32>
    tpu.vector_store %arg5[%c0_2, %c32], %193 {strides = array<i32>} : memref<20x832xf32, #tpu.memory_space<vmem>>, vector<4x768xf32>,
    %c0_3 = arith.constant 0 : index
    %c13 = arith.constant 13 : index
    %195 = vector.load %arg5[%c0_3, %c13] : memref<20x832xf32, #tpu.memory_space<vmem>>, vector<4x768xf32>
    %c0_4 = arith.constant 0 : index
    %c0_5 = arith.constant 0 : index
    %196 = vector.load %arg6[%c0_4, %c0_5] : memref<180x768xf32, #tpu.memory_space<vmem>>, vector<4x768xf32>
    tpu.vector_store %arg6[%c0_4, %c0_5], %195 {strides = array<i32>} : memref<180x768xf32, #tpu.memory_space<vmem>>, vector<4x768xf32>,
    %c0_6 = arith.constant 0 : index
    %c14 = arith.constant 14 : index
    %197 = vector.load %arg5[%c0_6, %c14] : memref<20x832xf32, #tpu.memory_space<vmem>>, vector<4x768xf32>
    %c4 = arith.constant 4 : index
    %c0_7 = arith.constant 0 : index
    %198 = vector.load %arg6[%c4, %c0_7] : memref<180x768xf32, #tpu.memory_space<vmem>>, vector<4x768xf32>
    tpu.vector_store %arg6[%c4, %c0_7], %197 {strides = array<i32>} : memref<180x768xf32, #tpu.memory_space<vmem>>, vector<4x768xf32>,
    %c0_8 = arith.constant 0 : index
    %c15 = arith.constant 15 : index
    %199 = vector.load %arg5[%c0_8, %c15] : memref<20x832xf32, #tpu.memory_space<vmem>>, vector<4x768xf32>
    %c8 = arith.constant 8 : index
    %c0_9 = arith.constant 0 : index
    %200 = vector.load %arg6[%c8, %c0_9] : memref<180x768xf32, #tpu.memory_space<vmem>>, vector<4x768xf32>
    tpu.vector_store %arg6[%c8, %c0_9], %199 {strides = array<i32>} : memref<180x768xf32, #tpu.memory_space<vmem>>, vector<4x768xf32>,
    %c0_10 = arith.constant 0 : index
    %c31 = arith.constant 31 : index
    %201 = vector.load %arg5[%c0_10, %c31] : memref<20x832xf32, #tpu.memory_space<vmem>>, vector<4x768xf32>
    %c12 = arith.constant 12 : index
    %c0_11 = arith.constant 0 : index
    %202 = vector.load %arg6[%c12, %c0_11] : memref<180x768xf32, #tpu.memory_space<vmem>>, vector<4x768xf32>
    tpu.vector_store %arg6[%c12, %c0_11], %201 {strides = array<i32>} : memref<180x768xf32, #tpu.memory_space<vmem>>, vector<4x768xf32>,
    %c0_12 = arith.constant 0 : index
    %c32_13 = arith.constant 32 : index
    %203 = vector.load %arg5[%c0_12, %c32_13] : memref<20x832xf32, #tpu.memory_space<vmem>>, vector<4x768xf32>
    %c16 = arith.constant 16 : index
    %c0_14 = arith.constant 0 : index
    %204 = vector.load %arg6[%c16, %c0_14] : memref<180x768xf32, #tpu.memory_space<vmem>>, vector<4x768xf32>
    tpu.vector_store %arg6[%c16, %c0_14], %203 {strides = array<i32>} : memref<180x768xf32, #tpu.memory_space<vmem>>, vector<4x768xf32>,
    %c0_15 = arith.constant 0 : index
    %c33 = arith.constant 33 : index
    %205 = vector.load %arg5[%c0_15, %c33] : memref<20x832xf32, #tpu.memory_space<vmem>>, vector<4x768xf32>
    %c20 = arith.constant 20 : index
    %c0_16 = arith.constant 0 : index
    %206 = vector.load %arg6[%c20, %c0_16] : memref<180x768xf32, #tpu.memory_space<vmem>>, vector<4x768xf32>
    tpu.vector_store %arg6[%c20, %c0_16], %205 {strides = array<i32>} : memref<180x768xf32, #tpu.memory_space<vmem>>, vector<4x768xf32>,
    %c0_17 = arith.constant 0 : index
    %c49 = arith.constant 49 : index
    %207 = vector.load %arg5[%c0_17, %c49] : memref<20x832xf32, #tpu.memory_space<vmem>>, vector<4x768xf32>
    %c24 = arith.constant 24 : index
    %c0_18 = arith.constant 0 : index
    %208 = vector.load %arg6[%c24, %c0_18] : memref<180x768xf32, #tpu.memory_space<vmem>>, vector<4x768xf32>
    tpu.vector_store %arg6[%c24, %c0_18], %207 {strides = array<i32>} : memref<180x768xf32, #tpu.memory_space<vmem>>, vector<4x768xf32>,
    %c0_19 = arith.constant 0 : index
    %c50 = arith.constant 50 : index
    %209 = vector.load %arg5[%c0_19, %c50] : memref<20x832xf32, #tpu.memory_space<vmem>>, vector<4x768xf32>
    %c28 = arith.constant 28 : index
    %c0_20 = arith.constant 0 : index
    %210 = vector.load %arg6[%c28, %c0_20] : memref<180x768xf32, #tpu.memory_space<vmem>>, vector<4x768xf32>
    tpu.vector_store %arg6[%c28, %c0_20], %209 {strides = array<i32>} : memref<180x768xf32, #tpu.memory_space<vmem>>, vector<4x768xf32>,
    %c0_21 = arith.constant 0 : index
    %c51 = arith.constant 51 : index
    %211 = vector.load %arg5[%c0_21, %c51] : memref<20x832xf32, #tpu.memory_space<vmem>>, vector<4x768xf32>
    %c32_22 = arith.constant 32 : index
    %c0_23 = arith.constant 0 : index
    %212 = vector.load %arg6[%c32_22, %c0_23] : memref<180x768xf32, #tpu.memory_space<vmem>>, vector<4x768xf32>
    tpu.vector_store %arg6[%c32_22, %c0_23], %211 {strides = array<i32>} : memref<180x768xf32, #tpu.memory_space<vmem>>, vector<4x768xf32>,
    %c0_24 = arith.constant 0 : index
    %c0_25 = arith.constant 0 : index
    %213 = vector.load %arg2[%c0_24, %c0_25] : memref<20x180xf32, #tpu.memory_space<vmem>>, vector<4x36xf32>
    %c0_26 = arith.constant 0 : index
    %c0_27 = arith.constant 0 : index
    %214 = vector.load %arg6[%c0_26, %c0_27] : memref<180x768xf32, #tpu.memory_space<vmem>>, vector<36x768xf32>
    %cst = arith.constant dense<0.000000e+00> : vector<4x768xf32>
    %215 = tpu.matmul %213, %214, %cst {dimension_numbers = #tpu.dot_dimension_numbers<[1], [0], [0], [1], [0, 0, 1, 1], [], []>} : vector<4x36xf32>, vector<36x768xf32>, vector<4x768xf32> -> vector<4x768xf32>
    %c0_28 = arith.constant 0 : index
    %c0_29 = arith.constant 0 : index
    %216 = vector.load %arg3[%c0_28, %c0_29] : memref<20x1xf32, #tpu.memory_space<vmem>>, vector<4x1xf32>
    %217 = vector.broadcast %216 : vector<4x1xf32> to vector<4x768xf32>
    %218 = arith.addf %215, %217 : vector<4x768xf32>
    %cst_30 = arith.constant 0.000000e+00 : f32
    %219 = vector.broadcast %cst_30 : f32 to vector<4x768xf32>
    %220 = arith.cmpf oge, %218, %219 : vector<4x768xf32>
    %cst_31 = arith.constant 2.000000e-01 : f32
    %221 = vector.broadcast %cst_31 : f32 to vector<4x768xf32>
    %222 = arith.mulf %221, %218 : vector<4x768xf32>
    %223 = arith.select %220, %218, %222 : vector<4x768xi1>, vector<4x768xf32>
    %cst_32 = arith.constant 0.000000e+00 : f32
    %224 = vector.shape_cast %191 : vector<1x768xi1> to vector<1x768xi1>
    %225 = vector.broadcast %224 : vector<1x768xi1> to vector<4x768xi1>
    %226 = vector.broadcast %cst_32 : f32 to vector<4x768xf32>
    %227 = arith.select %225, %223, %226 : vector<4x768xi1>, vector<4x768xf32>
    %c4_33 = arith.constant 4 : index
    %c32_34 = arith.constant 32 : index
    %228 = vector.load %arg5[%c4_33, %c32_34] : memref<20x832xf32, #tpu.memory_space<vmem>>, vector<4x768xf32>
    tpu.vector_store %arg5[%c4_33, %c32_34], %227 {strides = array<i32>} : memref<20x832xf32, #tpu.memory_space<vmem>>, vector<4x768xf32>,
    %c4_35 = arith.constant 4 : index
    %c13_36 = arith.constant 13 : index
    %229 = vector.load %arg5[%c4_35, %c13_36] : memref<20x832xf32, #tpu.memory_space<vmem>>, vector<4x768xf32>
    %c36 = arith.constant 36 : index
    %c0_37 = arith.constant 0 : index
    %230 = vector.load %arg6[%c36, %c0_37] : memref<180x768xf32, #tpu.memory_space<vmem>>, vector<4x768xf32>
    tpu.vector_store %arg6[%c36, %c0_37], %229 {strides = array<i32>} : memref<180x768xf32, #tpu.memory_space<vmem>>, vector<4x768xf32>,
    %c4_38 = arith.constant 4 : index
    %c14_39 = arith.constant 14 : index
    %231 = vector.load %arg5[%c4_38, %c14_39] : memref<20x832xf32, #tpu.memory_space<vmem>>, vector<4x768xf32>
    %c40 = arith.constant 40 : index
    %c0_40 = arith.constant 0 : index
    %232 = vector.load %arg6[%c40, %c0_40] : memref<180x768xf32, #tpu.memory_space<vmem>>, vector<4x768xf32>
    tpu.vector_store %arg6[%c40, %c0_40], %231 {strides = array<i32>} : memref<180x768xf32, #tpu.memory_space<vmem>>, vector<4x768xf32>,
    %c4_41 = arith.constant 4 : index
    %c15_42 = arith.constant 15 : index
    %233 = vector.load %arg5[%c4_41, %c15_42] : memref<20x832xf32, #tpu.memory_space<vmem>>, vector<4x768xf32>
    %c44 = arith.constant 44 : index
    %c0_43 = arith.constant 0 : index
    %234 = vector.load %arg6[%c44, %c0_43] : memref<180x768xf32, #tpu.memory_space<vmem>>, vector<4x768xf32>
    tpu.vector_store %arg6[%c44, %c0_43], %233 {strides = array<i32>} : memref<180x768xf32, #tpu.memory_space<vmem>>, vector<4x768xf32>,
    %c4_44 = arith.constant 4 : index
    %c31_45 = arith.constant 31 : index
    %235 = vector.load %arg5[%c4_44, %c31_45] : memref<20x832xf32, #tpu.memory_space<vmem>>, vector<4x768xf32>
    %c48 = arith.constant 48 : index
    %c0_46 = arith.constant 0 : index
    %236 = vector.load %arg6[%c48, %c0_46] : memref<180x768xf32, #tpu.memory_space<vmem>>, vector<4x768xf32>
    tpu.vector_store %arg6[%c48, %c0_46], %235 {strides = array<i32>} : memref<180x768xf32, #tpu.memory_space<vmem>>, vector<4x768xf32>,
    %c4_47 = arith.constant 4 : index
    %c32_48 = arith.constant 32 : index
    %237 = vector.load %arg5[%c4_47, %c32_48] : memref<20x832xf32, #tpu.memory_space<vmem>>, vector<4x768xf32>
    %c52 = arith.constant 52 : index
    %c0_49 = arith.constant 0 : index
    %238 = vector.load %arg6[%c52, %c0_49] : memref<180x768xf32, #tpu.memory_space<vmem>>, vector<4x768xf32>
    tpu.vector_store %arg6[%c52, %c0_49], %237 {strides = array<i32>} : memref<180x768xf32, #tpu.memory_space<vmem>>, vector<4x768xf32>,
    %c4_50 = arith.constant 4 : index
    %c33_51 = arith.constant 33 : index
    %239 = vector.load %arg5[%c4_50, %c33_51] : memref<20x832xf32, #tpu.memory_space<vmem>>, vector<4x768xf32>
    %c56 = arith.constant 56 : index
    %c0_52 = arith.constant 0 : index
    %240 = vector.load %arg6[%c56, %c0_52] : memref<180x768xf32, #tpu.memory_space<vmem>>, vector<4x768xf32>
    tpu.vector_store %arg6[%c56, %c0_52], %239 {strides = array<i32>} : memref<180x768xf32, #tpu.memory_space<vmem>>, vector<4x768xf32>,
    %c4_53 = arith.constant 4 : index
    %c49_54 = arith.constant 49 : index
    %241 = vector.load %arg5[%c4_53, %c49_54] : memref<20x832xf32, #tpu.memory_space<vmem>>, vector<4x768xf32>
    %c60 = arith.constant 60 : index
    %c0_55 = arith.constant 0 : index
    %242 = vector.load %arg6[%c60, %c0_55] : memref<180x768xf32, #tpu.memory_space<vmem>>, vector<4x768xf32>
    tpu.vector_store %arg6[%c60, %c0_55], %241 {strides = array<i32>} : memref<180x768xf32, #tpu.memory_space<vmem>>, vector<4x768xf32>,
    %c4_56 = arith.constant 4 : index
    %c50_57 = arith.constant 50 : index
    %243 = vector.load %arg5[%c4_56, %c50_57] : memref<20x832xf32, #tpu.memory_space<vmem>>, vector<4x768xf32>
    %c64 = arith.constant 64 : index
    %c0_58 = arith.constant 0 : index
    %244 = vector.load %arg6[%c64, %c0_58] : memref<180x768xf32, #tpu.memory_space<vmem>>, vector<4x768xf32>
    tpu.vector_store %arg6[%c64, %c0_58], %243 {strides = array<i32>} : memref<180x768xf32, #tpu.memory_space<vmem>>, vector<4x768xf32>,
    %c4_59 = arith.constant 4 : index
    %c51_60 = arith.constant 51 : index
    %245 = vector.load %arg5[%c4_59, %c51_60] : memref<20x832xf32, #tpu.memory_space<vmem>>, vector<4x768xf32>
    %c68 = arith.constant 68 : index
    %c0_61 = arith.constant 0 : index
    %246 = vector.load %arg6[%c68, %c0_61] : memref<180x768xf32, #tpu.memory_space<vmem>>, vector<4x768xf32>
    tpu.vector_store %arg6[%c68, %c0_61], %245 {strides = array<i32>} : memref<180x768xf32, #tpu.memory_space<vmem>>, vector<4x768xf32>,
    %c4_62 = arith.constant 4 : index
    %c0_63 = arith.constant 0 : index
    %247 = vector.load %arg2[%c4_62, %c0_63] : memref<20x180xf32, #tpu.memory_space<vmem>>, vector<4x72xf32>
    %c0_64 = arith.constant 0 : index
    %c0_65 = arith.constant 0 : index
    %248 = vector.load %arg6[%c0_64, %c0_65] : memref<180x768xf32, #tpu.memory_space<vmem>>, vector<72x768xf32>
    %cst_66 = arith.constant dense<0.000000e+00> : vector<4x768xf32>
    %249 = tpu.matmul %247, %248, %cst_66 {dimension_numbers = #tpu.dot_dimension_numbers<[1], [0], [0], [1], [0, 0, 1, 1], [], []>} : vector<4x72xf32>, vector<72x768xf32>, vector<4x768xf32> -> vector<4x768xf32>
    %c4_67 = arith.constant 4 : index
    %c0_68 = arith.constant 0 : index
    %250 = vector.load %arg3[%c4_67, %c0_68] : memref<20x1xf32, #tpu.memory_space<vmem>>, vector<4x1xf32>
    %251 = vector.broadcast %250 : vector<4x1xf32> to vector<4x768xf32>
    %252 = arith.addf %249, %251 : vector<4x768xf32>
    %cst_69 = arith.constant 0.000000e+00 : f32
    %253 = vector.broadcast %cst_69 : f32 to vector<4x768xf32>
    %254 = arith.cmpf oge, %252, %253 : vector<4x768xf32>
    %cst_70 = arith.constant 2.000000e-01 : f32
    %255 = vector.broadcast %cst_70 : f32 to vector<4x768xf32>
    %256 = arith.mulf %255, %252 : vector<4x768xf32>
    %257 = arith.select %254, %252, %256 : vector<4x768xi1>, vector<4x768xf32>
    %cst_71 = arith.constant 0.000000e+00 : f32
    %258 = vector.shape_cast %191 : vector<1x768xi1> to vector<1x768xi1>
    %259 = vector.broadcast %258 : vector<1x768xi1> to vector<4x768xi1>
    %260 = vector.broadcast %cst_71 : f32 to vector<4x768xf32>
    %261 = arith.select %259, %257, %260 : vector<4x768xi1>, vector<4x768xf32>
    %c8_72 = arith.constant 8 : index
    %c32_73 = arith.constant 32 : index
    %262 = vector.load %arg5[%c8_72, %c32_73] : memref<20x832xf32, #tpu.memory_space<vmem>>, vector<4x768xf32>
    tpu.vector_store %arg5[%c8_72, %c32_73], %261 {strides = array<i32>} : memref<20x832xf32, #tpu.memory_space<vmem>>, vector<4x768xf32>,
    %c8_74 = arith.constant 8 : index
    %c13_75 = arith.constant 13 : index
    %263 = vector.load %arg5[%c8_74, %c13_75] : memref<20x832xf32, #tpu.memory_space<vmem>>, vector<4x768xf32>
    %c72 = arith.constant 72 : index
    %c0_76 = arith.constant 0 : index
    %264 = vector.load %arg6[%c72, %c0_76] : memref<180x768xf32, #tpu.memory_space<vmem>>, vector<4x768xf32>
    tpu.vector_store %arg6[%c72, %c0_76], %263 {strides = array<i32>} : memref<180x768xf32, #tpu.memory_space<vmem>>, vector<4x768xf32>,
    %c8_77 = arith.constant 8 : index
    %c14_78 = arith.constant 14 : index
    %265 = vector.load %arg5[%c8_77, %c14_78] : memref<20x832xf32, #tpu.memory_space<vmem>>, vector<4x768xf32>
    %c76 = arith.constant 76 : index
    %c0_79 = arith.constant 0 : index
    %266 = vector.load %arg6[%c76, %c0_79] : memref<180x768xf32, #tpu.memory_space<vmem>>, vector<4x768xf32>
    tpu.vector_store %arg6[%c76, %c0_79], %265 {strides = array<i32>} : memref<180x768xf32, #tpu.memory_space<vmem>>, vector<4x768xf32>,
    %c8_80 = arith.constant 8 : index
    %c15_81 = arith.constant 15 : index
    %267 = vector.load %arg5[%c8_80, %c15_81] : memref<20x832xf32, #tpu.memory_space<vmem>>, vector<4x768xf32>
    %c80 = arith.constant 80 : index
    %c0_82 = arith.constant 0 : index
    %268 = vector.load %arg6[%c80, %c0_82] : memref<180x768xf32, #tpu.memory_space<vmem>>, vector<4x768xf32>
    tpu.vector_store %arg6[%c80, %c0_82], %267 {strides = array<i32>} : memref<180x768xf32, #tpu.memory_space<vmem>>, vector<4x768xf32>,
    %c8_83 = arith.constant 8 : index
    %c31_84 = arith.constant 31 : index
    %269 = vector.load %arg5[%c8_83, %c31_84] : memref<20x832xf32, #tpu.memory_space<vmem>>, vector<4x768xf32>
    %c84 = arith.constant 84 : index
    %c0_85 = arith.constant 0 : index
    %270 = vector.load %arg6[%c84, %c0_85] : memref<180x768xf32, #tpu.memory_space<vmem>>, vector<4x768xf32>
    tpu.vector_store %arg6[%c84, %c0_85], %269 {strides = array<i32>} : memref<180x768xf32, #tpu.memory_space<vmem>>, vector<4x768xf32>,
    %c8_86 = arith.constant 8 : index
    %c32_87 = arith.constant 32 : index
    %271 = vector.load %arg5[%c8_86, %c32_87] : memref<20x832xf32, #tpu.memory_space<vmem>>, vector<4x768xf32>
    %c88 = arith.constant 88 : index
    %c0_88 = arith.constant 0 : index
    %272 = vector.load %arg6[%c88, %c0_88] : memref<180x768xf32, #tpu.memory_space<vmem>>, vector<4x768xf32>
    tpu.vector_store %arg6[%c88, %c0_88], %271 {strides = array<i32>} : memref<180x768xf32, #tpu.memory_space<vmem>>, vector<4x768xf32>,
    %c8_89 = arith.constant 8 : index
    %c33_90 = arith.constant 33 : index
    %273 = vector.load %arg5[%c8_89, %c33_90] : memref<20x832xf32, #tpu.memory_space<vmem>>, vector<4x768xf32>
    %c92 = arith.constant 92 : index
    %c0_91 = arith.constant 0 : index
    %274 = vector.load %arg6[%c92, %c0_91] : memref<180x768xf32, #tpu.memory_space<vmem>>, vector<4x768xf32>
    tpu.vector_store %arg6[%c92, %c0_91], %273 {strides = array<i32>} : memref<180x768xf32, #tpu.memory_space<vmem>>, vector<4x768xf32>,
    %c8_92 = arith.constant 8 : index
    %c49_93 = arith.constant 49 : index
    %275 = vector.load %arg5[%c8_92, %c49_93] : memref<20x832xf32, #tpu.memory_space<vmem>>, vector<4x768xf32>
    %c96 = arith.constant 96 : index
    %c0_94 = arith.constant 0 : index
    %276 = vector.load %arg6[%c96, %c0_94] : memref<180x768xf32, #tpu.memory_space<vmem>>, vector<4x768xf32>
    tpu.vector_store %arg6[%c96, %c0_94], %275 {strides = array<i32>} : memref<180x768xf32, #tpu.memory_space<vmem>>, vector<4x768xf32>,
    %c8_95 = arith.constant 8 : index
    %c50_96 = arith.constant 50 : index
    %277 = vector.load %arg5[%c8_95, %c50_96] : memref<20x832xf32, #tpu.memory_space<vmem>>, vector<4x768xf32>
    %c100 = arith.constant 100 : index
    %c0_97 = arith.constant 0 : index
    %278 = vector.load %arg6[%c100, %c0_97] : memref<180x768xf32, #tpu.memory_space<vmem>>, vector<4x768xf32>
    tpu.vector_store %arg6[%c100, %c0_97], %277 {strides = array<i32>} : memref<180x768xf32, #tpu.memory_space<vmem>>, vector<4x768xf32>,
    %c8_98 = arith.constant 8 : index
    %c51_99 = arith.constant 51 : index
    %279 = vector.load %arg5[%c8_98, %c51_99] : memref<20x832xf32, #tpu.memory_space<vmem>>, vector<4x768xf32>
    %c104 = arith.constant 104 : index
    %c0_100 = arith.constant 0 : index
    %280 = vector.load %arg6[%c104, %c0_100] : memref<180x768xf32, #tpu.memory_space<vmem>>, vector<4x768xf32>
    tpu.vector_store %arg6[%c104, %c0_100], %279 {strides = array<i32>} : memref<180x768xf32, #tpu.memory_space<vmem>>, vector<4x768xf32>,
    %c8_101 = arith.constant 8 : index
    %c0_102 = arith.constant 0 : index
    %281 = vector.load %arg2[%c8_101, %c0_102] : memref<20x180xf32, #tpu.memory_space<vmem>>, vector<4x108xf32>
    %c0_103 = arith.constant 0 : index
    %c0_104 = arith.constant 0 : index
    %282 = vector.load %arg6[%c0_103, %c0_104] : memref<180x768xf32, #tpu.memory_space<vmem>>, vector<108x768xf32>
    %cst_105 = arith.constant dense<0.000000e+00> : vector<4x768xf32>
    %283 = tpu.matmul %281, %282, %cst_105 {dimension_numbers = #tpu.dot_dimension_numbers<[1], [0], [0], [1], [0, 0, 1, 1], [], []>} : vector<4x108xf32>, vector<108x768xf32>, vector<4x768xf32> -> vector<4x768xf32>
    %c8_106 = arith.constant 8 : index
    %c0_107 = arith.constant 0 : index
    %284 = vector.load %arg3[%c8_106, %c0_107] : memref<20x1xf32, #tpu.memory_space<vmem>>, vector<4x1xf32>
    %285 = vector.broadcast %284 : vector<4x1xf32> to vector<4x768xf32>
    %286 = arith.addf %283, %285 : vector<4x768xf32>
    %cst_108 = arith.constant 0.000000e+00 : f32
    %287 = vector.broadcast %cst_108 : f32 to vector<4x768xf32>
    %288 = arith.cmpf oge, %286, %287 : vector<4x768xf32>
    %cst_109 = arith.constant 2.000000e-01 : f32
    %289 = vector.broadcast %cst_109 : f32 to vector<4x768xf32>
    %290 = arith.mulf %289, %286 : vector<4x768xf32>
    %291 = arith.select %288, %286, %290 : vector<4x768xi1>, vector<4x768xf32>
    %cst_110 = arith.constant 0.000000e+00 : f32
    %292 = vector.shape_cast %191 : vector<1x768xi1> to vector<1x768xi1>
    %293 = vector.broadcast %292 : vector<1x768xi1> to vector<4x768xi1>
    %294 = vector.broadcast %cst_110 : f32 to vector<4x768xf32>
    %295 = arith.select %293, %291, %294 : vector<4x768xi1>, vector<4x768xf32>
    %c12_111 = arith.constant 12 : index
    %c32_112 = arith.constant 32 : index
    %296 = vector.load %arg5[%c12_111, %c32_112] : memref<20x832xf32, #tpu.memory_space<vmem>>, vector<4x768xf32>
    tpu.vector_store %arg5[%c12_111, %c32_112], %295 {strides = array<i32>} : memref<20x832xf32, #tpu.memory_space<vmem>>, vector<4x768xf32>,
    %c12_113 = arith.constant 12 : index
    %c13_114 = arith.constant 13 : index
    %297 = vector.load %arg5[%c12_113, %c13_114] : memref<20x832xf32, #tpu.memory_space<vmem>>, vector<4x768xf32>
    %c108 = arith.constant 108 : index
    %c0_115 = arith.constant 0 : index
    %298 = vector.load %arg6[%c108, %c0_115] : memref<180x768xf32, #tpu.memory_space<vmem>>, vector<4x768xf32>
    tpu.vector_store %arg6[%c108, %c0_115], %297 {strides = array<i32>} : memref<180x768xf32, #tpu.memory_space<vmem>>, vector<4x768xf32>,
    %c12_116 = arith.constant 12 : index
    %c14_117 = arith.constant 14 : index
    %299 = vector.load %arg5[%c12_116, %c14_117] : memref<20x832xf32, #tpu.memory_space<vmem>>, vector<4x768xf32>
    %c112 = arith.constant 112 : index
    %c0_118 = arith.constant 0 : index
    %300 = vector.load %arg6[%c112, %c0_118] : memref<180x768xf32, #tpu.memory_space<vmem>>, vector<4x768xf32>
    tpu.vector_store %arg6[%c112, %c0_118], %299 {strides = array<i32>} : memref<180x768xf32, #tpu.memory_space<vmem>>, vector<4x768xf32>,
    %c12_119 = arith.constant 12 : index
    %c15_120 = arith.constant 15 : index
    %301 = vector.load %arg5[%c12_119, %c15_120] : memref<20x832xf32, #tpu.memory_space<vmem>>, vector<4x768xf32>
    %c116 = arith.constant 116 : index
    %c0_121 = arith.constant 0 : index
    %302 = vector.load %arg6[%c116, %c0_121] : memref<180x768xf32, #tpu.memory_space<vmem>>, vector<4x768xf32>
    tpu.vector_store %arg6[%c116, %c0_121], %301 {strides = array<i32>} : memref<180x768xf32, #tpu.memory_space<vmem>>, vector<4x768xf32>,
    %c12_122 = arith.constant 12 : index
    %c31_123 = arith.constant 31 : index
    %303 = vector.load %arg5[%c12_122, %c31_123] : memref<20x832xf32, #tpu.memory_space<vmem>>, vector<4x768xf32>
    %c120 = arith.constant 120 : index
    %c0_124 = arith.constant 0 : index
    %304 = vector.load %arg6[%c120, %c0_124] : memref<180x768xf32, #tpu.memory_space<vmem>>, vector<4x768xf32>
    tpu.vector_store %arg6[%c120, %c0_124], %303 {strides = array<i32>} : memref<180x768xf32, #tpu.memory_space<vmem>>, vector<4x768xf32>,
    %c12_125 = arith.constant 12 : index
    %c32_126 = arith.constant 32 : index
    %305 = vector.load %arg5[%c12_125, %c32_126] : memref<20x832xf32, #tpu.memory_space<vmem>>, vector<4x768xf32>
    %c124 = arith.constant 124 : index
    %c0_127 = arith.constant 0 : index
    %306 = vector.load %arg6[%c124, %c0_127] : memref<180x768xf32, #tpu.memory_space<vmem>>, vector<4x768xf32>
    tpu.vector_store %arg6[%c124, %c0_127], %305 {strides = array<i32>} : memref<180x768xf32, #tpu.memory_space<vmem>>, vector<4x768xf32>,
    %c12_128 = arith.constant 12 : index
    %c33_129 = arith.constant 33 : index
    %307 = vector.load %arg5[%c12_128, %c33_129] : memref<20x832xf32, #tpu.memory_space<vmem>>, vector<4x768xf32>
    %c128 = arith.constant 128 : index
    %c0_130 = arith.constant 0 : index
    %308 = vector.load %arg6[%c128, %c0_130] : memref<180x768xf32, #tpu.memory_space<vmem>>, vector<4x768xf32>
    tpu.vector_store %arg6[%c128, %c0_130], %307 {strides = array<i32>} : memref<180x768xf32, #tpu.memory_space<vmem>>, vector<4x768xf32>,
    %c12_131 = arith.constant 12 : index
    %c49_132 = arith.constant 49 : index
    %309 = vector.load %arg5[%c12_131, %c49_132] : memref<20x832xf32, #tpu.memory_space<vmem>>, vector<4x768xf32>
    %c132 = arith.constant 132 : index
    %c0_133 = arith.constant 0 : index
    %310 = vector.load %arg6[%c132, %c0_133] : memref<180x768xf32, #tpu.memory_space<vmem>>, vector<4x768xf32>
    tpu.vector_store %arg6[%c132, %c0_133], %309 {strides = array<i32>} : memref<180x768xf32, #tpu.memory_space<vmem>>, vector<4x768xf32>,
    %c12_134 = arith.constant 12 : index
    %c50_135 = arith.constant 50 : index
    %311 = vector.load %arg5[%c12_134, %c50_135] : memref<20x832xf32, #tpu.memory_space<vmem>>, vector<4x768xf32>
    %c136 = arith.constant 136 : index
    %c0_136 = arith.constant 0 : index
    %312 = vector.load %arg6[%c136, %c0_136] : memref<180x768xf32, #tpu.memory_space<vmem>>, vector<4x768xf32>
    tpu.vector_store %arg6[%c136, %c0_136], %311 {strides = array<i32>} : memref<180x768xf32, #tpu.memory_space<vmem>>, vector<4x768xf32>,
    %c12_137 = arith.constant 12 : index
    %c51_138 = arith.constant 51 : index
    %313 = vector.load %arg5[%c12_137, %c51_138] : memref<20x832xf32, #tpu.memory_space<vmem>>, vector<4x768xf32>
    %c140 = arith.constant 140 : index
    %c0_139 = arith.constant 0 : index
    %314 = vector.load %arg6[%c140, %c0_139] : memref<180x768xf32, #tpu.memory_space<vmem>>, vector<4x768xf32>
    tpu.vector_store %arg6[%c140, %c0_139], %313 {strides = array<i32>} : memref<180x768xf32, #tpu.memory_space<vmem>>, vector<4x768xf32>,
    %c12_140 = arith.constant 12 : index
    %c0_141 = arith.constant 0 : index
    %315 = vector.load %arg2[%c12_140, %c0_141] : memref<20x180xf32, #tpu.memory_space<vmem>>, vector<4x144xf32>
    %c0_142 = arith.constant 0 : index
    %c0_143 = arith.constant 0 : index
    %316 = vector.load %arg6[%c0_142, %c0_143] : memref<180x768xf32, #tpu.memory_space<vmem>>, vector<144x768xf32>
    %cst_144 = arith.constant dense<0.000000e+00> : vector<4x768xf32>
    %317 = tpu.matmul %315, %316, %cst_144 {dimension_numbers = #tpu.dot_dimension_numbers<[1], [0], [0], [1], [0, 0, 1, 1], [], []>} : vector<4x144xf32>, vector<144x768xf32>, vector<4x768xf32> -> vector<4x768xf32>
    %c12_145 = arith.constant 12 : index
    %c0_146 = arith.constant 0 : index
    %318 = vector.load %arg3[%c12_145, %c0_146] : memref<20x1xf32, #tpu.memory_space<vmem>>, vector<4x1xf32>
    %319 = vector.broadcast %318 : vector<4x1xf32> to vector<4x768xf32>
    %320 = arith.addf %317, %319 : vector<4x768xf32>
    %cst_147 = arith.constant 0.000000e+00 : f32
    %321 = vector.broadcast %cst_147 : f32 to vector<4x768xf32>
    %322 = arith.cmpf oge, %320, %321 : vector<4x768xf32>
    %cst_148 = arith.constant 2.000000e-01 : f32
    %323 = vector.broadcast %cst_148 : f32 to vector<4x768xf32>
    %324 = arith.mulf %323, %320 : vector<4x768xf32>
    %325 = arith.select %322, %320, %324 : vector<4x768xi1>, vector<4x768xf32>
    %cst_149 = arith.constant 0.000000e+00 : f32
    %326 = vector.shape_cast %191 : vector<1x768xi1> to vector<1x768xi1>
    %327 = vector.broadcast %326 : vector<1x768xi1> to vector<4x768xi1>
    %328 = vector.broadcast %cst_149 : f32 to vector<4x768xf32>
    %329 = arith.select %327, %325, %328 : vector<4x768xi1>, vector<4x768xf32>
    %c16_150 = arith.constant 16 : index
    %c32_151 = arith.constant 32 : index
    %330 = vector.load %arg5[%c16_150, %c32_151] : memref<20x832xf32, #tpu.memory_space<vmem>>, vector<4x768xf32>
    tpu.vector_store %arg5[%c16_150, %c32_151], %329 {strides = array<i32>} : memref<20x832xf32, #tpu.memory_space<vmem>>, vector<4x768xf32>,
    %c16_152 = arith.constant 16 : index
    %c13_153 = arith.constant 13 : index
    %331 = vector.load %arg5[%c16_152, %c13_153] : memref<20x832xf32, #tpu.memory_space<vmem>>, vector<4x768xf32>
    %c144 = arith.constant 144 : index
    %c0_154 = arith.constant 0 : index
    %332 = vector.load %arg6[%c144, %c0_154] : memref<180x768xf32, #tpu.memory_space<vmem>>, vector<4x768xf32>
    tpu.vector_store %arg6[%c144, %c0_154], %331 {strides = array<i32>} : memref<180x768xf32, #tpu.memory_space<vmem>>, vector<4x768xf32>,
    %c16_155 = arith.constant 16 : index
    %c14_156 = arith.constant 14 : index
    %333 = vector.load %arg5[%c16_155, %c14_156] : memref<20x832xf32, #tpu.memory_space<vmem>>, vector<4x768xf32>
    %c148 = arith.constant 148 : index
    %c0_157 = arith.constant 0 : index
    %334 = vector.load %arg6[%c148, %c0_157] : memref<180x768xf32, #tpu.memory_space<vmem>>, vector<4x768xf32>
    tpu.vector_store %arg6[%c148, %c0_157], %333 {strides = array<i32>} : memref<180x768xf32, #tpu.memory_space<vmem>>, vector<4x768xf32>,
    %c16_158 = arith.constant 16 : index
    %c15_159 = arith.constant 15 : index
    %335 = vector.load %arg5[%c16_158, %c15_159] : memref<20x832xf32, #tpu.memory_space<vmem>>, vector<4x768xf32>
    %c152 = arith.constant 152 : index
    %c0_160 = arith.constant 0 : index
    %336 = vector.load %arg6[%c152, %c0_160] : memref<180x768xf32, #tpu.memory_space<vmem>>, vector<4x768xf32>
    tpu.vector_store %arg6[%c152, %c0_160], %335 {strides = array<i32>} : memref<180x768xf32, #tpu.memory_space<vmem>>, vector<4x768xf32>,
    %c16_161 = arith.constant 16 : index
    %c31_162 = arith.constant 31 : index
    %337 = vector.load %arg5[%c16_161, %c31_162] : memref<20x832xf32, #tpu.memory_space<vmem>>, vector<4x768xf32>
    %c156 = arith.constant 156 : index
    %c0_163 = arith.constant 0 : index
    %338 = vector.load %arg6[%c156, %c0_163] : memref<180x768xf32, #tpu.memory_space<vmem>>, vector<4x768xf32>
    tpu.vector_store %arg6[%c156, %c0_163], %337 {strides = array<i32>} : memref<180x768xf32, #tpu.memory_space<vmem>>, vector<4x768xf32>,
    %c16_164 = arith.constant 16 : index
    %c32_165 = arith.constant 32 : index
    %339 = vector.load %arg5[%c16_164, %c32_165] : memref<20x832xf32, #tpu.memory_space<vmem>>, vector<4x768xf32>
    %c160 = arith.constant 160 : index
    %c0_166 = arith.constant 0 : index
    %340 = vector.load %arg6[%c160, %c0_166] : memref<180x768xf32, #tpu.memory_space<vmem>>, vector<4x768xf32>
    tpu.vector_store %arg6[%c160, %c0_166], %339 {strides = array<i32>} : memref<180x768xf32, #tpu.memory_space<vmem>>, vector<4x768xf32>,
    %c16_167 = arith.constant 16 : index
    %c33_168 = arith.constant 33 : index
    %341 = vector.load %arg5[%c16_167, %c33_168] : memref<20x832xf32, #tpu.memory_space<vmem>>, vector<4x768xf32>
    %c164 = arith.constant 164 : index
    %c0_169 = arith.constant 0 : index
    %342 = vector.load %arg6[%c164, %c0_169] : memref<180x768xf32, #tpu.memory_space<vmem>>, vector<4x768xf32>
    tpu.vector_store %arg6[%c164, %c0_169], %341 {strides = array<i32>} : memref<180x768xf32, #tpu.memory_space<vmem>>, vector<4x768xf32>,
    %c16_170 = arith.constant 16 : index
    %c49_171 = arith.constant 49 : index
    %343 = vector.load %arg5[%c16_170, %c49_171] : memref<20x832xf32, #tpu.memory_space<vmem>>, vector<4x768xf32>
    %c168 = arith.constant 168 : index
    %c0_172 = arith.constant 0 : index
    %344 = vector.load %arg6[%c168, %c0_172] : memref<180x768xf32, #tpu.memory_space<vmem>>, vector<4x768xf32>
    tpu.vector_store %arg6[%c168, %c0_172], %343 {strides = array<i32>} : memref<180x768xf32, #tpu.memory_space<vmem>>, vector<4x768xf32>,
    %c16_173 = arith.constant 16 : index
    %c50_174 = arith.constant 50 : index
    %345 = vector.load %arg5[%c16_173, %c50_174] : memref<20x832xf32, #tpu.memory_space<vmem>>, vector<4x768xf32>
    %c172 = arith.constant 172 : index
    %c0_175 = arith.constant 0 : index
    %346 = vector.load %arg6[%c172, %c0_175] : memref<180x768xf32, #tpu.memory_space<vmem>>, vector<4x768xf32>
    tpu.vector_store %arg6[%c172, %c0_175], %345 {strides = array<i32>} : memref<180x768xf32, #tpu.memory_space<vmem>>, vector<4x768xf32>,
    %c16_176 = arith.constant 16 : index
    %c51_177 = arith.constant 51 : index
    %347 = vector.load %arg5[%c16_176, %c51_177] : memref<20x832xf32, #tpu.memory_space<vmem>>, vector<4x768xf32>
    %c176 = arith.constant 176 : index
    %c0_178 = arith.constant 0 : index
    %348 = vector.load %arg6[%c176, %c0_178] : memref<180x768xf32, #tpu.memory_space<vmem>>, vector<4x768xf32>
    tpu.vector_store %arg6[%c176, %c0_178], %347 {strides = array<i32>} : memref<180x768xf32, #tpu.memory_space<vmem>>, vector<4x768xf32>,
    %c16_179 = arith.constant 16 : index
    %c0_180 = arith.constant 0 : index
    %349 = vector.load %arg2[%c16_179, %c0_180] : memref<20x180xf32, #tpu.memory_space<vmem>>, vector<4x180xf32>
    %c0_181 = arith.constant 0 : index
    %c0_182 = arith.constant 0 : index
    %350 = vector.load %arg6[%c0_181, %c0_182] : memref<180x768xf32, #tpu.memory_space<vmem>>, vector<180x768xf32>
    %cst_183 = arith.constant dense<0.000000e+00> : vector<4x768xf32>
    %351 = tpu.matmul %349, %350, %cst_183 {dimension_numbers = #tpu.dot_dimension_numbers<[1], [0], [0], [1], [0, 0, 1, 1], [], []>} : vector<4x180xf32>, vector<180x768xf32>, vector<4x768xf32> -> vector<4x768xf32>
    %c16_184 = arith.constant 16 : index
    %c0_185 = arith.constant 0 : index
    %352 = vector.load %arg3[%c16_184, %c0_185] : memref<20x1xf32, #tpu.memory_space<vmem>>, vector<4x1xf32>
    %353 = vector.broadcast %352 : vector<4x1xf32> to vector<4x768xf32>
    %354 = arith.addf %351, %353 : vector<4x768xf32>
    %c0_186 = arith.constant 0 : index
    %c0_187 = arith.constant 0 : index
    %c0_188 = arith.constant 0 : index
    %355 = vector.load %arg4[%c0_186, %c0_187, %c0_188] : memref<1x4x768xf32, #tpu.memory_space<vmem>>, vector<1x4x768xf32>
    %356 = vector.shape_cast %355 : vector<1x4x768xf32> to vector<4x768xf32>
    %357 = vector.shape_cast %354 : vector<4x768xf32> to vector<1x4x768xf32>
    tpu.vector_store %arg4[%c0_186, %c0_187, %c0_188], %357 {strides = array<i32>} : memref<1x4x768xf32, #tpu.memory_space<vmem>>, vector<1x4x768xf32>,
    return
  }
  func.func @transform_0(%arg0: i32) -> (i32, i32, i32) {
    %c0_i32 = arith.constant 0 : i32
    %c0_i32_0 = arith.constant 0 : i32
    %c0_i32_1 = arith.constant 0 : i32
    return %arg0, %c0_i32, %c0_i32_0 : i32, i32, i32
  }
  func.func @transform_1(%arg0: i32) -> (i32, i32) {
    %c0_i32 = arith.constant 0 : i32
    %c0_i32_0 = arith.constant 0 : i32
    %c0_i32_1 = arith.constant 0 : i32
    return %c0_i32, %c0_i32_0 : i32, i32
  }
  func.func @transform_2(%arg0: i32) -> (i32, i32) {
    %c0_i32 = arith.constant 0 : i32
    %c0_i32_0 = arith.constant 0 : i32
    %c0_i32_1 = arith.constant 0 : i32
    return %c0_i32, %c0_i32_0 : i32, i32
  }
  func.func @transform_3(%arg0: i32) -> (i32, i32, i32) {
    %c0_i32 = arith.constant 0 : i32
    %c0_i32_0 = arith.constant 0 : i32
    %c0_i32_1 = arith.constant 0 : i32
    return %arg0, %c0_i32, %c0_i32_0 : i32, i32, i32
  }
}

</mosaic_0001>

<bundles_post_ra>
// kernel: tpu_custom_call.1
= control target key start
LH: loop header
LB: loop body
LE: loop exit
PB: predicated region body
PF: predicated region fallthrough
CT: control target
= control target key end

     0   :  { %8 = vsyncpa [#allocation5], 0  ;;  %s7590_s0 = inlined_call_operand.hbm [shape: f32[2,4,768], index: 0, kind: input, shape index: {}]   ;;  %s7591_s1 = inlined_call_operand.hbm [shape: f32[20,180], index: 1, kind: input, shape index: {}]   ;;  %s7592_s2 = inlined_call_operand.vmem [shape: f32[20,1], index: 2, kind: input, shape index: {}]   ;;  %s7593_s3 = inlined_call_operand.hbm [shape: f32[2,4,768], index: 3, kind: output, shape index: {}]  }
   0x1   :  { %10 = vsyncpa [#allocation5 + $0x1], 0 }
   0x2   :  { %11 = vsyncpa [#allocation8], 0 }
   0x3   :  { %12 = vsyncpa [#allocation6], 0 }
   0x4   :  { %14 = vsyncpa [#allocation6 + $0x1], 0  ;;  %s5903_s12 = smov 0   ;;  %s5905_s13 = smov 0  }
   0x5   :  { %s5907_s14 = smov 0   ;;  %s5909_s15 = smov 0  }
   0x6 LB: > { %s5924_s16 = sadd.s32 4294967295, %s5863_s15   ;;  %s5209_s17 = sadd.s32 4294967294, %s5863_s15   ;;  %s5863_s15 = sphi %s5909_s15, %s7944_s15   ;;  %s5859_s14 = sphi %s5907_s14, %s7943_s14   ;;  %s5855_s13 = sphi %s5905_s13, %s7942_s13   ;;  %s5851_s12 = sphi %s5903_s12, %s7941_s12  }
   0x7   : > { %p40_p0 = scmp.ne.s32.totalorder %s5855_s13, %s5851_s12  ;;  %p7594_p1 = scmp.eq.s32.totalorder %s5924_s16, 0 }
   0x8   : > { %p112_p3 = scmp.eq.s32.totalorder %s5209_s17, 1  ;;  %p5210_p5 = scmp.ge.s32.totalorder %s5863_s15, 1 }
   0x9   : > { %p5933_p4 = por %p7594_p1, %p40_p0  ;;  %p119_p7 = scmp.lt.s32.totalorder %s5863_s15, 3 }
   0xa   : > { %p5938_p6 = por %p112_p3, %p40_p0  ;;  %s5865_s21 = smov [#allocation7]  }
   0xb   : > { %s7614_s18 = scalar_select %p5933_p4, 1, 0 }
   0xc   : > { %s7615_s19 = scalar_select %p5938_p6, 1, 0 }
   0xd   : > { %p5943_p8 = pnand %p5210_p5, %p119_p7  ;;  %s131_s22 = sshll.u32 %s5865_s21, 4  ;;  %s5947_s22 = int_to_ptr.vmem [resolvable:$true] %s131_s22 }
   0xe   : > { %s5959_s24 = sadd.s32 1, %s5863_s15   ;;  %s27_s25 = sadd.s32 1, %s5859_s14 }
   0xf   : > { %s7616_s20 = scalar_select %p5943_p8, 1, 0 }
  0x10   : > { %p5666_p9 = pneg %p5943_p8  ;;  %s24_s26 = ssub.s32 %s5863_s15, %s5959_s24 }
  0x11   : > { %s5735_s29 = scalar_lea.hbm %s7591_s1, 768 }
  0x12   : > { %p5954_p11 = pnand %p5666_p9, %p7594_p1  ;;  %p5736_p12 = scmp.ne.s32.totalorder %s7591_s1, %s5735_s29 }
  0x13   : > { %p5742_p5 = scmp.lt.u32.totalorder %s5735_s29, %s7591_s1 }
  0x14   : > { %p5737_p13 = pneg %p5954_p11 }
  0x16   : > { %p5738_p0 = pnand %p5737_p13, %p5736_p12 }
  0x18   : > { %p5739_p3 = pneg %p5738_p0 }
  0x1a   : > { %p5744_p7 = pnand %p5742_p5, %p5739_p3 }
  0x1c   : > { %5747 = shalt.err (!%p5744_p7)
}
  0x1d   : > { %s5748_s7 = scalar_lea.vmem %s5947_s22, 768  ;;  %p5756_p2 = scmp.lt.s32.totalorder %s5947_s22, %s5947_s22 }
  0x1e   : > { %p5749_p9 = scmp.ne.s32.totalorder %s5947_s22, %s5748_s7  ;;  %p5757_p6 = scmp.lt.s32.totalorder %s5748_s7, %s5748_s7 }
  0x20   : > { %p5751_p10 = pnand %p5749_p9, %p5737_p13  ;;  %p5758_p4 = por %p5757_p6, %p5756_p2 }
  0x22   : > { %p5752_p1 = pneg %p5751_p10 }
  0x24   : > { %p5759_p8 = pnand %p5758_p4, %p5752_p1 }
  0x26   : > { %5762 = shalt.err (!%p5759_p8)
}
  0x27   : > { %s5866_s8 = smov 256   ;;  %s5867_s9 = smov 16  }
  0x28   : > { %5669 = dma.hbm_to_vmem [thread:$0]  (!%p5954_p11), %s7591_s1, 768, %s5947_s22, [#allocation8], %s5866_s8, %s5866_s8, %s5867_s9  }
  0x29   : > { %p25_p2 = scmp.eq.s32.totalorder %s24_s26, 0  ;;  %p34_p1 = scmp.ne.s32.totalorder %s5859_s14, %s5855_s13 }
  0x2a   : > { %p35_p4 = scmp.eq.s32.totalorder %s5863_s15, 0  ;;  %p5679_p6 = scmp.lt.s32.totalorder %s5863_s15, 2 }
  0x2b   : > { %s5990_s17 = scalar_select %p25_p2, %s5859_s14, %s27_s25  }
  0x2c   : > { %p36_p8 = por %p35_p4, %p34_p1  ;;  %p7618_p10 = scmp.eq.s32.totalorder %s5924_s16, 1 }
  0x2d   : > { %s148_s27 = sand.u32 1, %s5859_s14   ;;  %s5655_s28 = smul.u32 384, %s5863_s15 }
  0x2e   : > { %p5994_p12 = por %p7618_p10, %p34_p1  ;;  %s5654_s29 = smul.u32 24, %s148_s27 }
  0x2f   : > { %p6000_p13 = pnand %p5679_p6, %p36_p8  ;;  %s6007_s25 = scalar_lea.hbm %s7590_s0, %s5655_s28 }
  0x30   : > { %s152_s30 = scalar_lea.vmem [#allocation4], %s5654_s29  ;;  %s149_s5 = scalar_lea.sflag [#allocation5], %s148_s27 }
  0x31   : > { %s160_s4 = sshll.u32 %s152_s30, 4  ;;  %s5763_s6 = scalar_lea.hbm %s6007_s25, 384  ;;  %s6009_s4 = int_to_ptr.vmem [resolvable:$true] %s160_s4 }
  0x32   : > { %p5764_p11 = scmp.ne.s32.totalorder %s6007_s25, %s5763_s6  ;;  %p5765_p0 = pneg %p6000_p13 }
  0x33   : > { %s5768_s9 = scalar_lea.hbm %s7590_s0, 768  ;;  %p5769_p7 = scmp.lt.u32.totalorder %s6007_s25, %s7590_s0 }
  0x34   : > { %p5766_p3 = pnand %p5765_p0, %p5764_p11  ;;  %p5770_p9 = scmp.lt.u32.totalorder %s5768_s9, %s5763_s6 }
  0x35   : > { %p5772_p1 = scmp.lt.u32.totalorder %s5763_s6, %s6007_s25 }
  0x36   : > { %p5767_p5 = pneg %p5766_p3  ;;  %p5771_p2 = por %p5770_p9, %p5769_p7 }
  0x38   : > { %p5773_p4 = por %p5772_p1, %p5771_p2 }
  0x3a   : > { %p5774_p6 = pnand %p5773_p4, %p5767_p5 }
  0x3c   : > { %5777 = shalt.err (!%p5774_p6)
}
  0x3d   : > { %s5778_s27 = scalar_lea.vmem %s6009_s4, 384  ;;  %s5868_s28 = smov [#allocation4]  }
  0x3e   : > { %p5779_p8 = scmp.ne.s32.totalorder %s6009_s4, %s5778_s27  ;;  %s5783_s29 = sshll.u32 %s5868_s28, 4  ;;  %s5784_s29 = int_to_ptr.vmem [resolvable:$false] %s5783_s29 }
  0x3f   : > { %s5785_s22 = scalar_lea.vmem %s5784_s29, 768  ;;  %p5786_p3 = scmp.lt.s32.totalorder %s6009_s4, %s5784_s29 }
  0x40   : > { %p5781_p10 = pnand %p5779_p8, %p5765_p0  ;;  %p5787_p7 = scmp.lt.s32.totalorder %s5785_s22, %s5778_s27 }
  0x42   : > { %p5782_p11 = pneg %p5781_p10  ;;  %p5788_p9 = por %p5787_p7, %p5786_p3 }
  0x44   : > { %p5789_p2 = pnand %p5788_p9, %p5782_p11 }
  0x46   : > { %5792 = shalt.err (!%p5789_p2)
}
  0x47   : > { %5673 = dma.hbm_to_vmem [thread:$0]  (!%p6000_p13), %s6007_s25, 384, %s6009_s4, %s149_s5  }
  0x48   : > { %p7621_p5 = scmp.ne.s32.totalorder %s7616_s20, 0 }
  0x49   : > { %s6039_s26 = sand.u32 (!%p7621_p5), 1, %s5855_s13   ;;  %p7622_p0 = scmp.ne.s32.totalorder (!%p7621_p5), %s7614_s18, 0 }
  0x4a   : > { %169 = sbr.rel (%p7621_p5) target bundleno = 2909 (0xb5d), region = 32  ;;  %s172_s6 = scalar_lea.sflag (!%p7621_p5), [#allocation5], %s6039_s26 }
  0x4b   : > { %s5656_s30 = smul.u32 (!%p7621_p5), 24, %s6039_s26 }
  0x4d   : > { %s175_s7 = scalar_lea.vmem (!%p7621_p5), [#allocation4], %s5656_s30 }
  0x51   : > { %5838 = dma.done.wait (%p7622_p0), %s172_s6, 384  }
  0x52   : > { %5840 = vsyncadd (%p7622_p0), %s172_s6, 4294966912  ;;  %p7623_p13 = scmp.eq.s32.totalorder %s5924_s16, 0 }
  0x54   : > { %5842 = dma.done.wait (%p7623_p13), [#allocation8], 768   ;;  %p7624_p1 = pmov %p7623_p13 }
  0x55   : > { %v971_v0 = vld [vmem:[%s175_s7] sm:$0xff]  ;;  %v972_v1 = vld [vmem:[%s175_s7 + $0x8] sm:$0xff]  ;;  %s5869_s20 = smov 32   ;;  %v973_v3 = vld [vmem:[%s175_s7 + $0x10] sm:$0xff]  ;;  %vm7599_vm0 = vcmask 1043712   ;;  %vm7609_vm1 = vcmask 261120  }
  0x56   : > { %5844 = vsyncadd (%p7624_p1), [#allocation8], 4294966528  ;;  %980 = vrot.lane.b32.xlu0 %v971_v0, %s5869_s20  ;;  %984 = vrot.lane.b32.xlu1 %v972_v1, %s5869_s20  ;;  %v978_v2 = vcombine.high %v972_v1, %v972_v1  ;;  %v977_v4 = vcombine.high %v971_v0, %v971_v0  ;;  %v979_v5 = vcombine.high %v973_v3, %v973_v3  ;;  %vm7598_vm2 = vcmask 257024   ;;  %s5870_s18 = smov 115   ;;  %s5871_s23 = smov 114  }
  0x57   : > { %s5872_s25 = smov 113   ;;  %s5873_s4 = smov 97   ;;  %vm7608_vm3 = vcmask 941056   ;;  %vm7606_vm4 = vcmask 924672   ;;  %vm7607_vm5 = vcmask 785408   ;;  %vm7605_vm6 = vcmask 646144  }
  0x58   : > { %s5874_s5 = smov 96   ;;  %s5875_s8 = smov 95   ;;  %vm7604_vm7 = vcmask 629760   ;;  %vm7603_vm8 = vcmask 932864   ;;  %vm7602_vm9 = vcmask 793600   ;;  %vm7601_vm10 = vcmask 777216  }
  0x59   : > { %s5876_s9 = smov 79   ;;  %s5877_s10 = smov 78   ;;  %vm7600_vm11 = vcmask 637952   ;;  %vm7597_vm12 = vcmask 1043456   ;;  %vm1502_vm13 = vcmask 293888  }
  0x5a   : > { %988 = vrot.lane.b32.xlu0 %v973_v3, %s5869_s20  ;;  %986 = vrot.lane.b32.xlu1 %v978_v2, %s5869_s20  ;;  %s5878_s11 = smov 77  }
  0x5e   : > { %982 = vrot.lane.b32.xlu0 %v977_v4, %s5869_s20  ;;  %990 = vrot.lane.b32.xlu1 %v979_v5, %s5869_s20 }
  0xc8   : > { %v981_v6 = vpop.permute.xlu0 %980  ;;  %v985_v7 = vpop.permute.xlu1 %984 }
  0xc9   : > { %1006 = vst.msk [vmem:[#allocation2] sm:$0xf] %vm7599_vm0, %v981_v6 }
  0xcc   : > { %v989_v8 = vpop.permute.xlu0 %988  ;;  %v987_v9 = vpop.permute.xlu1 %986 }
  0xcd   : > { %v995_v10 = vsel %vm7609_vm1, %v985_v7, %v987_v9  ;;  %v996_v11 = vsel %vm7609_vm1, %v987_v9, %v989_v8 }
  0xce   : > { %1009 = vst [vmem:[#allocation2 + $0x18] sm:$0xf] %v995_v10  ;;  %1010 = vst [vmem:[#allocation2 + $0x20] sm:$0xf] %v996_v11 }
  0xd0   : > { %v983_v12 = vpop.permute.xlu0 %982  ;;  %v1014_v13 = vld [vmem:[#allocation2] sm:$0xf]  ;;  %v991_v15 = vpop.permute.xlu1 %990 }
  0xd1   : > { %v1061_v14 = vld [vmem:[#allocation2] sm:$0xf]  ;;  %v993_v16 = vsel %vm7609_vm1, %v981_v6, %v983_v12  ;;  %v994_v17 = vsel %vm7609_vm1, %v983_v12, %v985_v7  ;;  %1028 = vrot.lane.b32.xlu0 %v1014_v13, %s5870_s18  ;;  %v997_v19 = vsel %vm7609_vm1, %v989_v8, %v991_v15  ;;  %1013 = vst.msk [vmem:[#allocation2 + $0x30] sm:$0xf] %vm7598_vm2, %v991_v15 }
  0xd2   : > { %v1075_v18 = vrot.slane %v1061_v14, 4  ;;  %1007 = vst [vmem:[#allocation2 + $0x8] sm:$0xf] %v993_v16  ;;  %1008 = vst [vmem:[#allocation2 + $0x10] sm:$0xf] %v994_v17 }
  0xd3   : > { %1011 = vst [vmem:[#allocation2 + $0x28] sm:$0xf] %v997_v19  ;;  %v1162_v20 = vld [vmem:[#allocation2] sm:$0xf] }
  0xd4   : > { %1082 = vrot.lane.b32.xlu1 %v1075_v18, %s5871_s23  ;;  %v1115_v21 = vld [vmem:[#allocation2] sm:$0xf]  ;;  %v1176_v22 = vrot.slane %v1162_v20, 4 }
  0xd5   : > { %1129 = vrot.lane.b32.xlu0 %v1115_v21, %s5872_s25  ;;  %v1263_v23 = vld [vmem:[#allocation2] sm:$0xf]  ;;  %v1017_v34 = vld [vmem:[#allocation2 + $0x18] sm:$0xf] }
  0xd6   : > { %v1216_v24 = vld [vmem:[#allocation2] sm:$0xf]  ;;  %v1277_v25 = vrot.slane %v1263_v23, 4  ;;  %v1118_v36 = vld [vmem:[#allocation2 + $0x18] sm:$0xf] }
  0xd7   : > { %v1364_v26 = vld [vmem:[#allocation2] sm:$0xf]  ;;  %v1219_v42 = vld [vmem:[#allocation2 + $0x18] sm:$0xf] }
  0xd8   : > { %1183 = vrot.lane.b32.xlu1 %v1176_v22, %s5873_s4  ;;  %v1317_v27 = vld [vmem:[#allocation2] sm:$0xf]  ;;  %v1378_v28 = vrot.slane %v1364_v26, 4  ;;  %v1020_v31 = vld [vmem:[#allocation2 + $0x30] sm:$0xf] }
  0xd9   : > { %1230 = vrot.lane.b32.xlu0 %v1216_v24, %s5874_s5  ;;  %v1418_v29 = vld [vmem:[#allocation2] sm:$0xf]  ;;  %v1016_v30 = vld [vmem:[#allocation2 + $0x10] sm:$0xf]  ;;  %v1015_v35 = vld [vmem:[#allocation2 + $0x8] sm:$0xf] }
  0xda   : > { %v1117_v32 = vld [vmem:[#allocation2 + $0x10] sm:$0xf]  ;;  %v1116_v37 = vld [vmem:[#allocation2 + $0x8] sm:$0xf]  ;;  %v1018_v39 = vld [vmem:[#allocation2 + $0x20] sm:$0xf] }
  0xdb   : > { %v1121_v33 = vld [vmem:[#allocation2 + $0x30] sm:$0xf]  ;;  %v1119_v41 = vld [vmem:[#allocation2 + $0x20] sm:$0xf]  ;;  %v1217_v43 = vld [vmem:[#allocation2 + $0x8] sm:$0xf] }
  0xdc   : > { %1284 = vrot.lane.b32.xlu1 %v1277_v25, %s5875_s8  ;;  %v1218_v38 = vld [vmem:[#allocation2 + $0x10] sm:$0xf]  ;;  %v1320_v44 = vld [vmem:[#allocation2 + $0x18] sm:$0xf]  ;;  %v1318_v45 = vld [vmem:[#allocation2 + $0x8] sm:$0xf] }
  0xdd   : > { %1331 = vrot.lane.b32.xlu0 %v1317_v27, %s5876_s9  ;;  %v1319_v40 = vld [vmem:[#allocation2 + $0x10] sm:$0xf]  ;;  %v1220_v47 = vld [vmem:[#allocation2 + $0x20] sm:$0xf]  ;;  %v1421_v48 = vld [vmem:[#allocation2 + $0x18] sm:$0xf] }
  0xde   : > { %v1420_v46 = vld [vmem:[#allocation2 + $0x10] sm:$0xf]  ;;  %v1321_v49 = vld [vmem:[#allocation2 + $0x20] sm:$0xf]  ;;  %v1019_v50 = vld [vmem:[#allocation2 + $0x28] sm:$0xf] }
  0xdf   : > { %v1419_v51 = vld [vmem:[#allocation2 + $0x8] sm:$0xf]  ;;  %v1063_v53 = vld [vmem:[#allocation2 + $0x10] sm:$0xf]  ;;  %v1422_v54 = vld [vmem:[#allocation2 + $0x20] sm:$0xf] }
  0xe0   : > { %1385 = vrot.lane.b32.xlu1 %v1378_v28, %s5877_s10  ;;  %v1120_v52 = vld [vmem:[#allocation2 + $0x28] sm:$0xf]  ;;  %v1067_v55 = vld [vmem:[#allocation2 + $0x30] sm:$0xf]  ;;  %v1077_v56 = vrot.slane %v1063_v53, 4  ;;  %v5879_v24 = vmov 0.0  }
  0xe1   : > { %1432 = vrot.lane.b32.xlu0 %v1418_v29, %s5878_s11  ;;  %v1164_v57 = vld [vmem:[#allocation2 + $0x10] sm:$0xf]  ;;  %v1081_v58 = vrot.slane %v1067_v55, 4  ;;  %v1062_v59 = vld [vmem:[#allocation2 + $0x8] sm:$0xf]  ;;  %1589 = vmatprep.mubr.f32.mxu0 %v5879_v24  ;;  %v5880_v55 = vmov 0  }
  0xe2   : > { %v1178_v60 = vrot.slane %v1164_v57, 4  ;;  %v1065_v61 = vld [vmem:[#allocation2 + $0x20] sm:$0xf]  ;;  %v1076_v62 = vrot.slane %v1062_v59, 4  ;;  %v1163_v63 = vld [vmem:[#allocation2 + $0x8] sm:$0xf]  ;;  %1660 = vmatprep.mubr.f32.mxu1 %v5879_v24  ;;  %5730 = vset.pattern.permute.xlu1 %v5880_v55 }
  0xe3   : > { %v1079_v0 = vrot.slane %v1065_v61, 4  ;;  %v1166_v1 = vld [vmem:[#allocation2 + $0x20] sm:$0xf]  ;;  %v1177_v2 = vrot.slane %v1163_v63, 4  ;;  %v1064_v3 = vld [vmem:[#allocation2 + $0x18] sm:$0xf]  ;;  %5731 = vset.pattern.permute.xlu0 %v5880_v55 }
  0xe4   : > { %1032 = vrot.lane.b32.xlu1 %v1016_v30, %s5870_s18  ;;  %v1180_v4 = vrot.slane %v1166_v1, 4  ;;  %v1265_v5 = vld [vmem:[#allocation2 + $0x10] sm:$0xf]  ;;  %v1078_v6 = vrot.slane %v1064_v3, 4  ;;  %v1165_v7 = vld [vmem:[#allocation2 + $0x18] sm:$0xf] }
  0xe5   : > { %1040 = vrot.lane.b32.xlu0 %v1020_v31, %s5870_s18  ;;  %v1279_v8 = vrot.slane %v1265_v5, 4  ;;  %v1366_v9 = vld [vmem:[#allocation2 + $0x10] sm:$0xf]  ;;  %v1179_v10 = vrot.slane %v1165_v7, 4  ;;  %v1264_v11 = vld [vmem:[#allocation2 + $0x8] sm:$0xf] }
  0xe6   : > { %v1380_v12 = vrot.slane %v1366_v9, 4  ;;  %v1267_v13 = vld [vmem:[#allocation2 + $0x20] sm:$0xf]  ;;  %v1278_v14 = vrot.slane %v1264_v11, 4  ;;  %v1365_v15 = vld [vmem:[#allocation2 + $0x8] sm:$0xf] }
  0xe7   : > { %v1281_v16 = vrot.slane %v1267_v13, 4  ;;  %v1379_v17 = vrot.slane %v1365_v15, 4  ;;  %v1266_v18 = vld [vmem:[#allocation2 + $0x18] sm:$0xf]  ;;  %v1221_v19 = vld [vmem:[#allocation2 + $0x28] sm:$0xf] }
  0xe8   : > { %1133 = vrot.lane.b32.xlu1 %v1117_v32, %s5872_s25  ;;  %v1368_v20 = vld [vmem:[#allocation2 + $0x20] sm:$0xf]  ;;  %v1280_v21 = vrot.slane %v1266_v18, 4  ;;  %v1367_v22 = vld [vmem:[#allocation2 + $0x18] sm:$0xf] }
  0xe9   : > { %1141 = vrot.lane.b32.xlu0 %v1121_v33, %s5872_s25  ;;  %v1382_v23 = vrot.slane %v1368_v20, 4  ;;  %v1381_v25 = vrot.slane %v1367_v22, 4  ;;  %v1168_v26 = vld [vmem:[#allocation2 + $0x30] sm:$0xf]  ;;  %v1322_v27 = vld [vmem:[#allocation2 + $0x28] sm:$0xf] }
  0xea   : > { %v1066_v28 = vld [vmem:[#allocation2 + $0x28] sm:$0xf]  ;;  %v1182_v29 = vrot.slane %v1168_v26, 4  ;;  %v1222_v32 = vld [vmem:[#allocation2 + $0x30] sm:$0xf] }
  0xeb   : > { %v1080_v30 = vrot.slane %v1066_v28, 4  ;;  %v1167_v31 = vld [vmem:[#allocation2 + $0x28] sm:$0xf]  ;;  %v1269_v33 = vld [vmem:[#allocation2 + $0x30] sm:$0xf] }
  0xec   : > { %1034 = vrot.lane.b32.xlu1 %v1017_v34, %s5870_s18  ;;  %v1181_v34 = vrot.slane %v1167_v31, 4  ;;  %v1496_v53 = vld [vmem:[%s7592_s2] sm:$0xf] }
  0xed   : > { %1030 = vrot.lane.b32.xlu0 %v1015_v35, %s5870_s18  ;;  %v1268_v35 = vld [vmem:[#allocation2 + $0x28] sm:$0xf] }
  0xf0   : > { %1135 = vrot.lane.b32.xlu1 %v1118_v36, %s5872_s25  ;;  %v1283_v36 = vrot.slane %v1269_v33, 4 }
  0xf1   : > { %1131 = vrot.lane.b32.xlu0 %v1116_v37, %s5872_s25  ;;  %v1282_v37 = vrot.slane %v1268_v35, 4 }
  0xf4   : > { %1234 = vrot.lane.b32.xlu1 %v1218_v38, %s5874_s5  ;;  %v1369_v38 = vld [vmem:[#allocation2 + $0x28] sm:$0xf] }
  0xf5   : > { %1036 = vrot.lane.b32.xlu0 %v1018_v39, %s5870_s18 }
  0xf8   : > { %1335 = vrot.lane.b32.xlu1 %v1319_v40, %s5876_s9  ;;  %v1323_v40 = vld [vmem:[#allocation2 + $0x30] sm:$0xf] }
  0xf9   : > { %1137 = vrot.lane.b32.xlu0 %v1119_v41, %s5872_s25  ;;  %v1370_v41 = vld [vmem:[#allocation2 + $0x30] sm:$0xf] }
  0xfc   : > { %1236 = vrot.lane.b32.xlu1 %v1219_v42, %s5874_s5 }
  0xfd   : > { %1232 = vrot.lane.b32.xlu0 %v1217_v43, %s5874_s5  ;;  %v1383_v43 = vrot.slane %v1369_v38, 4 }
 0x100   : > { %1337 = vrot.lane.b32.xlu1 %v1320_v44, %s5876_s9 }
 0x101   : > { %1333 = vrot.lane.b32.xlu0 %v1318_v45, %s5876_s9  ;;  %v1384_v45 = vrot.slane %v1370_v41, 4 }
 0x104   : > { %1436 = vrot.lane.b32.xlu1 %v1420_v46, %s5878_s11 }
 0x105   : > { %1238 = vrot.lane.b32.xlu0 %v1220_v47, %s5874_s5  ;;  %v1423_v47 = vld [vmem:[#allocation2 + $0x28] sm:$0xf] }
 0x108   : > { %1438 = vrot.lane.b32.xlu1 %v1421_v48, %s5878_s11 }
 0x109   : > { %1339 = vrot.lane.b32.xlu0 %v1321_v49, %s5876_s9  ;;  %v1424_v49 = vld [vmem:[#allocation2 + $0x30] sm:$0xf] }
 0x10c   : > { %1038 = vrot.lane.b32.xlu1 %v1019_v50, %s5870_s18 }
 0x10d   : > { %1434 = vrot.lane.b32.xlu0 %v1419_v51, %s5878_s11 }
 0x110   : > { %1139 = vrot.lane.b32.xlu1 %v1120_v52, %s5872_s25 }
 0x111   : > { %1440 = vrot.lane.b32.xlu0 %v1422_v54, %s5878_s11 }
 0x114   : > { %1086 = vrot.lane.b32.xlu1 %v1077_v56, %s5871_s23 }
 0x115   : > { %1094 = vrot.lane.b32.xlu0 %v1081_v58, %s5871_s23 }
 0x118   : > { %1187 = vrot.lane.b32.xlu1 %v1178_v60, %s5873_s4 }
 0x119   : > { %1084 = vrot.lane.b32.xlu0 %v1076_v62, %s5871_s23 }
 0x11c   : > { %1090 = vrot.lane.b32.xlu1 %v1079_v0, %s5871_s23 }
 0x11d   : > { %1185 = vrot.lane.b32.xlu0 %v1177_v2, %s5873_s4 }
 0x120   : > { %1191 = vrot.lane.b32.xlu1 %v1180_v4, %s5873_s4 }
 0x121   : > { %1088 = vrot.lane.b32.xlu0 %v1078_v6, %s5871_s23 }
 0x124   : > { %1288 = vrot.lane.b32.xlu1 %v1279_v8, %s5875_s8 }
 0x125   : > { %1189 = vrot.lane.b32.xlu0 %v1179_v10, %s5873_s4 }
 0x128   : > { %1389 = vrot.lane.b32.xlu1 %v1380_v12, %s5877_s10 }
 0x129   : > { %1286 = vrot.lane.b32.xlu0 %v1278_v14, %s5875_s8 }
 0x12c   : > { %1292 = vrot.lane.b32.xlu1 %v1281_v16, %s5875_s8 }
 0x12d   : > { %1387 = vrot.lane.b32.xlu0 %v1379_v17, %s5877_s10 }
 0x130   : > { %1240 = vrot.lane.b32.xlu1 %v1221_v19, %s5874_s5 }
 0x131   : > { %1290 = vrot.lane.b32.xlu0 %v1280_v21, %s5875_s8 }
 0x134   : > { %1393 = vrot.lane.b32.xlu1 %v1382_v23, %s5877_s10 }
 0x135   : > { %1391 = vrot.lane.b32.xlu0 %v1381_v25, %s5877_s10 }
 0x138   : > { %1341 = vrot.lane.b32.xlu1 %v1322_v27, %s5876_s9 }
 0x139   : > { %1195 = vrot.lane.b32.xlu0 %v1182_v29, %s5873_s4 }
 0x13c   : > { %1092 = vrot.lane.b32.xlu1 %v1080_v30, %s5871_s23 }
 0x13d   : > { %1242 = vrot.lane.b32.xlu0 %v1222_v32, %s5874_s5 }
 0x140   : > { %1193 = vrot.lane.b32.xlu1 %v1181_v34, %s5873_s4 }
 0x141   : > { %1296 = vrot.lane.b32.xlu0 %v1283_v36, %s5875_s8 }
 0x143   : > { %v1029_v39 = vpop.permute.xlu0 %1028 }
 0x144   : > { %1294 = vrot.lane.b32.xlu1 %v1282_v37, %s5875_s8 }
 0x145   : > { %1343 = vrot.lane.b32.xlu0 %v1323_v40, %s5876_s9 }
 0x146   : > { %v6126_v42 = vpop.permute.xlu1 %1082 }
 0x147   : > { %v1130_v44 = vpop.permute.xlu0 %1129 }
 0x148   : > { %1395 = vrot.lane.b32.xlu1 %v1383_v43, %s5877_s10 }
 0x149   : > { %1397 = vrot.lane.b32.xlu0 %v1384_v45, %s5877_s10 }
 0x14a   : > { %v6130_v46 = vpop.permute.xlu1 %1183 }
 0x14b   : > { %v1231_v48 = vpop.permute.xlu0 %1230 }
 0x14c   : > { %1442 = vrot.lane.b32.xlu1 %v1423_v47, %s5878_s11 }
 0x14d   : > { %1444 = vrot.lane.b32.xlu0 %v1424_v49, %s5878_s11 }
 0x14e   : > { %v6134_v50 = vpop.permute.xlu1 %1284 }
 0x14f   : > { %v1332_v51 = vpop.permute.xlu0 %1331 }
 0x150   : > { %1499 = vperm.xlu1 %5730, %v1496_v53  }
 0x152   : > { %v6137_v52 = vpop.permute.xlu1 %1385 }
 0x153   : > { %v6142_v54 = vpop.permute.xlu0 %1432 }
 0x156   : > { %v1033_v56 = vpop.permute.xlu1 %1032 }
 0x157   : > { %v1041_v57 = vpop.permute.xlu0 %1040 }
 0x15a   : > { %v1134_v58 = vpop.permute.xlu1 %1133 }
 0x15b   : > { %v6146_v59 = vpop.permute.xlu0 %1141 }
 0x15e   : > { %v1035_v60 = vpop.permute.xlu1 %1034 }
 0x15f   : > { %v1045_v61 = vsel %vm7608_vm3, %v1033_v56, %v1035_v60  ;;  %v1031_v62 = vpop.permute.xlu0 %1030 }
 0x160   : > { %1057 = vst [vmem:[#allocation3 + $0x10] sm:$0xf] %v1045_v61  ;;  %v1043_v63 = vsel %vm7608_vm3, %v1029_v39, %v1031_v62  ;;  %v1044_v0 = vsel %vm7608_vm3, %v1031_v62, %v1033_v56 }
 0x161   : > { %1055 = vst [vmem:[#allocation3] sm:$0xf] %v1043_v63  ;;  %1056 = vst [vmem:[#allocation3 + $0x8] sm:$0xf] %v1044_v0 }
 0x162   : > { %v1136_v1 = vpop.permute.xlu1 %1135 }
 0x163   : > { %v1146_v2 = vsel %vm7606_vm4, %v1134_v58, %v1136_v1  ;;  %v1132_v3 = vpop.permute.xlu0 %1131 }
 0x164   : > { %1158 = vst [vmem:[#allocation3 + $0x40] sm:$0xf] %v1146_v2  ;;  %v1144_v4 = vsel %vm7606_vm4, %v1130_v44, %v1132_v3  ;;  %v1145_v5 = vsel %vm7606_vm4, %v1132_v3, %v1134_v58 }
 0x165   : > { %1156 = vst [vmem:[#allocation3 + $0x30] sm:$0xf] %v1144_v4  ;;  %1157 = vst [vmem:[#allocation3 + $0x38] sm:$0xf] %v1145_v5 }
 0x166   : > { %v1235_v6 = vpop.permute.xlu1 %1234 }
 0x167   : > { %v1037_v7 = vpop.permute.xlu0 %1036 }
 0x168   : > { %v1046_v8 = vsel %vm7608_vm3, %v1035_v60, %v1037_v7 }
 0x169   : > { %1058 = vst [vmem:[#allocation3 + $0x18] sm:$0xf] %v1046_v8 }
 0x16a   : > { %v1336_v9 = vpop.permute.xlu1 %1335 }
 0x16b   : > { %v1138_v10 = vpop.permute.xlu0 %1137 }
 0x16c   : > { %v1147_v11 = vsel %vm7606_vm4, %v1136_v1, %v1138_v10 }
 0x16d   : > { %1159 = vst [vmem:[#allocation3 + $0x48] sm:$0xf] %v1147_v11 }
 0x16e   : > { %v1237_v12 = vpop.permute.xlu1 %1236 }
 0x16f   : > { %v1247_v13 = vsel %vm7607_vm5, %v1235_v6, %v1237_v12  ;;  %v1233_v14 = vpop.permute.xlu0 %1232 }
 0x170   : > { %1259 = vst [vmem:[#allocation3 + $0x70] sm:$0xf] %v1247_v13  ;;  %v1245_v15 = vsel %vm7607_vm5, %v1231_v48, %v1233_v14  ;;  %v1246_v16 = vsel %vm7607_vm5, %v1233_v14, %v1235_v6 }
 0x171   : > { %1257 = vst [vmem:[#allocation3 + $0x60] sm:$0xf] %v1245_v15  ;;  %1258 = vst [vmem:[#allocation3 + $0x68] sm:$0xf] %v1246_v16 }
 0x172   : > { %v1338_v17 = vpop.permute.xlu1 %1337 }
 0x173   : > { %v1348_v18 = vsel %vm7605_vm6, %v1336_v9, %v1338_v17  ;;  %v1334_v19 = vpop.permute.xlu0 %1333 }
 0x174   : > { %1360 = vst [vmem:[#allocation3 + $0xa0] sm:$0xf] %v1348_v18  ;;  %v1346_v20 = vsel %vm7605_vm6, %v1332_v51, %v1334_v19  ;;  %v1347_v21 = vsel %vm7605_vm6, %v1334_v19, %v1336_v9 }
 0x175   : > { %1358 = vst [vmem:[#allocation3 + $0x90] sm:$0xf] %v1346_v20  ;;  %1359 = vst [vmem:[#allocation3 + $0x98] sm:$0xf] %v1347_v21 }
 0x176   : > { %v1437_v22 = vpop.permute.xlu1 %1436 }
 0x177   : > { %v6162_v23 = vpop.permute.xlu0 %1238 }
 0x178   : > { %v1248_v25 = vsel %vm7607_vm5, %v1237_v12, %v6162_v23 }
 0x179   : > { %1260 = vst [vmem:[#allocation3 + $0x78] sm:$0xf] %v1248_v25 }
 0x17a   : > { %v1439_v26 = vpop.permute.xlu1 %1438 }
 0x17b   : > { %v1449_v27 = vsel %vm7604_vm7, %v1437_v22, %v1439_v26  ;;  %v6167_v28 = vpop.permute.xlu0 %1339 }
 0x17c   : > { %1461 = vst [vmem:[#allocation3 + $0xd0] sm:$0xf] %v1449_v27  ;;  %v1349_v29 = vsel %vm7605_vm6, %v1338_v17, %v6167_v28 }
 0x17d   : > { %1361 = vst [vmem:[#allocation3 + $0xa8] sm:$0xf] %v1349_v29 }
 0x17e   : > { %v1039_v30 = vpop.permute.xlu1 %1038 }
 0x17f   : > { %v1047_v31 = vsel %vm7608_vm3, %v1037_v7, %v1039_v30  ;;  %v1048_v32 = vsel %vm7608_vm3, %v1039_v30, %v1041_v57  ;;  %v1435_v33 = vpop.permute.xlu0 %1434 }
 0x180   : > { %1059 = vst [vmem:[#allocation3 + $0x20] sm:$0xf] %v1047_v31  ;;  %1060 = vst [vmem:[#allocation3 + $0x28] sm:$0xf] %v1048_v32  ;;  %v1447_v34 = vsel %vm7604_vm7, %v6142_v54, %v1435_v33  ;;  %v1448_v35 = vsel %vm7604_vm7, %v1435_v33, %v1437_v22 }
 0x181   : > { %1459 = vst [vmem:[#allocation3 + $0xc0] sm:$0xf] %v1447_v34  ;;  %1460 = vst [vmem:[#allocation3 + $0xc8] sm:$0xf] %v1448_v35 }
 0x182   : > { %v1140_v36 = vpop.permute.xlu1 %1139 }
 0x183   : > { %v1148_v37 = vsel %vm7606_vm4, %v1138_v10, %v1140_v36  ;;  %v1149_v38 = vsel %vm7606_vm4, %v1140_v36, %v6146_v59  ;;  %v6179_v39 = vpop.permute.xlu0 %1440 }
 0x184   : > { %1160 = vst [vmem:[#allocation3 + $0x50] sm:$0xf] %v1148_v37  ;;  %1161 = vst [vmem:[#allocation3 + $0x58] sm:$0xf] %v1149_v38  ;;  %v1450_v40 = vsel %vm7604_vm7, %v1439_v26, %v6179_v39 }
 0x185   : > { %1462 = vst [vmem:[#allocation3 + $0xd8] sm:$0xf] %v1450_v40 }
 0x186   : > { %v1087_v41 = vpop.permute.xlu1 %1086 }
 0x187   : > { %v6183_v43 = vpop.permute.xlu0 %1094 }
 0x188   : > { %v1491_v36 = vld [vmem:[#allocation3 + $0xc8] sm:$0xf] }
 0x18a   : > { %v1188_v44 = vpop.permute.xlu1 %1187 }
 0x18b   : > { %v1085_v45 = vpop.permute.xlu0 %1084 }
 0x18c   : > { %v1097_v47 = vsel %vm7603_vm8, %v6126_v42, %v1085_v45  ;;  %v1098_v48 = vsel %vm7603_vm8, %v1085_v45, %v1087_v41 }
 0x18d   : > { %1109 = vst [vmem:[#allocation3] sm:$0xf0] %v1097_v47  ;;  %1110 = vst [vmem:[#allocation3 + $0x8] sm:$0xf0] %v1098_v48 }
 0x18e   : > { %v6188_v49 = vpop.permute.xlu1 %1090 }
 0x18f   : > { %v1186_v51 = vpop.permute.xlu0 %1185 }
 0x190   : > { %v1198_v53 = vsel %vm7602_vm9, %v6130_v46, %v1186_v51  ;;  %v1199_v54 = vsel %vm7602_vm9, %v1186_v51, %v1188_v44 }
 0x191   : > { %1210 = vst [vmem:[#allocation3 + $0x30] sm:$0xf0] %v1198_v53  ;;  %1211 = vst [vmem:[#allocation3 + $0x38] sm:$0xf0] %v1199_v54 }
 0x192   : > { %v6193_v56 = vpop.permute.xlu1 %1191 }
 0x193   : > { %v1089_v57 = vpop.permute.xlu0 %1088 }
 0x194   : > { %v1099_v42 = vsel %vm7603_vm8, %v1087_v41, %v1089_v57  ;;  %v1100_v58 = vsel %vm7603_vm8, %v1089_v57, %v6188_v49  ;;  %v1467_v61 = vld [vmem:[#allocation3 + $0x8] sm:$0xff]  ;;  %v1466_v0 = vld [vmem:[#allocation3] sm:$0xff] }
 0x195   : > { %1111 = vst [vmem:[#allocation3 + $0x10] sm:$0xf0] %v1099_v42  ;;  %1112 = vst [vmem:[#allocation3 + $0x18] sm:$0xf0] %v1100_v58  ;;  %v6238_v41 = vld [vmem:[#allocation7] sm:$0xf] }
 0x196   : > { %v1289_v59 = vpop.permute.xlu1 %1288 }
 0x197   : > { %v1190_v60 = vpop.permute.xlu0 %1189 }
 0x198   : > { %v1200_v62 = vsel %vm7602_vm9, %v1188_v44, %v1190_v60  ;;  %v1201_v46 = vsel %vm7602_vm9, %v1190_v60, %v6193_v56  ;;  %v1473_v63 = vld [vmem:[#allocation3 + $0x38] sm:$0xff]  ;;  %v1472_v1 = vld [vmem:[#allocation3 + $0x30] sm:$0xff]  ;;  %v1490_v44 = vld [vmem:[#allocation3 + $0xc0] sm:$0xf] }
 0x199   : > { %1212 = vst [vmem:[#allocation3 + $0x40] sm:$0xf0] %v1200_v62  ;;  %1213 = vst [vmem:[#allocation3 + $0x48] sm:$0xf0] %v1201_v46  ;;  %v6201_v3 = vpack.c.bf16 %v1473_v63, %v1467_v61  ;;  %v6203_v4 = vpack.c.bf16 %v1472_v1, %v1466_v0  ;;  %v1492_v46 = vld [vmem:[#allocation3 + $0xd0] sm:$0xf] }
 0x19a   : > { %v1390_v2 = vpop.permute.xlu1 %1389 }
 0x19b   : > { %5253 = vmatprep.subr.bf16.mxu0 %v6201_v3  ;;  %v1287_v5 = vpop.permute.xlu0 %1286 }
 0x19c   : > { %v1299_v6 = vsel %vm7601_vm10, %v6134_v50, %v1287_v5  ;;  %v1300_v7 = vsel %vm7601_vm10, %v1287_v5, %v1289_v59  ;;  %5255 = vmatpush1.bf16.msra.mxu0 %v6203_v4  ;;  %v1469_v10 = vld [vmem:[#allocation3 + $0x18] sm:$0xff]  ;;  %v1468_v14 = vld [vmem:[#allocation3 + $0x10] sm:$0xff] }
 0x19d   : > { %1311 = vst [vmem:[#allocation3 + $0x60] sm:$0xf0] %v1299_v6  ;;  %1312 = vst [vmem:[#allocation3 + $0x68] sm:$0xf0] %v1300_v7 }
 0x19e   : > { %v6210_v8 = vpop.permute.xlu1 %1292 }
 0x19f   : > { %v1388_v9 = vpop.permute.xlu0 %1387 }
 0x1a0   : > { %v1400_v11 = vsel %vm7600_vm11, %v6137_v52, %v1388_v9  ;;  %v1401_v12 = vsel %vm7600_vm11, %v1388_v9, %v1390_v2  ;;  %v1475_v13 = vld [vmem:[#allocation3 + $0x48] sm:$0xff]  ;;  %v1474_v15 = vld [vmem:[#allocation3 + $0x40] sm:$0xff] }
 0x1a1   : > { %1412 = vst [vmem:[#allocation3 + $0x90] sm:$0xf0] %v1400_v11  ;;  %1413 = vst [vmem:[#allocation3 + $0x98] sm:$0xf0] %v1401_v12  ;;  %v5260_v16 = vpack.c.bf16 %v1475_v13, %v1469_v10  ;;  %v5262_v17 = vpack.c.bf16 %v1474_v15, %v1468_v14 }
 0x1a2   : > { %v1241_v50 = vpop.permute.xlu1 %1240 }
 0x1a3   : > { %v1249_v18 = vsel %vm7607_vm5, %v6162_v23, %v1241_v50  ;;  %5261 = vmatprep.subr.bf16.mxu1 %v5260_v16  ;;  %v1291_v19 = vpop.permute.xlu0 %1290 }
 0x1a4   : > { %1261 = vst [vmem:[#allocation3 + $0x80] sm:$0xf] %v1249_v18  ;;  %v1301_v20 = vsel %vm7601_vm10, %v1289_v59, %v1291_v19  ;;  %v1302_v52 = vsel %vm7601_vm10, %v1291_v19, %v6210_v8  ;;  %5263 = vmatpush1.bf16.msra.mxu1 %v5262_v17  ;;  %v1479_v25 = vld [vmem:[#allocation3 + $0x68] sm:$0xff]  ;;  %v1478_v29 = vld [vmem:[#allocation3 + $0x60] sm:$0xff]  ;;  %v1493_v59 = vld [vmem:[#allocation3 + $0xd8] sm:$0xf] }
 0x1a5   : > { %1313 = vst [vmem:[#allocation3 + $0x70] sm:$0xf0] %v1301_v20  ;;  %1314 = vst [vmem:[#allocation3 + $0x78] sm:$0xf0] %v1302_v52 }
 0x1a6   : > { %v6220_v21 = vpop.permute.xlu1 %1393 }
 0x1a7   : > { %v1392_v22 = vpop.permute.xlu0 %1391 }
 0x1a8   : > { %v1402_v26 = vsel %vm7600_vm11, %v1390_v2, %v1392_v22  ;;  %v1403_v23 = vsel %vm7600_vm11, %v1392_v22, %v6220_v21  ;;  %v1485_v27 = vld [vmem:[#allocation3 + $0x98] sm:$0xff]  ;;  %v1484_v30 = vld [vmem:[#allocation3 + $0x90] sm:$0xff] }
 0x1a9   : > { %1414 = vst [vmem:[#allocation3 + $0xa0] sm:$0xf0] %v1402_v26  ;;  %1415 = vst [vmem:[#allocation3 + $0xa8] sm:$0xf0] %v1403_v23  ;;  %v6225_v32 = vpack.c.bf16 %v1485_v27, %v1479_v25  ;;  %v6227_v33 = vpack.c.bf16 %v1484_v30, %v1478_v29  ;;  %v7627_v25 = vmov 0  ;;  %v7633_v29 = vmov 0 }
 0x1aa   : > { %v1342_v31 = vpop.permute.xlu1 %1341  ;;  %v7638_v30 = vmov 0 }
 0x1ab   : > { %v1350_v34 = vsel %vm7605_vm6, %v6167_v28, %v1342_v31  ;;  %5257 = vmatprep.subr.bf16.mxu0 %v6225_v32  ;;  %v1196_v35 = vpop.permute.xlu0 %1195 }
 0x1ac   : > { %1362 = vst [vmem:[#allocation3 + $0xb0] sm:$0xf] %v1350_v34  ;;  %5259 = vmatpush1.bf16.msra.mxu0 %v6227_v33  ;;  %v1481_v45 = vld [vmem:[#allocation3 + $0x78] sm:$0xff]  ;;  %v1480_v51 = vld [vmem:[#allocation3 + $0x70] sm:$0xff] }
 0x1ad   : > { %5216 = vmatprep.subr.msk.mxu0 %vm7597_vm12, %v1491_v36 }
 0x1ae   : > { %v1093_v37 = vpop.permute.xlu1 %1092 }
 0x1af   : > { %v1101_v38 = vsel %vm7603_vm8, %v6188_v49, %v1093_v37  ;;  %v1102_v40 = vsel %vm7603_vm8, %v1093_v37, %v6183_v43  ;;  %v1243_v28 = vpop.permute.xlu0 %1242 }
 0x1b0   : > { %1113 = vst [vmem:[#allocation3 + $0x20] sm:$0xf0] %v1101_v38  ;;  %1114 = vst [vmem:[#allocation3 + $0x28] sm:$0xf0] %v1102_v40  ;;  %v1250_v47 = vsel %vm7607_vm5, %v1241_v50, %v1243_v28  ;;  %5217 = vmatpush1.msk.msra.mxu0 %vm7597_vm12, %v1490_v44  ;;  %v1487_v48 = vld [vmem:[#allocation3 + $0xa8] sm:$0xff]  ;;  %v1486_v53 = vld [vmem:[#allocation3 + $0xa0] sm:$0xff] }
 0x1b1   : > { %1262 = vst [vmem:[#allocation3 + $0x88] sm:$0xf] %v1250_v47  ;;  %5218 = vmatmul.mubr.msk.f32.vlgmr.msra.gmra.mrb[0].mxu0 %vm1502_vm13, %v6238_v41  ;;  %v5264_v43 = vpack.c.bf16 %v1487_v48, %v1481_v45  ;;  %v5266_v54 = vpack.c.bf16 %v1486_v53, %v1480_v51 }
 0x1b2   : > { %v1194_v49 = vpop.permute.xlu1 %1193  ;;  %1731 = vmatprep.mubr.f32.mxu0 %v5879_v24 }
 0x1b3   : > { %v1202_v57 = vsel %vm7602_vm9, %v6193_v56, %v1194_v49  ;;  %v1203_v42 = vsel %vm7602_vm9, %v1194_v49, %v1196_v35  ;;  %5265 = vmatprep.subr.bf16.mxu1 %v5264_v43  ;;  %v1297_v58 = vpop.permute.xlu0 %1296  ;;  %v7661_v49 = vmov 0 }
 0x1b4   : > { %1214 = vst [vmem:[#allocation3 + $0x50] sm:$0xf0] %v1202_v57  ;;  %1215 = vst [vmem:[#allocation3 + $0x58] sm:$0xf0] %v1203_v42  ;;  %5267 = vmatpush1.bf16.msra.mxu1 %v5266_v54  ;;  %v7665_v42 = vmov 0 }
 0x1b5   : > { %5219 = vmatprep.subr.msk.mxu1 %vm7597_vm12, %v1493_v59  ;;  %v7668_v59 = vmov 0 }
 0x1b6   : > { %v1295_v60 = vpop.permute.xlu1 %1294 }
 0x1b7   : > { %v1303_v61 = vsel %vm7601_vm10, %v6210_v8, %v1295_v60  ;;  %v1304_v62 = vsel %vm7601_vm10, %v1295_v60, %v1297_v58  ;;  %v1344_v56 = vpop.permute.xlu0 %1343  ;;  %v1471_v1 = vld [vmem:[#allocation3 + $0x28] sm:$0xff]  ;;  %v1470_v6 = vld [vmem:[#allocation3 + $0x20] sm:$0xff] }
 0x1b8   : > { %1315 = vst [vmem:[#allocation3 + $0x80] sm:$0xf0] %v1303_v61  ;;  %1316 = vst [vmem:[#allocation3 + $0x88] sm:$0xf0] %v1304_v62  ;;  %v1351_v63 = vsel %vm7605_vm6, %v1342_v31, %v1344_v56  ;;  %5220 = vmatpush1.msk.msra.mxu1 %vm7597_vm12, %v1492_v46  ;;  %v7640_v31 = vmov 0 }
 0x1b9   : > { %1363 = vst [vmem:[#allocation3 + $0xb8] sm:$0xf] %v1351_v63  ;;  %5221 = vmatmul.mubr.msk.f32.vlgmr.msra.gmra.mrb[0].mxu1 %vm1502_vm13, %v6238_v41  ;;  %5277 = vmatprep.subr.bf16.mxu1 %v6201_v3 }
 0x1ba   : > { %v1396_v0 = vpop.permute.xlu1 %1395  ;;  %5279 = vmatpush1.bf16.msra.mxu1 %v6203_v4  ;;  %2391 = vmatprep.mubr.f32.mxu1 %v5879_v24 }
 0x1bb   : > { %v1404_v2 = vsel %vm7600_vm11, %v6220_v21, %v1396_v0  ;;  %v1477_v5 = vld [vmem:[#allocation3 + $0x58] sm:$0xff]  ;;  %v1476_v7 = vld [vmem:[#allocation3 + $0x50] sm:$0xff]  ;;  %5281 = vmatprep.subr.bf16.mxu1 %v6225_v32  ;;  %v1398_v8 = vpop.permute.xlu0 %1397  ;;  %v202_v21 = vlaneseq }
 0x1bc   : > { %1416 = vst [vmem:[#allocation3 + $0xb0] sm:$0xf0] %v1404_v2  ;;  %v5268_v9 = vpack.c.bf16 %v1477_v5, %v1471_v1  ;;  %v5270_v10 = vpack.c.bf16 %v1476_v7, %v1470_v6  ;;  %v1405_v11 = vsel %vm7600_vm11, %v1396_v0, %v1398_v8 }
 0x1bd   : > { %1417 = vst [vmem:[#allocation3 + $0xb8] sm:$0xf0] %v1405_v11  ;;  %v6276_v22 = vand.u32 127, %v202_v21 }
 0x1be   : > { %v1443_v12 = vpop.permute.xlu1 %1442  ;;  %5269 = vmatprep.subr.bf16.mxu0 %v5268_v9  ;;  %5283 = vmatpush1.bf16.msra.mxu1 %v6227_v33 }
 0x1bf   : > { %v1451_v13 = vsel %vm7604_vm7, %v6179_v39, %v1443_v12  ;;  %5271 = vmatpush1.bf16.msra.mxu0 %v5270_v10  ;;  %v1445_v14 = vpop.permute.xlu0 %1444  ;;  %v1483_v16 = vld [vmem:[#allocation3 + $0x88] sm:$0xff]  ;;  %v1482_v19 = vld [vmem:[#allocation3 + $0x80] sm:$0xff]  ;;  %vm209_vm14 = vcmp.ge.s32.totalorder %v6276_v22, 19  ;;  %vm215_vm15 = vcmp.le.s32.totalorder %v6276_v22, 34  ;;  %vm251_vm11 = vcmp.ge.s32.totalorder %v6276_v22, 55 }
 0x1c0   : > { %1463 = vst [vmem:[#allocation3 + $0xe0] sm:$0xf] %v1451_v13  ;;  %v1452_v15 = vsel %vm7604_vm7, %v1443_v12, %v1445_v14  ;;  %vm221_vm2 = vmand %vm209_vm14, %vm215_vm15  ;;  %vm257_vm10 = vcmp.le.s32.totalorder %v6276_v22, 70  ;;  %vm275_vm4 = vcmp.ge.s32.totalorder %v6276_v22, 73  ;;  %vm281_vm5 = vcmp.le.s32.totalorder %v6276_v22, 88 }
 0x1c1   : > { %1464 = vst [vmem:[#allocation3 + $0xe8] sm:$0xf] %v1452_v15  ;;  %vm263_vm6 = vmand %vm251_vm11, %vm257_vm10  ;;  %v6319_v27 = vadd.s32 384, %v6276_v22  ;;  %v6394_v37 = vadd.s32 512, %v6276_v22  ;;  %v205_v40 = vadd.s32 256, %v6276_v22 }
 0x1c3   : > { %v1488_v50 = vld [vmem:[#allocation3 + $0xb0] sm:$0xff] }
 0x1c4   : > { %v1489_v17 = vld [vmem:[#allocation3 + $0xb8] sm:$0xff]  ;;  %v5274_v20 = vpack.c.bf16 %v1488_v50, %v1482_v19 }
 0x1c5   : > { %v5272_v18 = vpack.c.bf16 %v1489_v17, %v1483_v16 }
 0x1c7   : > { %5273 = vmatprep.subr.bf16.mxu0 %v5272_v18  ;;  %v1494_v39 = vld [vmem:[#allocation3 + $0xe0] sm:$0xf]  ;;  %v208_v18 = vadd.s32 640, %v6276_v22 }
 0x1c8   : > { %5275 = vmatpush1.bf16.msra.mxu0 %v5274_v20  ;;  %v1495_v52 = vld [vmem:[#allocation3 + $0xe8] sm:$0xf] }
 0x1c9   : > { %5222 = vmatprep.subr.msk.mxu0 %vm7597_vm12, %v1495_v52 }
 0x1cc   : > { %5223 = vmatpush1.msk.msra.mxu0 %vm7597_vm12, %v1494_v39  ;;  %vm227_vm12 = vcmp.ge.s32.totalorder %v6276_v22, 37 }
 0x1cd   : > { %5224 = vmatmul.mubr.msk.f32.vlgmr.msra.gmra.mrb[2].mxu0 %vm1502_vm13, %v6238_v41  ;;  %5325 = vmatprep.subr.bf16.mxu0 %v6201_v3  ;;  %vm233_vm13 = vcmp.le.s32.totalorder %v6276_v22, 52  ;;  %v6283_v3 = vadd.s32 128, %v6276_v22 }
 0x1ce   : > { %5327 = vmatpush1.bf16.msra.mxu0 %v6203_v4  ;;  %3220 = vmatprep.mubr.f32.mxu0 %v5879_v24  ;;  %vm239_vm0 = vmand %vm227_vm12, %vm233_vm13  ;;  %v7625_v4 = vmov 0 }
 0x1cf   : > { %5329 = vmatprep.subr.bf16.mxu0 %v6225_v32  ;;  %vm245_vm9 = vmor %vm221_vm2, %vm239_vm0  ;;  %vm372_vm8 = vcmp.ge.s32.totalorder %v6283_v3, 145  ;;  %vm378_vm7 = vcmp.le.s32.totalorder %v6283_v3, 160  ;;  %vm354_vm14 = vcmp.le.s32.totalorder %v6283_v3, 142  ;;  %vm396_vm12 = vcmp.ge.s32.totalorder %v6283_v3, 163  ;;  %v6418_v44 = vpop.permute.xlu1 %1499 }
 0x1d0   : > { %vm384_vm15 = vmand %vm372_vm8, %vm378_vm7  ;;  %vm402_vm0 = vcmp.le.s32.totalorder %v6283_v3, 178  ;;  %vm426_vm7 = vcmp.le.s32.totalorder %v6283_v3, 196  ;;  %vm305_vm8 = vcmp.le.s32.totalorder %v6276_v22, 106  ;;  %vm450_vm1 = vcmp.le.s32.totalorder %v6283_v3, 214 }
 0x1d1   : > { %vm6292_vm3 = vmor %vm245_vm9, %vm263_vm6  ;;  %vm420_vm6 = vcmp.ge.s32.totalorder %v6283_v3, 181 }
 0x1d2   : > { %5331 = vmatpush1.bf16.msra.mxu0 %v6227_v33  ;;  %v7626_v4 = vsel %vm6292_vm3, 4294967295, %v7625_v4  ;;  %vm6298_vm2 = vmand %vm275_vm4, %vm281_vm5  ;;  %vm299_vm5 = vcmp.ge.s32.totalorder %v6276_v22, 91  ;;  %vm590_vm4 = vcmp.ge.s32.totalorder %v6319_v27, 403 }
 0x1d3   : > { %v7628_v25 = vsel %vm6298_vm2, 4294967295, %v7627_v25  ;;  %vm6302_vm10 = vmor %vm354_vm14, %vm384_vm15  ;;  %vm323_vm15 = vcmp.ge.s32.totalorder %v6276_v22, 109  ;;  %vm596_vm2 = vcmp.le.s32.totalorder %v6319_v27, 418 }
 0x1d4   : > { %vm6306_vm11 = vmand %vm396_vm12, %vm402_vm0  ;;  %vm329_vm12 = vcmp.le.s32.totalorder %v6276_v22, 124  ;;  %vm444_vm0 = vcmp.ge.s32.totalorder %v6283_v3, 199 }
 0x1d5   : > { %vm414_vm9 = vmor %vm6302_vm10, %vm6306_vm11  ;;  %vm614_vm10 = vcmp.ge.s32.totalorder %v6319_v27, 421  ;;  %vm620_vm11 = vcmp.le.s32.totalorder %v6319_v27, 436 }
 0x1d6   : > { %vm432_vm13 = vmand %vm420_vm6, %vm426_vm7  ;;  %vm7635_vm6 = vnez %v7626_v4  ;;  %vm7636_vm7 = vnez %v7628_v25 }
 0x1d7   : > { %vm311_vm14 = vmand %vm299_vm5, %vm305_vm8 }
 0x1d8   : > { %vm6331_vm3 = vmor %vm414_vm9, %vm432_vm13 }
 0x1d9   : > { %v7634_v29 = vsel %vm6331_vm3, 4294967295, %v7633_v29  ;;  %vm7637_vm5 = vmor %vm7635_vm6, %vm7636_vm7  ;;  %vm468_vm3 = vcmp.ge.s32.totalorder %v6283_v3, 217  ;;  %vm474_vm6 = vcmp.le.s32.totalorder %v6283_v3, 232 }
 0x1da   : > { %vm6342_vm8 = vmor %vm7637_vm5, %vm311_vm14  ;;  %vm7644_vm14 = vnez %v7634_v29 }
 0x1db   : > { %v7639_v30 = vsel %vm6342_vm8, 4294967295, %v7638_v30  ;;  %vm6346_vm9 = vmand %vm323_vm15, %vm329_vm12  ;;  %vm638_vm12 = vcmp.ge.s32.totalorder %v6319_v27, 439  ;;  %vm644_vm15 = vcmp.le.s32.totalorder %v6319_v27, 454 }
 0x1dc   : > { %v7641_v31 = vsel %vm6346_vm9, 4294967295, %v7640_v31  ;;  %vm456_vm13 = vmand %vm444_vm0, %vm450_vm1  ;;  %vm492_vm0 = vcmp.ge.s32.totalorder %v6283_v3, 235  ;;  %vm498_vm1 = vcmp.le.s32.totalorder %v6283_v3, 250 }
 0x1dd   : > { %vm6352_vm7 = vmand %vm590_vm4, %vm596_vm2 }
 0x1de   : > { %vm626_vm5 = vmand %vm614_vm10, %vm620_vm11  ;;  %vm662_vm11 = vcmp.ge.s32.totalorder %v6319_v27, 457 }
 0x1df   : > { %vm462_vm8 = vmor %vm7644_vm14, %vm456_vm13  ;;  %vm668_vm13 = vcmp.le.s32.totalorder %v6319_v27, 472 }
 0x1e0   : > { %vm480_vm9 = vmand %vm468_vm3, %vm474_vm6 }
 0x1e1   : > { %vm632_vm2 = vmor %vm6352_vm7, %vm626_vm5  ;;  %vm686_vm5 = vcmp.ge.s32.totalorder %v6319_v27, 475 }
 0x1e2   : > { %vm650_vm4 = vmand %vm638_vm12, %vm644_vm15  ;;  %vm692_vm12 = vcmp.le.s32.totalorder %v6319_v27, 490  ;;  %vm347_vm15 = vcmp.ge.s32.totalorder %v6276_v22, 127 }
 0x1e3   : > { %vm6364_vm10 = vmor %vm462_vm8, %vm480_vm9  ;;  %vm7653_vm8 = vnez %v7641_v31  ;;  %vm7654_vm9 = vnez %v7639_v30 }
 0x1e4   : > { %vm6370_vm14 = vmand %vm492_vm0, %vm498_vm1  ;;  %vm516_vm1 = vcmp.ge.s32.totalorder %v6283_v3, 253 }
 0x1e5   : > { %vm6374_vm3 = vmor %vm632_vm2, %vm650_vm4 }
 0x1e6   : > { %vm6378_vm6 = vmand %vm662_vm11, %vm668_vm13  ;;  %vm710_vm13 = vcmp.ge.s32.totalorder %v6319_v27, 493 }
 0x1e7   : > { %vm341_vm7 = vmor %vm7654_vm9, %vm7653_vm8  ;;  %vm716_vm8 = vcmp.le.s32.totalorder %v6319_v27, 508 }
 0x1e8   : > { %vm510_vm0 = vmor %vm6364_vm10, %vm6370_vm14  ;;  %vm759_vm10 = vcmp.ge.s32.totalorder %v6394_v37, 529  ;;  %vm765_vm14 = vcmp.le.s32.totalorder %v6394_v37, 544 }
 0x1e9   : > { %vm680_vm2 = vmor %vm6374_vm3, %vm6378_vm6 }
 0x1ea   : > { %vm698_vm4 = vmand %vm686_vm5, %vm692_vm12  ;;  %vm783_vm12 = vcmp.ge.s32.totalorder %v6394_v37, 547 }
 0x1eb   : > { %vm365_vm11 = vmor %vm341_vm7, %vm347_vm15  ;;  %vm741_vm7 = vcmp.le.s32.totalorder %v6394_v37, 526  ;;  %vm789_vm15 = vcmp.le.s32.totalorder %v6394_v37, 562 }
 0x1ec   : > { %vm6403_vm9 = vmor %vm510_vm0, %vm516_vm1  ;;  %v6422_v45 = vsel %vm365_vm11, 1, %v5880_v55  ;;  %vm541_vm0 = vcmp.ge.s32.totalorder %v205_v40, 271  ;;  %vm547_vm1 = vcmp.le.s32.totalorder %v205_v40, 286 }
 0x1ed   : > { %vm6410_vm3 = vmor %vm680_vm2, %vm698_vm4  ;;  %v6434_v53 = vsel %vm6403_vm9, 1, %v5880_v55  ;;  %vm734_vm4 = vcmp.ge.s32.totalorder %v6319_v27, 511  ;;  %vm807_vm9 = vcmp.ge.s32.totalorder %v6394_v37, 565  ;;  %vm7671_vm2 = vcmp.eq.s32.totalorder %v6422_v45, 1 }
 0x1ee   : > { %vm6414_vm6 = vmand %vm710_vm13, %vm716_vm8 }
 0x1ef   : > { %vm771_vm5 = vmand %vm759_vm10, %vm765_vm14 }
 0x1f0   : > { %vm6437_vm11 = vmor %vm741_vm7, %vm771_vm5  ;;  %vm813_vm7 = vcmp.le.s32.totalorder %v6394_v37, 580 }
 0x1f1   : > { %v7662_v49 = vsel %vm6437_vm11, 4294967295, %v7661_v49  ;;  %vm6443_vm8 = vmand %vm783_vm12, %vm789_vm15  ;;  %vm523_vm11 = vcmp.le.s32.totalorder %v205_v40, 268 }
 0x1f2   : > { %vm6447_vm14 = vmand %vm541_vm0, %vm547_vm1  ;;  %vm565_vm0 = vcmp.ge.s32.totalorder %v205_v40, 289  ;;  %vm571_vm1 = vcmp.le.s32.totalorder %v205_v40, 304  ;;  %vm7670_vm13 = vnez %v7662_v49 }
 0x1f3   : > { %v7666_v42 = vsel %vm6447_vm14, 4294967295, %v7665_v42  ;;  %vm7667_vm12 = vmor %vm6410_vm3, %vm6414_vm6  ;;  %vm7672_vm6 = vcmp.eq.s32.totalorder %v6434_v53, 1 }
 0x1f4   : > { %vm6459_vm15 = vmor %vm7667_vm12, %vm734_vm4  ;;  %vm7673_vm4 = vnez %v7666_v42 }
 0x1f5   : > { %v7669_v59 = vsel %vm6459_vm15, 4294967295, %v7668_v59  ;;  %vm801_vm14 = vmor %vm7670_vm13, %vm6443_vm8  ;;  %vm837_vm15 = vcmp.le.s32.totalorder %v6394_v37, 598  ;;  %vm855_vm13 = vcmp.ge.s32.totalorder %v6394_v37, 601  ;;  %vm861_vm8 = vcmp.le.s32.totalorder %v6394_v37, 616 }
 0x1f6   : > { %vm819_vm3 = vmand %vm807_vm9, %vm813_vm7 }
 0x1f7   : > { %vm6473_vm12 = vmor %vm523_vm11, %vm7673_vm4  ;;  %vm885_vm4 = vcmp.le.s32.totalorder %v6394_v37, 634 }
 0x1f8   : > { %vm6491_vm11 = vmor %vm801_vm14, %vm819_vm3 }
 0x1f9   : > { %vm867_vm3 = vmand %vm855_vm13, %vm861_vm8  ;;  %vm910_vm13 = vcmp.le.s32.totalorder %v208_v18, 652 }
 0x284   : > { %v1591_v47 = vpop.f32.mrb[0].mxu0 }
 0x285   : > { %v1592_v48 = vadd.f32 %v1591_v47, %v6418_v44  ;;  %v1593_v51 = vpop.f32.mrb[1].mxu0 }
 0x286   : > { %v1594_v43 = vadd.f32 %v1593_v51, %v6418_v44 }
 0x287   : > { %vm1738_vm10 = vcmp.ge.f32.partialorder %v1592_v48, 0.0  ;;  %v1744_v57 = vmul.f32 0.2, %v1592_v48 }
 0x288   : > { %vm1739_vm5 = vcmp.ge.f32.partialorder %v1594_v43, 0.0  ;;  %v1745_v58 = vmul.f32 0.2, %v1594_v43 }
 0x289   : > { %v1750_v60 = vsel %vm1738_vm10, %v1592_v48, %v1744_v57  ;;  %vm831_vm10 = vcmp.ge.s32.totalorder %v6394_v37, 583 }
 0x28a   : > { %v1751_v61 = vsel %vm1739_vm5, %v1594_v43, %v1745_v58  ;;  %v1768_v62 = vsel %vm7671_vm2, %v1750_v60, 0.0  ;;  %vm577_vm5 = vmand %vm565_vm0, %vm571_vm1  ;;  %vm7676_vm2 = vnez %v7669_v59 }
 0x28b   : > { %v1780_v56 = vrot.slane %v1768_v62, 4  ;;  %v1769_v46 = vsel %vm7672_vm6, %v1751_v61, 0.0  ;;  %v6484_v6 = vsel %vm7676_vm2, 1, %v5880_v55  ;;  %vm6497_vm9 = vmand %vm831_vm10, %vm837_vm15  ;;  %vm879_vm6 = vcmp.ge.s32.totalorder %v6394_v37, 619 }
 0x28c   : > { %v1662_v0 = vpop.f32.mrb[0].mxu1  ;;  %v1781_v1 = vrot.slane %v1769_v46, 4  ;;  %vm6503_vm0 = vmor %vm6473_vm12, %vm577_vm5  ;;  %vm7613_vm1 = vcmp.eq.s32.totalorder %v6484_v6, 1  ;;  %vm903_vm2 = vcmp.ge.s32.totalorder %v6394_v37, 637 }
 0x28d   : > { %v1663_v2 = vadd.f32 %v1662_v0, %v6418_v44  ;;  %1786 = vrot.lane.b32.xlu0 %v1780_v56, %s5869_s20  ;;  %v1664_v5 = vpop.f32.mrb[1].mxu1  ;;  %vm849_vm15 = vmor %vm6491_vm11, %vm6497_vm9  ;;  %vm928_vm11 = vcmp.ge.s32.totalorder %v208_v18, 655  ;;  %vm934_vm9 = vcmp.le.s32.totalorder %v208_v18, 670 }
 0x28e   : > { %v1665_v8 = vadd.f32 %v1664_v5, %v6418_v44  ;;  %1788 = vrot.lane.b32.xlu1 %v1781_v1, %s5869_s20  ;;  %vm873_vm12 = vmor %vm849_vm15, %vm867_vm3 }
 0x28f   : > { %vm1740_vm7 = vcmp.ge.f32.partialorder %v1663_v2, 0.0  ;;  %v1746_v10 = vmul.f32 0.2, %v1663_v2  ;;  %vm891_vm10 = vmand %vm879_vm6, %vm885_vm4 }
 0x290   : > { %vm1741_vm14 = vcmp.ge.f32.partialorder %v1665_v8, 0.0  ;;  %v1747_v12 = vmul.f32 0.2, %v1665_v8  ;;  %vm897_vm5 = vmor %vm873_vm12, %vm891_vm10 }
 0x291   : > { %v1752_v13 = vsel %vm1740_vm7, %v1663_v2, %v1746_v10  ;;  %vm921_vm7 = vmor %vm897_vm5, %vm903_vm2  ;;  %vm7685_vm5 = vcmask 261120  }
 0x292   : > { %v1753_v14 = vsel %vm1741_vm14, %v1665_v8, %v1747_v12  ;;  %v1770_v15 = vsel %vm6503_vm0, %v1752_v13, 0.0  ;;  %vm940_vm8 = vmand %vm928_vm11, %vm934_vm9  ;;  %vm952_vm14 = vcmp.ge.s32.totalorder %v208_v18, 673  ;;  %v6525_v20 = vsel %vm921_vm7, 1, %v5880_v55 }
 0x293   : > { %v1782_v50 = vrot.slane %v1770_v15, 4  ;;  %v1771_v16 = vsel %vm7613_vm1, %v1753_v14, 0.0  ;;  %vm958_vm1 = vcmp.le.s32.totalorder %v208_v18, 688  ;;  %vm946_vm15 = vmor %vm910_vm13, %vm940_vm8  ;;  %vm1766_vm4 = vcmp.eq.s32.totalorder %v6525_v20, 1 }
 0x294   : > { %v1783_v17 = vrot.slane %v1771_v16, 4  ;;  %vm964_vm3 = vmand %vm952_vm14, %vm958_vm1  ;;  %vm1810_vm1 = vcmask 1047812   ;;  %vm1817_vm9 = vcmask 261124   ;;  %vm7690_vm8 = vcmask 941056  }
 0x295   : > { %1790 = vrot.lane.b32.xlu0 %v1782_v50, %s5869_s20  ;;  %vm6530_vm10 = vmor %vm946_vm15, %vm964_vm3  ;;  %vm7692_vm15 = vcmask 785408   ;;  %vm7693_vm3 = vcmask 924672  }
 0x296   : > { %1792 = vrot.lane.b32.xlu1 %v1783_v17, %s5869_s20  ;;  %vm7686_vm2 = vmmov %vm7685_vm5 }
 0x297   : > { %vm7687_vm11 = vmmov %vm7686_vm2 }
 0x298   : > { %vm7688_vm7 = vmmov %vm7686_vm2 }
 0x299   : > { %vm7689_vm13 = vmmov %vm7686_vm2 }
 0x29a   : > { %vm7691_vm14 = vmmov %vm7690_vm8 }
 0x2a0   : > { %v1733_v19 = vpop.f32.mrb[2].mxu0 }
 0x2a1   : > { %v1734_v52 = vadd.f32 %v1733_v19, %v6418_v44  ;;  %v1735_v39 = vpop.f32.mrb[3].mxu0 }
 0x2a2   : > { %v1736_v21 = vadd.f32 %v1735_v39, %v6418_v44 }
 0x2a3   : > { %vm1742_vm6 = vcmp.ge.f32.partialorder %v1734_v52, 0.0  ;;  %v1748_v22 = vmul.f32 0.2, %v1734_v52 }
 0x2a4   : > { %vm1743_vm12 = vcmp.ge.f32.partialorder %v1736_v21, 0.0  ;;  %v1749_v3 = vmul.f32 0.2, %v1736_v21 }
 0x2a5   : > { %v1754_v25 = vsel %vm1742_vm6, %v1734_v52, %v1748_v22  ;;  %vm7694_vm6 = vmmov %vm7693_vm3 }
 0x2a6   : > { %v1755_v55 = vsel %vm1743_vm12, %v1736_v21, %v1749_v3  ;;  %v1772_v26 = vsel %vm1766_vm4, %v1754_v25, 0.0  ;;  %vm7695_vm12 = vcmask 646144  }
 0x2a7   : > { %v1784_v23 = vrot.slane %v1772_v26, 4  ;;  %v1773_v27 = vsel %vm6530_vm10, %v1755_v55, 0.0 }
 0x2a8   : > { %v1785_v29 = vrot.slane %v1773_v27, 4 }
 0x2a9   : > { %1794 = vrot.lane.b32.xlu0 %v1784_v23, %s5869_s20 }
 0x2aa   : > { %1796 = vrot.lane.b32.xlu1 %v1785_v29, %s5869_s20 }
 0x2ff   : > { %v1787_v30 = vpop.permute.xlu0 %1786 }
 0x300   : > { %1811 = vst.msk [vmem:[#allocation2] sm:$0xf0] %vm1810_vm1, %v1787_v30  ;;  %v1789_v31 = vpop.permute.xlu1 %1788 }
 0x301   : > { %v1798_v32 = vsel %vm7685_vm5, %v1787_v30, %v1789_v31  ;;  %vm7696_vm5 = vmmov %vm7692_vm15 }
 0x302   : > { %1812 = vst [vmem:[#allocation2 + $0x8] sm:$0xf0] %v1798_v32 }
 0x307   : > { %v1791_v33 = vpop.permute.xlu0 %1790  ;;  %v1819_v34 = vld [vmem:[#allocation2] sm:$0xf0] }
 0x308   : > { %v1799_v35 = vsel %vm7686_vm2, %v1789_v31, %v1791_v33  ;;  %v1793_v36 = vpop.permute.xlu1 %1792  ;;  %1833 = vrot.lane.b32.xlu0 %v1819_v34, %s5870_s18  ;;  %v1918_v38 = vld [vmem:[#allocation2] sm:$0xf0]  ;;  %vm7697_vm2 = vmmov %vm7695_vm12 }
 0x309   : > { %1813 = vst [vmem:[#allocation2 + $0x10] sm:$0xf0] %v1799_v35  ;;  %v1800_v37 = vsel %vm7687_vm11, %v1791_v33, %v1793_v36  ;;  %v2017_v40 = vld [vmem:[#allocation2] sm:$0xf0]  ;;  %v1820_v43 = vld [vmem:[#allocation2 + $0x8] sm:$0xf0] }
 0x30a   : > { %1814 = vst [vmem:[#allocation2 + $0x18] sm:$0xf0] %v1800_v37  ;;  %v2116_v28 = vld [vmem:[#allocation2] sm:$0xf0]  ;;  %v2018_v42 = vld [vmem:[#allocation2 + $0x8] sm:$0xf0] }
 0x30b   : > { %v1865_v47 = vld [vmem:[#allocation2] sm:$0xf0]  ;;  %v1919_v59 = vld [vmem:[#allocation2 + $0x8] sm:$0xf0]  ;;  %vm7698_vm11 = vcmask 629760  }
 0x30c   : > { %1932 = vrot.lane.b32.xlu0 %v1918_v38, %s5872_s25  ;;  %v2215_v48 = vld [vmem:[#allocation2] sm:$0xf0]  ;;  %v1879_v51 = vrot.slane %v1865_v47, 4  ;;  %v2117_v60 = vld [vmem:[#allocation2 + $0x8] sm:$0xf0] }
 0x30d   : > { %v1964_v61 = vld [vmem:[#allocation2] sm:$0xf0]  ;;  %v1866_v2 = vld [vmem:[#allocation2 + $0x8] sm:$0xf0] }
 0x30e   : > { %v1978_v56 = vrot.slane %v1964_v61, 4  ;;  %v2063_v46 = vld [vmem:[#allocation2] sm:$0xf0]  ;;  %v2216_v5 = vld [vmem:[#allocation2 + $0x8] sm:$0xf0]  ;;  %v1880_v8 = vrot.slane %v1866_v2, 4 }
 0x30f   : > { %v2077_v0 = vrot.slane %v2063_v46, 4  ;;  %v2162_v7 = vld [vmem:[#allocation2] sm:$0xf0]  ;;  %v1965_v55 = vld [vmem:[#allocation2 + $0x8] sm:$0xf0] }
 0x310   : > { %2031 = vrot.lane.b32.xlu0 %v2017_v40, %s5874_s5  ;;  %v1821_v41 = vld [vmem:[#allocation2 + $0x10] sm:$0xf0]  ;;  %v2176_v9 = vrot.slane %v2162_v7, 4  ;;  %v1979_v23 = vrot.slane %v1965_v55, 4  ;;  %v2064_v27 = vld [vmem:[#allocation2 + $0x8] sm:$0xf0] }
 0x311   : > { %1837 = vrot.lane.b32.xlu1 %v1821_v41, %s5870_s18  ;;  %v1920_v44 = vld [vmem:[#allocation2 + $0x10] sm:$0xf0]  ;;  %v1822_v14 = vld [vmem:[#allocation2 + $0x18] sm:$0xf0]  ;;  %v2078_v30 = vrot.slane %v2064_v27, 4 }
 0x312   : > { %v2019_v62 = vld [vmem:[#allocation2 + $0x10] sm:$0xf0]  ;;  %v1921_v16 = vld [vmem:[#allocation2 + $0x18] sm:$0xf0]  ;;  %v2163_v31 = vld [vmem:[#allocation2 + $0x8] sm:$0xf0] }
 0x313   : > { %v2118_v63 = vld [vmem:[#allocation2 + $0x10] sm:$0xf0]  ;;  %v2020_v18 = vld [vmem:[#allocation2 + $0x18] sm:$0xf0]  ;;  %v2177_v33 = vrot.slane %v2163_v31, 4 }
 0x314   : > { %2130 = vrot.lane.b32.xlu0 %v2116_v28, %s5876_s9  ;;  %v2217_v1 = vld [vmem:[#allocation2 + $0x10] sm:$0xf0]  ;;  %v2119_v52 = vld [vmem:[#allocation2 + $0x18] sm:$0xf0]  ;;  %v2316_v55 = vld [vmem:[%s7592_s2 + $0x4] sm:$0xf] }
 0x315   : > { %1936 = vrot.lane.b32.xlu1 %v1920_v44, %s5872_s25  ;;  %v1966_v10 = vld [vmem:[#allocation2 + $0x10] sm:$0xf0]  ;;  %v2218_v21 = vld [vmem:[#allocation2 + $0x18] sm:$0xf0] }
 0x316   : > { %v1980_v12 = vrot.slane %v1966_v10, 4  ;;  %v2065_v13 = vld [vmem:[#allocation2 + $0x10] sm:$0xf0]  ;;  %v1868_v35 = vld [vmem:[#allocation2 + $0x18] sm:$0xf0] }
 0x317   : > { %v2079_v15 = vrot.slane %v2065_v13, 4  ;;  %v2164_v50 = vld [vmem:[#allocation2 + $0x10] sm:$0xf0]  ;;  %v1882_v37 = vrot.slane %v1868_v35, 4  ;;  %v1967_v40 = vld [vmem:[#allocation2 + $0x18] sm:$0xf0] }
 0x318   : > { %2229 = vrot.lane.b32.xlu0 %v2215_v48, %s5878_s11  ;;  %v2178_v17 = vrot.slane %v2164_v50, 4  ;;  %v1867_v22 = vld [vmem:[#allocation2 + $0x10] sm:$0xf0]  ;;  %v1981_v28 = vrot.slane %v1967_v40, 4  ;;  %v2066_v47 = vld [vmem:[#allocation2 + $0x18] sm:$0xf0] }
 0x319   : > { %1886 = vrot.lane.b32.xlu1 %v1879_v51, %s5871_s23  ;;  %v1881_v25 = vrot.slane %v1867_v22, 4  ;;  %v2080_v51 = vrot.slane %v2066_v47, 4 }
 0x31b   : > { %v1795_v49 = vpop.permute.xlu0 %1794 }
 0x31c   : > { %v1801_v54 = vsel %vm7688_vm7, %v1793_v36, %v1795_v49  ;;  %v1797_v57 = vpop.permute.xlu1 %1796  ;;  %1835 = vrot.lane.b32.xlu0 %v1820_v43, %s5870_s18  ;;  %vm7699_vm7 = vmmov %vm7698_vm11 }
 0x31d   : > { %1815 = vst [vmem:[#allocation2 + $0x20] sm:$0xf0] %v1801_v54  ;;  %v1802_v58 = vsel %vm7689_vm13, %v1795_v49, %v1797_v57  ;;  %1818 = vst.msk [vmem:[#allocation2 + $0x30] sm:$0xf0] %vm1817_vm9, %v1797_v57  ;;  %2033 = vrot.lane.b32.xlu1 %v2018_v42, %s5874_s5  ;;  %v2165_v49 = vld [vmem:[#allocation2 + $0x18] sm:$0xf0] }
 0x31e   : > { %1816 = vst [vmem:[#allocation2 + $0x28] sm:$0xf0] %v1802_v58  ;;  %v2179_v54 = vrot.slane %v2165_v49, 4  ;;  %vm7700_vm13 = vcmask 932864  }
 0x320   : > { %1934 = vrot.lane.b32.xlu0 %v1919_v59, %s5872_s25 }
 0x321   : > { %2132 = vrot.lane.b32.xlu1 %v2117_v60, %s5876_s9 }
 0x324   : > { %2035 = vrot.lane.b32.xlu0 %v2019_v62, %s5874_s5  ;;  %v1823_v19 = vld [vmem:[#allocation2 + $0x20] sm:$0xf0]  ;;  %v1825_v32 = vld [vmem:[#allocation2 + $0x30] sm:$0xf0] }
 0x325   : > { %1985 = vrot.lane.b32.xlu1 %v1978_v56, %s5873_s4  ;;  %v1922_v39 = vld [vmem:[#allocation2 + $0x20] sm:$0xf0]  ;;  %v1924_v43 = vld [vmem:[#allocation2 + $0x30] sm:$0xf0]  ;;  %v1824_v58 = vld [vmem:[#allocation2 + $0x28] sm:$0xf0] }
 0x326   : > { %v2021_v3 = vld [vmem:[#allocation2 + $0x20] sm:$0xf0]  ;;  %v2023_v59 = vld [vmem:[#allocation2 + $0x30] sm:$0xf0]  ;;  %v1923_v60 = vld [vmem:[#allocation2 + $0x28] sm:$0xf0] }
 0x327   : > { %v2120_v26 = vld [vmem:[#allocation2 + $0x20] sm:$0xf0]  ;;  %v2122_v61 = vld [vmem:[#allocation2 + $0x30] sm:$0xf0]  ;;  %v2022_v56 = vld [vmem:[#allocation2 + $0x28] sm:$0xf0] }
 0x328   : > { %2134 = vrot.lane.b32.xlu0 %v2118_v63, %s5876_s9  ;;  %v2219_v29 = vld [vmem:[#allocation2 + $0x20] sm:$0xf0]  ;;  %v1871_v62 = vld [vmem:[#allocation2 + $0x30] sm:$0xf0] }
 0x329   : > { %2084 = vrot.lane.b32.xlu1 %v2077_v0, %s5875_s8  ;;  %v1869_v34 = vld [vmem:[#allocation2 + $0x20] sm:$0xf0]  ;;  %v1885_v46 = vrot.slane %v1871_v62, 4  ;;  %v1970_v63 = vld [vmem:[#allocation2 + $0x30] sm:$0xf0] }
 0x32a   : > { %v1883_v36 = vrot.slane %v1869_v34, 4  ;;  %v1968_v38 = vld [vmem:[#allocation2 + $0x20] sm:$0xf0]  ;;  %v2121_v0 = vld [vmem:[#allocation2 + $0x28] sm:$0xf0]  ;;  %v1984_v2 = vrot.slane %v1970_v63, 4 }
 0x32b   : > { %v1982_v41 = vrot.slane %v1968_v38, 4  ;;  %v2067_v44 = vld [vmem:[#allocation2 + $0x20] sm:$0xf0]  ;;  %v2069_v7 = vld [vmem:[#allocation2 + $0x30] sm:$0xf0] }
 0x32c   : > { %2233 = vrot.lane.b32.xlu0 %v2217_v1, %s5878_s11  ;;  %v2081_v48 = vrot.slane %v2067_v44, 4  ;;  %v2166_v57 = vld [vmem:[#allocation2 + $0x20] sm:$0xf0]  ;;  %v1870_v1 = vld [vmem:[#allocation2 + $0x28] sm:$0xf0]  ;;  %v2083_v10 = vrot.slane %v2069_v7, 4 }
 0x32d   : > { %2231 = vrot.lane.b32.xlu1 %v2216_v5, %s5878_s11  ;;  %v2180_v42 = vrot.slane %v2166_v57, 4  ;;  %v1884_v5 = vrot.slane %v1870_v1, 4  ;;  %v2168_v13 = vld [vmem:[#allocation2 + $0x30] sm:$0xf0] }
 0x32e   : > { %v2182_v50 = vrot.slane %v2168_v13, 4 }
 0x330   : > { %1888 = vrot.lane.b32.xlu0 %v1880_v8, %s5871_s23  ;;  %v1969_v8 = vld [vmem:[#allocation2 + $0x28] sm:$0xf0] }
 0x331   : > { %2183 = vrot.lane.b32.xlu1 %v2176_v9, %s5877_s10 }
 0x334   : > { %1989 = vrot.lane.b32.xlu0 %v1980_v12, %s5873_s4  ;;  %v1983_v12 = vrot.slane %v1969_v8, 4 }
 0x335   : > { %1839 = vrot.lane.b32.xlu1 %v1822_v14, %s5870_s18  ;;  %v2068_v14 = vld [vmem:[#allocation2 + $0x28] sm:$0xf0] }
 0x338   : > { %2088 = vrot.lane.b32.xlu0 %v2079_v15, %s5875_s8 }
 0x339   : > { %1938 = vrot.lane.b32.xlu1 %v1921_v16, %s5872_s25  ;;  %v2082_v16 = vrot.slane %v2068_v14, 4 }
 0x33c   : > { %2187 = vrot.lane.b32.xlu0 %v2178_v17, %s5877_s10  ;;  %v2167_v17 = vld [vmem:[#allocation2 + $0x28] sm:$0xf0] }
 0x33d   : > { %2037 = vrot.lane.b32.xlu1 %v2020_v18, %s5874_s5 }
 0x340   : > { %1841 = vrot.lane.b32.xlu0 %v1823_v19, %s5870_s18 }
 0x341   : > { %2136 = vrot.lane.b32.xlu1 %v2119_v52, %s5876_s9  ;;  %v2221_v52 = vld [vmem:[#allocation2 + $0x30] sm:$0xf0] }
 0x344   : > { %1940 = vrot.lane.b32.xlu0 %v1922_v39, %s5872_s25  ;;  %v2181_v39 = vrot.slane %v2167_v17, 4 }
 0x345   : > { %2235 = vrot.lane.b32.xlu1 %v2218_v21, %s5878_s11 }
 0x348   : > { %2039 = vrot.lane.b32.xlu0 %v2021_v3, %s5874_s5  ;;  %v2220_v3 = vld [vmem:[#allocation2 + $0x28] sm:$0xf0] }
 0x349   : > { %1890 = vrot.lane.b32.xlu1 %v1881_v25, %s5871_s23 }
 0x34c   : > { %2138 = vrot.lane.b32.xlu0 %v2120_v26, %s5876_s9 }
 0x34d   : > { %1987 = vrot.lane.b32.xlu1 %v1979_v23, %s5873_s4 }
 0x350   : > { %2237 = vrot.lane.b32.xlu0 %v2219_v29, %s5878_s11 }
 0x351   : > { %2086 = vrot.lane.b32.xlu1 %v2078_v30, %s5875_s8 }
 0x354   : > { %1845 = vrot.lane.b32.xlu0 %v1825_v32, %s5870_s18 }
 0x355   : > { %2185 = vrot.lane.b32.xlu1 %v2177_v33, %s5877_s10 }
 0x358   : > { %1894 = vrot.lane.b32.xlu0 %v1883_v36, %s5871_s23 }
 0x359   : > { %1892 = vrot.lane.b32.xlu1 %v1882_v37, %s5871_s23 }
 0x35c   : > { %1993 = vrot.lane.b32.xlu0 %v1982_v41, %s5873_s4 }
 0x35d   : > { %1991 = vrot.lane.b32.xlu1 %v1981_v28, %s5873_s4 }
 0x360   : > { %2092 = vrot.lane.b32.xlu0 %v2081_v48, %s5875_s8 }
 0x361   : > { %2090 = vrot.lane.b32.xlu1 %v2080_v51, %s5875_s8 }
 0x364   : > { %1944 = vrot.lane.b32.xlu0 %v1924_v43, %s5872_s25 }
 0x365   : > { %2189 = vrot.lane.b32.xlu1 %v2179_v54, %s5877_s10 }
 0x368   : > { %2191 = vrot.lane.b32.xlu0 %v2180_v42, %s5877_s10 }
 0x369   : > { %1843 = vrot.lane.b32.xlu1 %v1824_v58, %s5870_s18 }
 0x36c   : > { %2043 = vrot.lane.b32.xlu0 %v2023_v59, %s5874_s5 }
 0x36d   : > { %1942 = vrot.lane.b32.xlu1 %v1923_v60, %s5872_s25 }
 0x370   : > { %2142 = vrot.lane.b32.xlu0 %v2122_v61, %s5876_s9 }
 0x371   : > { %2041 = vrot.lane.b32.xlu1 %v2022_v56, %s5874_s5 }
 0x374   : > { %1898 = vrot.lane.b32.xlu0 %v1885_v46, %s5871_s23 }
 0x375   : > { %2140 = vrot.lane.b32.xlu1 %v2121_v0, %s5876_s9 }
 0x378   : > { %1997 = vrot.lane.b32.xlu0 %v1984_v2, %s5873_s4 }
 0x379   : > { %1896 = vrot.lane.b32.xlu1 %v1884_v5, %s5871_s23 }
 0x37a   : > { %v1834_v9 = vpop.permute.xlu0 %1833 }
 0x37c   : > { %2096 = vrot.lane.b32.xlu0 %v2083_v10, %s5875_s8 }
 0x37d   : > { %1995 = vrot.lane.b32.xlu1 %v1983_v12, %s5873_s4 }
 0x37e   : > { %v1933_v15 = vpop.permute.xlu0 %1932 }
 0x380   : > { %2195 = vrot.lane.b32.xlu0 %v2182_v50, %s5877_s10 }
 0x381   : > { %2094 = vrot.lane.b32.xlu1 %v2082_v16, %s5875_s8 }
 0x382   : > { %v2032_v18 = vpop.permute.xlu0 %2031 }
 0x383   : > { %v1838_v19 = vpop.permute.xlu1 %1837 }
 0x384   : > { %2241 = vrot.lane.b32.xlu0 %v2221_v52, %s5878_s11 }
 0x385   : > { %2193 = vrot.lane.b32.xlu1 %v2181_v39, %s5877_s10 }
 0x386   : > { %v2131_v21 = vpop.permute.xlu0 %2130 }
 0x387   : > { %v1937_v22 = vpop.permute.xlu1 %1936 }
 0x389   : > { %2239 = vrot.lane.b32.xlu1 %v2220_v3, %s5878_s11 }
 0x38a   : > { %v2230_v25 = vpop.permute.xlu0 %2229 }
 0x38b   : > { %v1887_v26 = vpop.permute.xlu1 %1886 }
 0x38d   : > { %2319 = vperm.xlu1 %5730, %v2316_v55  }
 0x38e   : > { %v1836_v23 = vpop.permute.xlu0 %1835 }
 0x38f   : > { %v1847_v27 = vsel %vm7690_vm8, %v1834_v9, %v1836_v23  ;;  %v1848_v29 = vsel %vm7691_vm14, %v1836_v23, %v1838_v19  ;;  %v2034_v30 = vpop.permute.xlu1 %2033  ;;  %vm7701_vm14 = vmmov %vm7693_vm3 }
 0x390   : > { %1859 = vst [vmem:[#allocation3 + $0xc0] sm:$0xf0] %v1847_v27  ;;  %1860 = vst [vmem:[#allocation3 + $0xc8] sm:$0xf0] %v1848_v29  ;;  %v2045_v31 = vsel %vm7692_vm15, %v2032_v18, %v2034_v30 }
 0x391   : > { %2057 = vst [vmem:[#allocation3 + $0x120] sm:$0xf0] %v2045_v31  ;;  %vm7702_vm15 = vmmov %vm7696_vm5 }
 0x392   : > { %v1935_v32 = vpop.permute.xlu0 %1934 }
 0x393   : > { %v1946_v33 = vsel %vm7693_vm3, %v1933_v15, %v1935_v32  ;;  %v1947_v34 = vsel %vm7694_vm6, %v1935_v32, %v1937_v22  ;;  %v2133_v35 = vpop.permute.xlu1 %2132  ;;  %vm7703_vm3 = vmmov %vm7690_vm8 }
 0x394   : > { %1958 = vst [vmem:[#allocation3 + $0xf0] sm:$0xf0] %v1946_v33  ;;  %1959 = vst [vmem:[#allocation3 + $0xf8] sm:$0xf0] %v1947_v34  ;;  %v2144_v36 = vsel %vm7695_vm12, %v2131_v21, %v2133_v35 }
 0x395   : > { %2156 = vst [vmem:[#allocation3 + $0x150] sm:$0xf0] %v2144_v36  ;;  %vm7704_vm6 = vmmov %vm7697_vm2 }
 0x396   : > { %v2036_v37 = vpop.permute.xlu0 %2035  ;;  %vm7705_vm12 = vmmov %vm7701_vm14 }
 0x397   : > { %v2046_v38 = vsel %vm7696_vm5, %v2034_v30, %v2036_v37  ;;  %v1986_v40 = vpop.permute.xlu1 %1985  ;;  %vm7706_vm5 = vmmov %vm7699_vm7  ;;  %v2287_v55 = vld [vmem:[#allocation3 + $0xc8] sm:$0xff]  ;;  %v2286_v27 = vld [vmem:[#allocation3 + $0xc0] sm:$0xff] }
 0x398   : > { %2058 = vst [vmem:[#allocation3 + $0x128] sm:$0xf0] %v2046_v38 }
 0x39a   : > { %v2135_v41 = vpop.permute.xlu0 %2134 }
 0x39b   : > { %v2145_v28 = vsel %vm7697_vm2, %v2133_v35, %v2135_v41  ;;  %v2085_v44 = vpop.permute.xlu1 %2084  ;;  %vm7707_vm2 = vmmov %vm7702_vm15 }
 0x39c   : > { %2157 = vst [vmem:[#allocation3 + $0x158] sm:$0xf0] %v2145_v28 }
 0x39e   : > { %v2234_v47 = vpop.permute.xlu0 %2233 }
 0x39f   : > { %v2232_v48 = vpop.permute.xlu1 %2231 }
 0x3a0   : > { %v2243_v51 = vsel %vm7698_vm11, %v2230_v25, %v2232_v48  ;;  %v2244_v49 = vsel %vm7699_vm7, %v2232_v48, %v2234_v47  ;;  %vm7708_vm11 = vmmov %vm7700_vm13 }
 0x3a1   : > { %2255 = vst [vmem:[#allocation3 + $0x180] sm:$0xf0] %v2243_v51  ;;  %2256 = vst [vmem:[#allocation3 + $0x188] sm:$0xf0] %v2244_v49  ;;  %v2261_v51 = vld [vmem:[#allocation7] sm:$0xf0] }
 0x3a2   : > { %v1889_v43 = vpop.permute.xlu0 %1888  ;;  %vm7709_vm7 = vmmov %vm7704_vm6 }
 0x3a3   : > { %v1900_v54 = vsel %vm7700_vm13, %v1887_v26, %v1889_v43  ;;  %v2184_v57 = vpop.permute.xlu1 %2183  ;;  %vm7710_vm13 = vcmask 793600  }
 0x3a4   : > { %1912 = vst [vmem:[#allocation3 + $0xf0] sm:$0xf] %v1900_v54 }
 0x3a6   : > { %v6624_v42 = vpop.permute.xlu0 %1989 }
 0x3a7   : > { %v1840_v58 = vpop.permute.xlu1 %1839 }
 0x3a8   : > { %v1849_v59 = vsel %vm7690_vm8, %v1838_v19, %v1840_v58  ;;  %vm7711_vm8 = vmmov %vm7710_vm13 }
 0x3a9   : > { %1861 = vst [vmem:[#allocation3 + $0xd0] sm:$0xf0] %v1849_v59  ;;  %v6681_v59 = vrot.slane %v2261_v51, 4  ;;  %v2272_v51 = vld [vmem:[#allocation3 + $0x50] sm:$0xff] }
 0x3aa   : > { %v6627_v60 = vpop.permute.xlu0 %2088 }
 0x3ab   : > { %v1939_v61 = vpop.permute.xlu1 %1938 }
 0x3ac   : > { %v1948_v62 = vsel %vm7701_vm14, %v1937_v22, %v1939_v61  ;;  %vm7712_vm14 = vmmov %vm7706_vm5  ;;  %v2292_v22 = vld [vmem:[#allocation3 + $0xf0] sm:$0xff] }
 0x3ad   : > { %1960 = vst [vmem:[#allocation3 + $0x100] sm:$0xf0] %v1948_v62  ;;  %v5286_v30 = vpack.c.bf16 %v2292_v22, %v2286_v27 }
 0x3ae   : > { %v6630_v56 = vpop.permute.xlu0 %2187 }
 0x3af   : > { %v2038_v46 = vpop.permute.xlu1 %2037 }
 0x3b0   : > { %v2047_v63 = vsel %vm7702_vm15, %v2036_v37, %v2038_v46  ;;  %vm7713_vm15 = vcmask 777216  }
 0x3b1   : > { %2059 = vst [vmem:[#allocation3 + $0x130] sm:$0xf0] %v2047_v63 }
 0x3b2   : > { %v6633_v0 = vpop.permute.xlu0 %1841 }
 0x3b3   : > { %v1850_v1 = vsel %vm7703_vm3, %v1840_v58, %v6633_v0  ;;  %v2137_v2 = vpop.permute.xlu1 %2136  ;;  %vm7714_vm3 = vmmov %vm7713_vm15  ;;  %v2271_v58 = vld [vmem:[#allocation3 + $0x48] sm:$0xff] }
 0x3b4   : > { %1862 = vst [vmem:[#allocation3 + $0xd8] sm:$0xf0] %v1850_v1  ;;  %v2146_v5 = vsel %vm7704_vm6, %v2135_v41, %v2137_v2  ;;  %vm7715_vm6 = vcmask 637952  }
 0x3b5   : > { %2158 = vst [vmem:[#allocation3 + $0x160] sm:$0xf0] %v2146_v5  ;;  %v2264_v5 = vld [vmem:[#allocation3 + $0x10] sm:$0xff] }
 0x3b6   : > { %v6638_v7 = vpop.permute.xlu0 %1940 }
 0x3b7   : > { %v1949_v8 = vsel %vm7705_vm12, %v1939_v61, %v6638_v7  ;;  %v2236_v9 = vpop.permute.xlu1 %2235  ;;  %vm7716_vm12 = vmmov %vm7715_vm6  ;;  %v2270_v61 = vld [vmem:[#allocation3 + $0x40] sm:$0xff] }
 0x3b8   : > { %1961 = vst [vmem:[#allocation3 + $0x108] sm:$0xf0] %v1949_v8  ;;  %v2245_v10 = vsel %vm7706_vm5, %v2234_v47, %v2236_v9  ;;  %vm7717_vm5 = vmmov %vm7708_vm11 }
 0x3b9   : > { %2257 = vst [vmem:[#allocation3 + $0x190] sm:$0xf0] %v2245_v10  ;;  %v6694_v10 = vpack.c.bf16 %v2270_v61, %v2264_v5  ;;  %v2279_v5 = vld [vmem:[#allocation3 + $0x88] sm:$0xff] }
 0x3ba   : > { %v6643_v12 = vpop.permute.xlu0 %2039 }
 0x3bb   : > { %v2048_v13 = vsel %vm7707_vm2, %v2038_v46, %v6643_v12  ;;  %v1891_v14 = vpop.permute.xlu1 %1890  ;;  %vm7718_vm2 = vmmov %vm7717_vm5  ;;  %v2265_v46 = vld [vmem:[#allocation3 + $0x18] sm:$0xff] }
 0x3bc   : > { %2060 = vst [vmem:[#allocation3 + $0x138] sm:$0xf0] %v2048_v13  ;;  %v1901_v15 = vsel %vm7708_vm11, %v1889_v43, %v1891_v14  ;;  %vm7719_vm11 = vmmov %vm7711_vm8  ;;  %v2277_v13 = vld [vmem:[#allocation3 + $0x78] sm:$0xff] }
 0x3bd   : > { %1913 = vst [vmem:[#allocation3 + $0xf8] sm:$0xf] %v1901_v15  ;;  %v2282_v15 = vld [vmem:[#allocation3 + $0xa0] sm:$0xff] }
 0x3be   : > { %v6648_v50 = vpop.permute.xlu0 %2138 }
 0x3bf   : > { %v2147_v16 = vsel %vm7709_vm7, %v2137_v2, %v6648_v50  ;;  %v1988_v17 = vpop.permute.xlu1 %1987  ;;  %vm7720_vm7 = vmmov %vm7711_vm8  ;;  %v6687_v2 = vpack.c.bf16 %v2271_v58, %v2265_v46  ;;  %v2266_v46 = vld [vmem:[#allocation3 + $0x20] sm:$0xff] }
 0x3c0   : > { %2159 = vst [vmem:[#allocation3 + $0x168] sm:$0xf0] %v2147_v16  ;;  %v1999_v18 = vsel %vm7710_vm13, %v1986_v40, %v1988_v17  ;;  %v2000_v19 = vsel %vm7711_vm8, %v1988_v17, %v6624_v42  ;;  %vm2324_vm13 = vcmask 588800   ;;  %vm7721_vm8 = vmmov %vm7714_vm3 }
 0x3c1   : > { %2011 = vst [vmem:[#allocation3 + $0x120] sm:$0xf] %v1999_v18  ;;  %2012 = vst [vmem:[#allocation3 + $0x128] sm:$0xf] %v2000_v19  ;;  %v2276_v18 = vld [vmem:[#allocation3 + $0x70] sm:$0xff] }
 0x3c2   : > { %v6655_v52 = vpop.permute.xlu0 %2237 }
 0x3c3   : > { %v2246_v39 = vsel %vm7712_vm14, %v2236_v9, %v6655_v52  ;;  %v2087_v21 = vpop.permute.xlu1 %2086  ;;  %vm7722_vm14 = vmmov %vm7714_vm3 }
 0x3c4   : > { %2258 = vst [vmem:[#allocation3 + $0x198] sm:$0xf0] %v2246_v39  ;;  %v2098_v3 = vsel %vm7713_vm15, %v2085_v44, %v2087_v21  ;;  %v2099_v25 = vsel %vm7714_vm3, %v2087_v21, %v6627_v60  ;;  %v2293_v26 = vld [vmem:[#allocation3 + $0xf8] sm:$0xff]  ;;  %vm7723_vm15 = vmmov %vm7715_vm6  ;;  %v6706_v39 = vpack.c.bf16 %v2282_v15, %v2276_v18 }
 0x3c5   : > { %2110 = vst [vmem:[#allocation3 + $0x150] sm:$0xf] %v2098_v3  ;;  %2111 = vst [vmem:[#allocation3 + $0x158] sm:$0xf] %v2099_v25  ;;  %v5284_v23 = vpack.c.bf16 %v2293_v26, %v2287_v55  ;;  %v2289_v21 = vld [vmem:[#allocation3 + $0xd8] sm:$0xff] }
 0x3c6   : > { %v6662_v29 = vpop.permute.xlu0 %1845  ;;  %vm7724_vm3 = vmmov %vm7715_vm6 }
 0x3c7   : > { %v2186_v31 = vpop.permute.xlu1 %2185  ;;  %5285 = vmatprep.subr.bf16.mxu1 %v5284_v23  ;;  %5333 = vmatprep.subr.bf16.mxu0 %v5284_v23  ;;  %v2288_v23 = vld [vmem:[#allocation3 + $0xd0] sm:$0xff] }
 0x3c8   : > { %v2197_v32 = vsel %vm7715_vm6, %v2184_v57, %v2186_v31  ;;  %v2198_v33 = vsel %vm7716_vm12, %v2186_v31, %v6630_v56  ;;  %5287 = vmatpush1.bf16.msra.mxu1 %v5286_v30  ;;  %5335 = vmatpush1.bf16.msra.mxu0 %v5286_v30  ;;  %v2299_v36 = vld [vmem:[#allocation3 + $0x128] sm:$0xff]  ;;  %v2298_v41 = vld [vmem:[#allocation3 + $0x120] sm:$0xff]  ;;  %vm7725_vm6 = vcmask 941056  }
 0x3c9   : > { %2209 = vst [vmem:[#allocation3 + $0x180] sm:$0xf] %v2197_v32  ;;  %2210 = vst [vmem:[#allocation3 + $0x188] sm:$0xf] %v2198_v33 }
 0x3ca   : > { %v6667_v34 = vpop.permute.xlu0 %1894  ;;  %vm7726_vm12 = vmmov %vm7725_vm6 }
 0x3cb   : > { %v1893_v35 = vpop.permute.xlu1 %1892 }
 0x3cc   : > { %v1902_v37 = vsel %vm7717_vm5, %v1891_v14, %v1893_v35  ;;  %v1903_v38 = vsel %vm7718_vm2, %v1893_v35, %v6667_v34  ;;  %v2305_v40 = vld [vmem:[#allocation3 + $0x158] sm:$0xff]  ;;  %v2304_v28 = vld [vmem:[#allocation3 + $0x150] sm:$0xff]  ;;  %vm7727_vm5 = vcmask 924672  }
 0x3cd   : > { %1914 = vst [vmem:[#allocation3 + $0x100] sm:$0xf] %v1902_v37  ;;  %1915 = vst [vmem:[#allocation3 + $0x108] sm:$0xf] %v1903_v38  ;;  %v5288_v44 = vpack.c.bf16 %v2305_v40, %v2299_v36  ;;  %v5290_v47 = vpack.c.bf16 %v2304_v28, %v2298_v41  ;;  %v2273_v28 = vld [vmem:[#allocation3 + $0x58] sm:$0xff] }
 0x3ce   : > { %v6672_v48 = vpop.permute.xlu0 %1993  ;;  %vm7728_vm2 = vmmov %vm7727_vm5 }
 0x3cf   : > { %v1992_v49 = vpop.permute.xlu1 %1991  ;;  %5289 = vmatprep.subr.bf16.mxu1 %v5288_v44  ;;  %5337 = vmatprep.subr.bf16.mxu0 %v5288_v44 }
 0x3d0   : > { %v2001_v43 = vsel %vm7719_vm11, %v6624_v42, %v1992_v49  ;;  %v2002_v54 = vsel %vm7720_vm7, %v1992_v49, %v6672_v48  ;;  %5291 = vmatpush1.bf16.msra.mxu1 %v5290_v47  ;;  %5339 = vmatpush1.bf16.msra.mxu0 %v5290_v47  ;;  %v6678_v57 = vld [vmem:[#allocation3 + $0x188] sm:$0xff]  ;;  %v6685_v1 = vld [vmem:[#allocation3 + $0x180] sm:$0xff]  ;;  %vm7729_vm11 = vcmask 785408  }
 0x3d1   : > { %2013 = vst [vmem:[#allocation3 + $0x130] sm:$0xf] %v2001_v43  ;;  %2014 = vst [vmem:[#allocation3 + $0x138] sm:$0xf] %v2002_v54  ;;  %2343 = vmatprep.subr.mxu1 %v6678_v57  ;;  %v2283_v42 = vld [vmem:[#allocation3 + $0xa8] sm:$0xff]  ;;  %v2285_v54 = vld [vmem:[#allocation3 + $0xb8] sm:$0xff] }
 0x3d2   : > { %v6683_v62 = vpop.permute.xlu0 %2092  ;;  %v6699_v14 = vpack.c.bf16 %v2283_v42, %v2277_v13  ;;  %vm7730_vm7 = vmmov %vm7729_vm11 }
 0x3d3   : > { %v2091_v63 = vpop.permute.xlu1 %2090 }
 0x3d4   : > { %v2100_v8 = vsel %vm7721_vm8, %v6627_v60, %v2091_v63  ;;  %v2101_v9 = vsel %vm7722_vm14, %v2091_v63, %v6683_v62  ;;  %2344 = vmatpush1.msra.mxu1 %v6685_v1  ;;  %v2295_v16 = vld [vmem:[#allocation3 + $0x108] sm:$0xff]  ;;  %v2294_v3 = vld [vmem:[#allocation3 + $0x100] sm:$0xff]  ;;  %v6737_v63 = vpack.c.bf16 %v2272_v51, %v2266_v46  ;;  %vm7731_vm8 = vcmask 646144  }
 0x3d5   : > { %2112 = vst [vmem:[#allocation3 + $0x160] sm:$0xf] %v2100_v8  ;;  %2113 = vst [vmem:[#allocation3 + $0x168] sm:$0xf] %v2101_v9  ;;  %5225 = vmatmul.mubr.msk.f32.vlgmr.msra.gmra.mrb[2].mxu1 %vm2324_vm13, %v6681_v59  ;;  %5293 = vmatprep.subr.bf16.mxu1 %v6687_v2  ;;  %v6708_v22 = vpack.c.bf16 %v2295_v16, %v2289_v21  ;;  %v6720_v30 = vpack.c.bf16 %v2294_v3, %v2288_v23  ;;  %v2284_v9 = vld [vmem:[#allocation3 + $0xb0] sm:$0xff] }
 0x3d6   : > { %5295 = vmatpush1.bf16.msra.mxu1 %v6694_v10  ;;  %v1945_v60 = vpop.permute.xlu0 %1944  ;;  %2462 = vmatprep.mubr.f32.mxu1 %v5879_v24  ;;  %vm7732_vm14 = vmmov %vm7731_vm8 }
 0x3d7   : > { %v2190_v17 = vpop.permute.xlu1 %2189  ;;  %5297 = vmatprep.subr.bf16.mxu1 %v6699_v14 }
 0x3d8   : > { %v2199_v19 = vsel %vm7723_vm15, %v6630_v56, %v2190_v17  ;;  %v2301_v31 = vld [vmem:[#allocation3 + $0x138] sm:$0xff]  ;;  %v2300_v38 = vld [vmem:[#allocation3 + $0x130] sm:$0xff]  ;;  %vm7733_vm15 = vcmask 932864  }
 0x3d9   : > { %2211 = vst [vmem:[#allocation3 + $0x190] sm:$0xf] %v2199_v19 }
 0x3da   : > { %5299 = vmatpush1.bf16.msra.mxu1 %v6706_v39  ;;  %v6711_v25 = vpop.permute.xlu0 %2191 }
 0x3db   : > { %v2200_v55 = vsel %vm7724_vm3, %v2190_v17, %v6711_v25  ;;  %v1844_v26 = vpop.permute.xlu1 %1843  ;;  %5301 = vmatprep.subr.bf16.mxu1 %v6708_v22  ;;  %vm7734_vm3 = vmmov %vm7733_vm15 }
 0x3dc   : > { %2212 = vst [vmem:[#allocation3 + $0x198] sm:$0xf] %v2200_v55  ;;  %v1851_v56 = vsel %vm7725_vm6, %v6633_v0, %v1844_v26  ;;  %v1852_v27 = vsel %vm7726_vm12, %v1844_v26, %v6662_v29  ;;  %v2307_v32 = vld [vmem:[#allocation3 + $0x168] sm:$0xff]  ;;  %v2306_v35 = vld [vmem:[#allocation3 + $0x160] sm:$0xff]  ;;  %vm7735_vm6 = vcmask 793600  }
 0x3dd   : > { %1863 = vst [vmem:[#allocation3 + $0xe0] sm:$0xf0] %v1851_v56  ;;  %1864 = vst [vmem:[#allocation3 + $0xe8] sm:$0xf0] %v1852_v27  ;;  %v6722_v33 = vpack.c.bf16 %v2307_v32, %v2301_v31  ;;  %v6729_v40 = vpack.c.bf16 %v2306_v35, %v2300_v38 }
 0x3de   : > { %5303 = vmatpush1.bf16.msra.mxu1 %v6720_v30  ;;  %v2044_v36 = vpop.permute.xlu0 %2043  ;;  %vm7736_vm12 = vmmov %vm7735_vm6 }
 0x3df   : > { %v1943_v37 = vpop.permute.xlu1 %1942  ;;  %5305 = vmatprep.subr.bf16.mxu1 %v6722_v33 }
 0x3e0   : > { %v1950_v0 = vsel %vm7727_vm5, %v6638_v7, %v1943_v37  ;;  %v1951_v29 = vsel %vm7728_vm2, %v1943_v37, %v1945_v60  ;;  %v2267_v7 = vld [vmem:[#allocation3 + $0x28] sm:$0xff]  ;;  %v2312_v58 = vld [vmem:[#allocation3 + $0x190] sm:$0xff]  ;;  %v2278_v60 = vld [vmem:[#allocation3 + $0x80] sm:$0xff]  ;;  %vm7737_vm5 = vcmask 777216  }
 0x3e1   : > { %1962 = vst [vmem:[#allocation3 + $0x110] sm:$0xf0] %v1950_v0  ;;  %1963 = vst [vmem:[#allocation3 + $0x118] sm:$0xf0] %v1951_v29  ;;  %v6735_v61 = vpack.c.bf16 %v2273_v28, %v2267_v7  ;;  %v6750_v17 = vpack.c.bf16 %v2284_v9, %v2278_v60 }
 0x3e2   : > { %5307 = vmatpush1.bf16.msra.mxu1 %v6729_v40  ;;  %v2143_v41 = vpop.permute.xlu0 %2142  ;;  %vm7738_vm2 = vmmov %vm7737_vm5 }
 0x3e3   : > { %v2042_v44 = vpop.permute.xlu1 %2041  ;;  %v2313_v47 = vld [vmem:[#allocation3 + $0x198] sm:$0xff] }
 0x3e4   : > { %v2049_v49 = vsel %vm7729_vm11, %v6643_v12, %v2042_v44  ;;  %v2050_v43 = vsel %vm7730_vm7, %v2042_v44, %v2044_v36  ;;  %2414 = vmatprep.subr.mxu1 %v2313_v47  ;;  %v6742_v12 = vpack.c.bf16 %v2285_v54, %v2279_v5  ;;  %v2291_v56 = vld [vmem:[#allocation3 + $0xe8] sm:$0xff]  ;;  %v2290_v32 = vld [vmem:[#allocation3 + $0xe0] sm:$0xff]  ;;  %vm7739_vm11 = vcmask 637952  }
 0x3e5   : > { %2061 = vst [vmem:[#allocation3 + $0x140] sm:$0xf0] %v2049_v49  ;;  %2062 = vst [vmem:[#allocation3 + $0x148] sm:$0xf0] %v2050_v43 }
 0x3e6   : > { %2415 = vmatpush1.msra.mxu1 %v2312_v58  ;;  %v1899_v42 = vpop.permute.xlu0 %1898  ;;  %vm7740_vm7 = vmmov %vm7739_vm11 }
 0x3e7   : > { %v2141_v8 = vpop.permute.xlu1 %2140  ;;  %5226 = vmatmul.mubr.msk.f32.vlgmr.msra.gmra.mrb[4].mxu1 %vm2324_vm13, %v6681_v59  ;;  %5309 = vmatprep.subr.bf16.mxu1 %v6735_v61 }
 0x3e8   : > { %v2148_v13 = vsel %vm7731_vm8, %v6648_v50, %v2141_v8  ;;  %v2149_v15 = vsel %vm7732_vm14, %v2141_v8, %v2143_v41  ;;  %5311 = vmatpush1.bf16.msra.mxu1 %v6737_v63  ;;  %2533 = vmatprep.mubr.f32.mxu1 %v5879_v24  ;;  %vm7741_vm8 = vcmask 629760  }
 0x3e9   : > { %2160 = vst [vmem:[#allocation3 + $0x170] sm:$0xf0] %v2148_v13  ;;  %2161 = vst [vmem:[#allocation3 + $0x178] sm:$0xf0] %v2149_v15  ;;  %5313 = vmatprep.subr.bf16.mxu1 %v6742_v12 }
 0x3ea   : > { %v1998_v16 = vpop.permute.xlu0 %1997  ;;  %vm7742_vm14 = vmmov %vm7741_vm8 }
 0x3eb   : > { %v1897_v18 = vpop.permute.xlu1 %1896 }
 0x3ec   : > { %v1904_v19 = vsel %vm7733_vm15, %v6667_v34, %v1897_v18  ;;  %v1905_v50 = vsel %vm7734_vm3, %v1897_v18, %v1899_v42  ;;  %5315 = vmatpush1.bf16.msra.mxu1 %v6750_v17  ;;  %vm7743_vm3 = vcmp.eq.s32.totalorder %v6422_v45, 1 }
 0x3ed   : > { %1916 = vst [vmem:[#allocation3 + $0x110] sm:$0xf] %v1904_v19  ;;  %1917 = vst [vmem:[#allocation3 + $0x118] sm:$0xf] %v1905_v50 }
 0x3ee   : > { %v2097_v21 = vpop.permute.xlu0 %2096 }
 0x3ef   : > { %v1996_v3 = vpop.permute.xlu1 %1995 }
 0x3f0   : > { %v2003_v55 = vsel %vm7735_vm6, %v6672_v48, %v1996_v3  ;;  %v2004_v26 = vsel %vm7736_vm12, %v1996_v3, %v1998_v16  ;;  %vm7744_vm6 = vcmp.eq.s32.totalorder %v6434_v53, 1 }
 0x3f1   : > { %2015 = vst [vmem:[#allocation3 + $0x140] sm:$0xf] %v2003_v55  ;;  %2016 = vst [vmem:[#allocation3 + $0x148] sm:$0xf] %v2004_v26 }
 0x3f2   : > { %v2196_v36 = vpop.permute.xlu0 %2195 }
 0x3f3   : > { %v2095_v23 = vpop.permute.xlu1 %2094 }
 0x3f4   : > { %v2102_v34 = vsel %vm7737_vm5, %v6683_v62, %v2095_v23  ;;  %v2103_v27 = vsel %vm7738_vm2, %v2095_v23, %v2097_v21  ;;  %v2297_v31 = vld [vmem:[#allocation3 + $0x118] sm:$0xff]  ;;  %v2296_v35 = vld [vmem:[#allocation3 + $0x110] sm:$0xff]  ;;  %vm7745_vm2 = vcmp.eq.s32.totalorder %v6484_v6, 1 }
 0x3f5   : > { %2114 = vst [vmem:[#allocation3 + $0x170] sm:$0xf] %v2102_v34  ;;  %2115 = vst [vmem:[#allocation3 + $0x178] sm:$0xf] %v2103_v27  ;;  %v6762_v37 = vpack.c.bf16 %v2297_v31, %v2291_v56  ;;  %v6764_v48 = vpack.c.bf16 %v2296_v35, %v2290_v32 }
 0x3f6   : > { %v2242_v29 = vpop.permute.xlu0 %2241 }
 0x3f7   : > { %v2194_v38 = vpop.permute.xlu1 %2193  ;;  %5317 = vmatprep.subr.bf16.mxu1 %v6762_v37 }
 0x3f8   : > { %v2201_v0 = vsel %vm7739_vm11, %v6711_v25, %v2194_v38  ;;  %v2202_v62 = vsel %vm7740_vm7, %v2194_v38, %v2196_v36  ;;  %5319 = vmatpush1.bf16.msra.mxu1 %v6764_v48  ;;  %v2303_v28 = vld [vmem:[#allocation3 + $0x148] sm:$0xff]  ;;  %v2302_v49 = vld [vmem:[#allocation3 + $0x140] sm:$0xff] }
 0x3f9   : > { %2213 = vst [vmem:[#allocation3 + $0x1a0] sm:$0xf] %v2201_v0  ;;  %2214 = vst [vmem:[#allocation3 + $0x1a8] sm:$0xf] %v2202_v62 }
 0x3fb   : > { %v2240_v41 = vpop.permute.xlu1 %2239 }
 0x3fc   : > { %v2247_v44 = vsel %vm7741_vm8, %v6655_v52, %v2240_v41  ;;  %v2248_v47 = vsel %vm7742_vm14, %v2240_v41, %v2242_v29  ;;  %v2309_v51 = vld [vmem:[#allocation3 + $0x178] sm:$0xff]  ;;  %v2308_v43 = vld [vmem:[#allocation3 + $0x170] sm:$0xff]  ;;  %vm7746_vm8 = vcmask 1043712   ;;  %vm7747_vm14 = vcmask 261120  }
 0x3fd   : > { %2259 = vst [vmem:[#allocation3 + $0x1a0] sm:$0xf0] %v2247_v44  ;;  %2260 = vst [vmem:[#allocation3 + $0x1a8] sm:$0xf0] %v2248_v47  ;;  %v6774_v25 = vpack.c.bf16 %v2309_v51, %v2303_v28  ;;  %v6776_v7 = vpack.c.bf16 %v2308_v43, %v2302_v49 }
 0x3ff   : > { %5321 = vmatprep.subr.bf16.mxu1 %v6774_v25 }
 0x400   : > { %5323 = vmatpush1.bf16.msra.mxu1 %v6776_v7 }
 0x404   : > { %v6780_v54 = vld [vmem:[#allocation3 + $0x1a8] sm:$0xff]  ;;  %v6782_v58 = vld [vmem:[#allocation3 + $0x1a0] sm:$0xff] }
 0x405   : > { %2485 = vmatprep.subr.mxu1 %v6780_v54 }
 0x406   : > { %2486 = vmatpush1.msra.mxu1 %v6782_v58 }
 0x407   : > { %5227 = vmatmul.mubr.msk.f32.vlgmr.msra.gmra.mrb[6].mxu1 %vm2324_vm13, %v6681_v59  ;;  %5355 = vmatprep.subr.bf16.mxu1 %v6687_v2 }
 0x408   : > { %5357 = vmatpush1.bf16.msra.mxu1 %v6694_v10  ;;  %3291 = vmatprep.mubr.f32.mxu1 %v5879_v24 }
 0x409   : > { %5359 = vmatprep.subr.bf16.mxu1 %v6699_v14 }
 0x40c   : > { %5361 = vmatpush1.bf16.msra.mxu1 %v6706_v39  ;;  %v2320_v52 = vpop.permute.xlu1 %2319 }
 0x40d   : > { %5363 = vmatprep.subr.bf16.mxu1 %v6708_v22 }
 0x410   : > { %5365 = vmatpush1.bf16.msra.mxu1 %v6720_v30 }
 0x411   : > { %5367 = vmatprep.subr.bf16.mxu1 %v6722_v33 }
 0x414   : > { %5369 = vmatpush1.bf16.msra.mxu1 %v6729_v40 }
 0x4a8   : > { %v2393_v59 = vpop.f32.mrb[2].mxu1 }
 0x4a9   : > { %v2394_v46 = vadd.f32 %v2393_v59, %v2320_v52  ;;  %v2395_v2 = vpop.f32.mrb[3].mxu1 }
 0x4aa   : > { %v2396_v42 = vadd.f32 %v2395_v2, %v2320_v52 }
 0x4ab   : > { %vm2540_vm13 = vcmp.ge.f32.partialorder %v2394_v46, 0.0  ;;  %v2546_v10 = vmul.f32 0.2, %v2394_v46 }
 0x4ac   : > { %vm2541_vm15 = vcmp.ge.f32.partialorder %v2396_v42, 0.0  ;;  %v2547_v5 = vmul.f32 0.2, %v2396_v42 }
 0x4ad   : > { %v2552_v14 = vsel %vm2540_vm13, %v2394_v46, %v2546_v10  ;;  %vm7748_vm13 = vmmov %vm7747_vm14 }
 0x4ae   : > { %v2558_v39 = vsel %vm7743_vm3, %v2552_v14, 0.0  ;;  %v2553_v22 = vsel %vm2541_vm15, %v2396_v42, %v2547_v5  ;;  %vm7749_vm15 = vmmov %vm7748_vm13 }
 0x4af   : > { %2570 = vrot.lane.b32.xlu0 %v2558_v39, %s5869_s20  ;;  %v2559_v30 = vsel %vm7744_vm6, %v2553_v22, 0.0  ;;  %vm7750_vm3 = vmmov %vm7748_vm13 }
 0x4b0   : > { %2572 = vrot.lane.b32.xlu1 %v2559_v30, %s5869_s20  ;;  %vm7751_vm6 = vmmov %vm7750_vm3 }
 0x4ba   : > { %v2464_v33 = vpop.f32.mrb[4].mxu1 }
 0x4bb   : > { %v2465_v40 = vadd.f32 %v2464_v33, %v2320_v52  ;;  %v2466_v8 = vpop.f32.mrb[5].mxu1 }
 0x4bc   : > { %v2467_v9 = vadd.f32 %v2466_v8, %v2320_v52 }
 0x4bd   : > { %vm2542_vm12 = vcmp.ge.f32.partialorder %v2465_v40, 0.0  ;;  %v2548_v13 = vmul.f32 0.2, %v2465_v40 }
 0x4be   : > { %vm2543_vm5 = vcmp.ge.f32.partialorder %v2467_v9, 0.0  ;;  %v2549_v15 = vmul.f32 0.2, %v2467_v9 }
 0x4bf   : > { %v2554_v60 = vsel %vm2542_vm12, %v2465_v40, %v2548_v13  ;;  %vm7752_vm12 = vcmask 257024  }
 0x4c0   : > { %v2560_v16 = vsel %vm6503_vm0, %v2554_v60, 0.0  ;;  %v2555_v18 = vsel %vm2543_vm5, %v2467_v9, %v2549_v15  ;;  %vm7753_vm5 = vcmask 941056  }
 0x4c1   : > { %2574 = vrot.lane.b32.xlu0 %v2560_v16, %s5869_s20  ;;  %v2561_v19 = vsel %vm7745_vm2, %v2555_v18, 0.0  ;;  %vm7754_vm2 = vmmov %vm7753_vm5 }
 0x4c2   : > { %2576 = vrot.lane.b32.xlu1 %v2561_v19, %s5869_s20 }
 0x4da   : > { %v2535_v50 = vpop.f32.mrb[6].mxu1 }
 0x4db   : > { %v2536_v21 = vadd.f32 %v2535_v50, %v2320_v52  ;;  %v2537_v3 = vpop.f32.mrb[7].mxu1 }
 0x4dc   : > { %v2538_v55 = vadd.f32 %v2537_v3, %v2320_v52 }
 0x4dd   : > { %vm2544_vm11 = vcmp.ge.f32.partialorder %v2536_v21, 0.0  ;;  %v2550_v26 = vmul.f32 0.2, %v2536_v21 }
 0x4de   : > { %vm2545_vm7 = vcmp.ge.f32.partialorder %v2538_v55, 0.0  ;;  %v2551_v23 = vmul.f32 0.2, %v2538_v55 }
 0x4df   : > { %v2556_v56 = vsel %vm2544_vm11, %v2536_v21, %v2550_v26  ;;  %vm7755_vm11 = vcmask 924672  }
 0x4e0   : > { %v2562_v34 = vsel %vm1766_vm4, %v2556_v56, 0.0  ;;  %v2557_v27 = vsel %vm2545_vm7, %v2538_v55, %v2551_v23  ;;  %vm7756_vm7 = vmmov %vm7755_vm11 }
 0x4e1   : > { %2578 = vrot.lane.b32.xlu0 %v2562_v34, %s5869_s20  ;;  %v2563_v31 = vsel %vm6530_vm10, %v2557_v27, 0.0 }
 0x4e2   : > { %2580 = vrot.lane.b32.xlu1 %v2563_v31, %s5869_s20 }
 0x521   : > { %v2571_v32 = vpop.permute.xlu0 %2570 }
 0x522   : > { %2594 = vst.msk [vmem:[#allocation2 + $0x38] sm:$0xf] %vm7746_vm8, %v2571_v32  ;;  %v2573_v35 = vpop.permute.xlu1 %2572  ;;  %vm7757_vm8 = vcmask 785408  }
 0x523   : > { %v2582_v36 = vsel %vm7747_vm14, %v2571_v32, %v2573_v35  ;;  %vm7758_vm14 = vmmov %vm7757_vm8 }
 0x524   : > { %2595 = vst [vmem:[#allocation2 + $0x40] sm:$0xf] %v2582_v36 }
 0x529   : > { %v2601_v38 = vld [vmem:[#allocation2 + $0x38] sm:$0xf] }
 0x52a   : > { %v2647_v0 = vld [vmem:[#allocation2 + $0x38] sm:$0xf]  ;;  %2615 = vrot.lane.b32.xlu0 %v2601_v38, %s5870_s18 }
 0x52b   : > { %v2661_v62 = vrot.slane %v2647_v0, 4  ;;  %v2746_v29 = vld [vmem:[#allocation2 + $0x38] sm:$0xf]  ;;  %v2602_v14 = vld [vmem:[#allocation2 + $0x40] sm:$0xf] }
 0x52c   : > { %v2700_v41 = vld [vmem:[#allocation2 + $0x38] sm:$0xf]  ;;  %v2760_v28 = vrot.slane %v2746_v29, 4  ;;  %v2701_v22 = vld [vmem:[#allocation2 + $0x40] sm:$0xf] }
 0x52d   : > { %2668 = vrot.lane.b32.xlu1 %v2661_v62, %s5871_s23  ;;  %v2845_v44 = vld [vmem:[#allocation2 + $0x38] sm:$0xf]  ;;  %v2800_v33 = vld [vmem:[#allocation2 + $0x40] sm:$0xf] }
 0x52e   : > { %2714 = vrot.lane.b32.xlu0 %v2700_v41, %s5872_s25  ;;  %v2799_v47 = vld [vmem:[#allocation2 + $0x38] sm:$0xf]  ;;  %v2859_v51 = vrot.slane %v2845_v44, 4  ;;  %v2899_v8 = vld [vmem:[#allocation2 + $0x40] sm:$0xf] }
 0x52f   : > { %v2944_v43 = vld [vmem:[#allocation2 + $0x38] sm:$0xf]  ;;  %v2998_v13 = vld [vmem:[#allocation2 + $0x40] sm:$0xf] }
 0x530   : > { %v2898_v2 = vld [vmem:[#allocation2 + $0x38] sm:$0xf]  ;;  %v2958_v42 = vrot.slane %v2944_v43, 4  ;;  %v2648_v15 = vld [vmem:[#allocation2 + $0x40] sm:$0xf] }
 0x531   : > { %2767 = vrot.lane.b32.xlu1 %v2760_v28, %s5873_s4  ;;  %v2997_v10 = vld [vmem:[#allocation2 + $0x38] sm:$0xf]  ;;  %v2662_v16 = vrot.slane %v2648_v15, 4  ;;  %v2747_v18 = vld [vmem:[#allocation2 + $0x40] sm:$0xf] }
 0x532   : > { %2813 = vrot.lane.b32.xlu0 %v2799_v47, %s5874_s5  ;;  %v2761_v55 = vrot.slane %v2747_v18, 4  ;;  %v2846_v23 = vld [vmem:[#allocation2 + $0x40] sm:$0xf] }
 0x533   : > { %v2575_v49 = vpop.permute.xlu0 %2574  ;;  %v2860_v34 = vrot.slane %v2846_v23, 4  ;;  %v2945_v27 = vld [vmem:[#allocation2 + $0x40] sm:$0xf] }
 0x534   : > { %v2583_v52 = vsel %vm7748_vm13, %v2573_v35, %v2575_v49  ;;  %v2577_v59 = vpop.permute.xlu1 %2576  ;;  %v2959_v32 = vrot.slane %v2945_v27, 4  ;;  %vm7759_vm13 = vcmask 646144  }
 0x535   : > { %2866 = vrot.lane.b32.xlu1 %v2859_v51, %s5875_s8  ;;  %2596 = vst [vmem:[#allocation2 + $0x48] sm:$0xf] %v2583_v52  ;;  %v2584_v46 = vsel %vm7749_vm15, %v2575_v49, %v2577_v59  ;;  %vm7760_vm15 = vmmov %vm7759_vm13 }
 0x536   : > { %2597 = vst [vmem:[#allocation2 + $0x50] sm:$0xf] %v2584_v46  ;;  %2912 = vrot.lane.b32.xlu0 %v2898_v2, %s5876_s9 }
 0x539   : > { %2965 = vrot.lane.b32.xlu1 %v2958_v42, %s5877_s10 }
 0x53a   : > { %3011 = vrot.lane.b32.xlu0 %v2997_v10, %s5878_s11 }
 0x53c   : > { %v2603_v5 = vld [vmem:[#allocation2 + $0x48] sm:$0xf] }
 0x53d   : > { %2619 = vrot.lane.b32.xlu1 %v2603_v5, %s5870_s18  ;;  %v2702_v39 = vld [vmem:[#allocation2 + $0x48] sm:$0xf]  ;;  %v2604_v60 = vld [vmem:[#allocation2 + $0x50] sm:$0xf] }
 0x53e   : > { %2617 = vrot.lane.b32.xlu0 %v2602_v14, %s5870_s18  ;;  %v2801_v30 = vld [vmem:[#allocation2 + $0x48] sm:$0xf]  ;;  %v2703_v3 = vld [vmem:[#allocation2 + $0x50] sm:$0xf] }
 0x53f   : > { %v2900_v40 = vld [vmem:[#allocation2 + $0x48] sm:$0xf]  ;;  %v2802_v56 = vld [vmem:[#allocation2 + $0x50] sm:$0xf] }
 0x540   : > { %v2999_v9 = vld [vmem:[#allocation2 + $0x48] sm:$0xf]  ;;  %v2901_v31 = vld [vmem:[#allocation2 + $0x50] sm:$0xf] }
 0x541   : > { %2718 = vrot.lane.b32.xlu1 %v2702_v39, %s5872_s25  ;;  %v3000_v35 = vld [vmem:[#allocation2 + $0x50] sm:$0xf]  ;;  %v2649_v36 = vld [vmem:[#allocation2 + $0x48] sm:$0xf] }
 0x542   : > { %2716 = vrot.lane.b32.xlu0 %v2701_v22, %s5872_s25  ;;  %v2663_v0 = vrot.slane %v2649_v36, 4  ;;  %v2748_v62 = vld [vmem:[#allocation2 + $0x48] sm:$0xf]  ;;  %v2650_v52 = vld [vmem:[#allocation2 + $0x50] sm:$0xf] }
 0x543   : > { %v2762_v41 = vrot.slane %v2748_v62, 4  ;;  %v2847_v28 = vld [vmem:[#allocation2 + $0x48] sm:$0xf]  ;;  %v2664_v46 = vrot.slane %v2650_v52, 4  ;;  %v2749_v2 = vld [vmem:[#allocation2 + $0x50] sm:$0xf] }
 0x544   : > { %v2861_v47 = vrot.slane %v2847_v28, 4  ;;  %v2946_v51 = vld [vmem:[#allocation2 + $0x48] sm:$0xf]  ;;  %v2763_v10 = vrot.slane %v2749_v2, 4  ;;  %v2848_v5 = vld [vmem:[#allocation2 + $0x50] sm:$0xf] }
 0x545   : > { %2817 = vrot.lane.b32.xlu1 %v2801_v30, %s5874_s5  ;;  %v2960_v43 = vrot.slane %v2946_v51, 4  ;;  %v2862_v39 = vrot.slane %v2848_v5, 4  ;;  %v2947_v22 = vld [vmem:[#allocation2 + $0x50] sm:$0xf] }
 0x546   : > { %2815 = vrot.lane.b32.xlu0 %v2800_v33, %s5874_s5  ;;  %v2961_v33 = vrot.slane %v2947_v22, 4 }
 0x549   : > { %2916 = vrot.lane.b32.xlu1 %v2900_v40, %s5876_s9 }
 0x54a   : > { %2914 = vrot.lane.b32.xlu0 %v2899_v8, %s5876_s9 }
 0x54d   : > { %3015 = vrot.lane.b32.xlu1 %v2999_v9, %s5878_s11 }
 0x54e   : > { %3013 = vrot.lane.b32.xlu0 %v2998_v13, %s5878_s11 }
 0x551   : > { %2621 = vrot.lane.b32.xlu1 %v2604_v60, %s5870_s18 }
 0x552   : > { %2670 = vrot.lane.b32.xlu0 %v2662_v16, %s5871_s23 }
 0x553   : > { %v2579_v19 = vpop.permute.xlu0 %2578 }
 0x554   : > { %v2585_v50 = vsel %vm7750_vm3, %v2577_v59, %v2579_v19  ;;  %v2581_v21 = vpop.permute.xlu1 %2580  ;;  %vm7761_vm3 = vcmask 629760  }
 0x555   : > { %2598 = vst [vmem:[#allocation2 + $0x58] sm:$0xf] %v2585_v50  ;;  %v2586_v26 = vsel %vm7751_vm6, %v2579_v19, %v2581_v21  ;;  %2600 = vst.msk [vmem:[#allocation2 + $0x68] sm:$0xf] %vm7752_vm12, %v2581_v21  ;;  %2720 = vrot.lane.b32.xlu1 %v2703_v3, %s5872_s25 }
 0x556   : > { %2599 = vst [vmem:[#allocation2 + $0x60] sm:$0xf] %v2586_v26  ;;  %2769 = vrot.lane.b32.xlu0 %v2761_v55, %s5873_s4  ;;  %vm7762_vm6 = vmmov %vm7761_vm3 }
 0x557   : > { %vm7763_vm12 = vmmov %vm7754_vm2 }
 0x559   : > { %2819 = vrot.lane.b32.xlu1 %v2802_v56, %s5874_s5 }
 0x55a   : > { %2868 = vrot.lane.b32.xlu0 %v2860_v34, %s5875_s8 }
 0x55c   : > { %v2605_v38 = vld [vmem:[#allocation2 + $0x58] sm:$0xf]  ;;  %v2607_v29 = vld [vmem:[#allocation2 + $0x68] sm:$0xf] }
 0x55d   : > { %2918 = vrot.lane.b32.xlu1 %v2901_v31, %s5876_s9  ;;  %v2704_v44 = vld [vmem:[#allocation2 + $0x58] sm:$0xf]  ;;  %v2706_v59 = vld [vmem:[#allocation2 + $0x68] sm:$0xf]  ;;  %v2606_v9 = vld [vmem:[#allocation2 + $0x60] sm:$0xf] }
 0x55e   : > { %2967 = vrot.lane.b32.xlu0 %v2959_v32, %s5877_s10  ;;  %v2803_v49 = vld [vmem:[#allocation2 + $0x58] sm:$0xf]  ;;  %v2805_v42 = vld [vmem:[#allocation2 + $0x68] sm:$0xf]  ;;  %v2705_v60 = vld [vmem:[#allocation2 + $0x60] sm:$0xf] }
 0x55f   : > { %v2902_v14 = vld [vmem:[#allocation2 + $0x58] sm:$0xf]  ;;  %v2904_v40 = vld [vmem:[#allocation2 + $0x68] sm:$0xf]  ;;  %v2804_v19 = vld [vmem:[#allocation2 + $0x60] sm:$0xf] }
 0x560   : > { %v3001_v30 = vld [vmem:[#allocation2 + $0x58] sm:$0xf]  ;;  %v2653_v15 = vld [vmem:[#allocation2 + $0x68] sm:$0xf]  ;;  %v2903_v3 = vld [vmem:[#allocation2 + $0x60] sm:$0xf] }
 0x561   : > { %3017 = vrot.lane.b32.xlu1 %v3000_v35, %s5878_s11  ;;  %v2651_v8 = vld [vmem:[#allocation2 + $0x58] sm:$0xf]  ;;  %v2667_v16 = vrot.slane %v2653_v15, 4  ;;  %v2652_v26 = vld [vmem:[#allocation2 + $0x60] sm:$0xf] }
 0x562   : > { %2623 = vrot.lane.b32.xlu0 %v2605_v38, %s5870_s18  ;;  %v2665_v13 = vrot.slane %v2651_v8, 4  ;;  %v2750_v18 = vld [vmem:[#allocation2 + $0x58] sm:$0xf]  ;;  %v2752_v23 = vld [vmem:[#allocation2 + $0x68] sm:$0xf]  ;;  %v2666_v56 = vrot.slane %v2652_v26, 4 }
 0x563   : > { %v2764_v50 = vrot.slane %v2750_v18, 4  ;;  %v2849_v21 = vld [vmem:[#allocation2 + $0x58] sm:$0xf]  ;;  %v2766_v34 = vrot.slane %v2752_v23, 4  ;;  %v2751_v27 = vld [vmem:[#allocation2 + $0x60] sm:$0xf] }
 0x564   : > { %v2863_v55 = vrot.slane %v2849_v21, 4  ;;  %v2851_v31 = vld [vmem:[#allocation2 + $0x68] sm:$0xf]  ;;  %v2765_v32 = vrot.slane %v2751_v27, 4  ;;  %v2850_v36 = vld [vmem:[#allocation2 + $0x60] sm:$0xf] }
 0x565   : > { %2672 = vrot.lane.b32.xlu1 %v2663_v0, %s5871_s23  ;;  %v2865_v35 = vrot.slane %v2851_v31, 4  ;;  %v2948_v38 = vld [vmem:[#allocation2 + $0x58] sm:$0xf]  ;;  %v2864_v0 = vrot.slane %v2850_v36, 4  ;;  %v2950_v28 = vld [vmem:[#allocation2 + $0x68] sm:$0xf] }
 0x566   : > { %2627 = vrot.lane.b32.xlu0 %v2607_v29, %s5870_s18  ;;  %v2962_v29 = vrot.slane %v2948_v38, 4 }
 0x569   : > { %2771 = vrot.lane.b32.xlu1 %v2762_v41, %s5873_s4  ;;  %v2949_v41 = vld [vmem:[#allocation2 + $0x60] sm:$0xf] }
 0x56a   : > { %2722 = vrot.lane.b32.xlu0 %v2704_v44, %s5872_s25 }
 0x56d   : > { %2870 = vrot.lane.b32.xlu1 %v2861_v47, %s5875_s8  ;;  %v2963_v47 = vrot.slane %v2949_v41, 4 }
 0x56e   : > { %2821 = vrot.lane.b32.xlu0 %v2803_v49, %s5874_s5  ;;  %v2964_v49 = vrot.slane %v2950_v28, 4 }
 0x571   : > { %2969 = vrot.lane.b32.xlu1 %v2960_v43, %s5877_s10 }
 0x572   : > { %2726 = vrot.lane.b32.xlu0 %v2706_v59, %s5872_s25  ;;  %v3002_v59 = vld [vmem:[#allocation2 + $0x60] sm:$0xf] }
 0x575   : > { %2674 = vrot.lane.b32.xlu1 %v2664_v46, %s5871_s23  ;;  %v3003_v46 = vld [vmem:[#allocation2 + $0x68] sm:$0xf] }
 0x576   : > { %2825 = vrot.lane.b32.xlu0 %v2805_v42, %s5874_s5  ;;  %v3128_v42 = vld [vmem:[%s7592_s2 + $0x8] sm:$0xf] }
 0x579   : > { %2773 = vrot.lane.b32.xlu1 %v2763_v10, %s5873_s4 }
 0x57a   : > { %2920 = vrot.lane.b32.xlu0 %v2902_v14, %s5876_s9 }
 0x57d   : > { %2872 = vrot.lane.b32.xlu1 %v2862_v39, %s5875_s8 }
 0x57e   : > { %3019 = vrot.lane.b32.xlu0 %v3001_v30, %s5878_s11 }
 0x581   : > { %2971 = vrot.lane.b32.xlu1 %v2961_v33, %s5877_s10 }
 0x582   : > { %2924 = vrot.lane.b32.xlu0 %v2904_v40, %s5876_s9 }
 0x585   : > { %2625 = vrot.lane.b32.xlu1 %v2606_v9, %s5870_s18 }
 0x586   : > { %2676 = vrot.lane.b32.xlu0 %v2665_v13, %s5871_s23 }
 0x589   : > { %2724 = vrot.lane.b32.xlu1 %v2705_v60, %s5872_s25 }
 0x58a   : > { %2680 = vrot.lane.b32.xlu0 %v2667_v16, %s5871_s23 }
 0x58d   : > { %2823 = vrot.lane.b32.xlu1 %v2804_v19, %s5874_s5 }
 0x58e   : > { %2775 = vrot.lane.b32.xlu0 %v2764_v50, %s5873_s4 }
 0x591   : > { %2922 = vrot.lane.b32.xlu1 %v2903_v3, %s5876_s9 }
 0x592   : > { %2874 = vrot.lane.b32.xlu0 %v2863_v55, %s5875_s8 }
 0x595   : > { %2678 = vrot.lane.b32.xlu1 %v2666_v56, %s5871_s23 }
 0x596   : > { %2779 = vrot.lane.b32.xlu0 %v2766_v34, %s5873_s4 }
 0x599   : > { %2777 = vrot.lane.b32.xlu1 %v2765_v32, %s5873_s4 }
 0x59a   : > { %2878 = vrot.lane.b32.xlu0 %v2865_v35, %s5875_s8 }
 0x59c   : > { %v2616_v62 = vpop.permute.xlu0 %2615 }
 0x59d   : > { %2876 = vrot.lane.b32.xlu1 %v2864_v0, %s5875_s8 }
 0x59e   : > { %2973 = vrot.lane.b32.xlu0 %v2962_v29, %s5877_s10 }
 0x59f   : > { %v2669_v44 = vpop.permute.xlu1 %2668 }
 0x5a0   : > { %v2715_v51 = vpop.permute.xlu0 %2714 }
 0x5a1   : > { %2975 = vrot.lane.b32.xlu1 %v2963_v47, %s5877_s10 }
 0x5a2   : > { %2977 = vrot.lane.b32.xlu0 %v2964_v49, %s5877_s10 }
 0x5a3   : > { %v2768_v43 = vpop.permute.xlu1 %2767 }
 0x5a4   : > { %v2814_v52 = vpop.permute.xlu0 %2813 }
 0x5a5   : > { %3021 = vrot.lane.b32.xlu1 %v3002_v59, %s5878_s11 }
 0x5a6   : > { %3023 = vrot.lane.b32.xlu0 %v3003_v46, %s5878_s11 }
 0x5a7   : > { %v2867_v2 = vpop.permute.xlu1 %2866 }
 0x5a8   : > { %v2913_v10 = vpop.permute.xlu0 %2912 }
 0x5a9   : > { %3131 = vperm.xlu1 %5730, %v3128_v42  }
 0x5ab   : > { %v2966_v5 = vpop.permute.xlu1 %2965 }
 0x5ac   : > { %v3012_v14 = vpop.permute.xlu0 %3011 }
 0x5af   : > { %v2620_v39 = vpop.permute.xlu1 %2619 }
 0x5b0   : > { %v2618_v22 = vpop.permute.xlu0 %2617 }
 0x5b1   : > { %v2629_v30 = vsel %vm7753_vm5, %v2616_v62, %v2618_v22  ;;  %v2630_v33 = vsel %vm7754_vm2, %v2618_v22, %v2620_v39  ;;  %vm7764_vm5 = vcmask 932864   ;;  %vm7765_vm2 = vmmov %vm7756_vm7 }
 0x5b2   : > { %2641 = vst [vmem:[#allocation3 + $0x1b0] sm:$0xf] %v2629_v30  ;;  %2642 = vst [vmem:[#allocation3 + $0x1b8] sm:$0xf] %v2630_v33 }
 0x5b3   : > { %v2719_v40 = vpop.permute.xlu1 %2718 }
 0x5b4   : > { %v2717_v8 = vpop.permute.xlu0 %2716 }
 0x5b5   : > { %v2728_v9 = vsel %vm7755_vm11, %v2715_v51, %v2717_v8  ;;  %v2729_v13 = vsel %vm7756_vm7, %v2717_v8, %v2719_v40  ;;  %vm7766_vm11 = vcmask 793600   ;;  %vm7767_vm7 = vmmov %vm7757_vm8 }
 0x5b6   : > { %2740 = vst [vmem:[#allocation3 + $0x1e0] sm:$0xf] %v2728_v9  ;;  %2741 = vst [vmem:[#allocation3 + $0x1e8] sm:$0xf] %v2729_v13 }
 0x5b7   : > { %v2818_v15 = vpop.permute.xlu1 %2817 }
 0x5b8   : > { %v2816_v60 = vpop.permute.xlu0 %2815 }
 0x5b9   : > { %v2827_v16 = vsel %vm7757_vm8, %v2814_v52, %v2816_v60  ;;  %v2828_v18 = vsel %vm7758_vm14, %v2816_v60, %v2818_v15  ;;  %vm7768_vm8 = vcmask 777216   ;;  %vm7769_vm14 = vmmov %vm7759_vm13 }
 0x5ba   : > { %2839 = vst [vmem:[#allocation3 + $0x210] sm:$0xf] %v2827_v16  ;;  %2840 = vst [vmem:[#allocation3 + $0x218] sm:$0xf] %v2828_v18 }
 0x5bb   : > { %v2917_v19 = vpop.permute.xlu1 %2916 }
 0x5bc   : > { %v2915_v50 = vpop.permute.xlu0 %2914 }
 0x5bd   : > { %v2926_v21 = vsel %vm7759_vm13, %v2913_v10, %v2915_v50  ;;  %v2927_v3 = vsel %vm7760_vm15, %v2915_v50, %v2917_v19  ;;  %vm7770_vm13 = vcmask 637952   ;;  %vm7771_vm15 = vmmov %vm7761_vm3 }
 0x5be   : > { %2938 = vst [vmem:[#allocation3 + $0x240] sm:$0xf] %v2926_v21  ;;  %2939 = vst [vmem:[#allocation3 + $0x248] sm:$0xf] %v2927_v3 }
 0x5bf   : > { %v3016_v55 = vpop.permute.xlu1 %3015 }
 0x5c0   : > { %v3014_v26 = vpop.permute.xlu0 %3013 }
 0x5c1   : > { %v3025_v23 = vsel %vm7761_vm3, %v3012_v14, %v3014_v26  ;;  %v3026_v56 = vsel %vm7762_vm6, %v3014_v26, %v3016_v55  ;;  %vm7772_vm3 = vmmov %vm7763_vm12 }
 0x5c2   : > { %3037 = vst [vmem:[#allocation3 + $0x270] sm:$0xf] %v3025_v23  ;;  %3038 = vst [vmem:[#allocation3 + $0x278] sm:$0xf] %v3026_v56 }
 0x5c3   : > { %v2622_v34 = vpop.permute.xlu1 %2621  ;;  %vm7773_vm6 = vmmov %vm7764_vm5 }
 0x5c4   : > { %v2631_v27 = vsel %vm7763_vm12, %v2620_v39, %v2622_v34  ;;  %v2671_v31 = vpop.permute.xlu0 %2670  ;;  %vm7774_vm12 = vmmov %vm7766_vm11 }
 0x5c5   : > { %2643 = vst [vmem:[#allocation3 + $0x1c0] sm:$0xf] %v2631_v27  ;;  %v2682_v32 = vsel %vm7764_vm5, %v2669_v44, %v2671_v31  ;;  %vm7775_vm5 = vmmov %vm7765_vm2 }
 0x5c6   : > { %2694 = vst [vmem:[#allocation3 + $0x1b0] sm:$0xf0] %v2682_v32 }
 0x5c7   : > { %v2721_v35 = vpop.permute.xlu1 %2720 }
 0x5c8   : > { %v2730_v36 = vsel %vm7765_vm2, %v2719_v40, %v2721_v35  ;;  %v2770_v38 = vpop.permute.xlu0 %2769  ;;  %vm7776_vm2 = vmmov %vm7768_vm8 }
 0x5c9   : > { %2742 = vst [vmem:[#allocation3 + $0x1f0] sm:$0xf] %v2730_v36  ;;  %v2781_v0 = vsel %vm7766_vm11, %v2768_v43, %v2770_v38  ;;  %vm7777_vm11 = vmmov %vm7767_vm7  ;;  %v3123_v36 = vld [vmem:[#allocation3 + $0x278] sm:$0xf] }
 0x5ca   : > { %2793 = vst [vmem:[#allocation3 + $0x1e0] sm:$0xf0] %v2781_v0 }
 0x5cb   : > { %v2820_v62 = vpop.permute.xlu1 %2819 }
 0x5cc   : > { %v2829_v29 = vsel %vm7767_vm7, %v2818_v15, %v2820_v62  ;;  %v2869_v41 = vpop.permute.xlu0 %2868  ;;  %vm7778_vm7 = vmmov %vm7770_vm13 }
 0x5cd   : > { %2841 = vst [vmem:[#allocation3 + $0x220] sm:$0xf] %v2829_v29  ;;  %v2880_v28 = vsel %vm7768_vm8, %v2867_v2, %v2869_v41  ;;  %v6922_v33 = vld [vmem:[#allocation3 + $0x1b0] sm:$0xff]  ;;  %vm7779_vm8 = vmmov %vm7773_vm6 }
 0x5ce   : > { %2892 = vst [vmem:[#allocation3 + $0x210] sm:$0xf0] %v2880_v28  ;;  %v5342_v60 = vpack.c.bf16 %v6922_v33, %v6685_v1  ;;  %v3122_v29 = vld [vmem:[#allocation3 + $0x270] sm:$0xf] }
 0x5cf   : > { %v2919_v47 = vpop.permute.xlu1 %2918 }
 0x5d0   : > { %v2928_v44 = vsel %vm7769_vm14, %v2917_v19, %v2919_v47  ;;  %v2968_v51 = vpop.permute.xlu0 %2967  ;;  %vm7780_vm14 = vmmov %vm7774_vm12 }
 0x5d1   : > { %2940 = vst [vmem:[#allocation3 + $0x250] sm:$0xf] %v2928_v44  ;;  %v2979_v49 = vsel %vm7770_vm13, %v2966_v5, %v2968_v51  ;;  %v3104_v56 = vld [vmem:[#allocation3 + $0x1e0] sm:$0xff]  ;;  %vm5881_vm13 = vmmov 1  }
 0x5d2   : > { %2991 = vst [vmem:[#allocation3 + $0x240] sm:$0xf0] %v2979_v49  ;;  %v6962_v49 = vld [vmem:[#allocation7 + $0x10] sm:$0xf] }
 0x5d3   : > { %v6906_v52 = vpop.permute.xlu1 %3017 }
 0x5d4   : > { %v3027_v43 = vsel %vm7771_vm15, %v3016_v55, %v6906_v52  ;;  %v6910_v59 = vpop.permute.xlu0 %2623  ;;  %vm7781_vm15 = vcmask 1043456  }
 0x5d5   : > { %3039 = vst [vmem:[#allocation3 + $0x280] sm:$0xf] %v3027_v43  ;;  %v2632_v46 = vsel %vm7772_vm3, %v2622_v34, %v6910_v59  ;;  %v3110_v21 = vld [vmem:[#allocation3 + $0x210] sm:$0xff]  ;;  %vm6949_vm3 = vmpackc.low %vm7781_vm15, %vm5881_vm13  ;;  %vm7791_vm13 = vcmask 924672  }
 0x5d6   : > { %2644 = vst [vmem:[#allocation3 + $0x1c8] sm:$0xf] %v2632_v46  ;;  %v6941_v1 = vpack.c.bf16 %v3110_v21, %v3104_v56  ;;  %vm7792_vm15 = vmmov %vm7791_vm13 }
 0x5d7   : > { %v2673_v2 = vpop.permute.xlu1 %2672 }
 0x5d8   : > { %v2683_v42 = vsel %vm7773_vm6, %v2671_v31, %v2673_v2  ;;  %v6915_v10 = vpop.permute.xlu0 %2627  ;;  %vm7784_vm6 = vcmask 646144  }
 0x5d9   : > { %2695 = vst [vmem:[#allocation3 + $0x1b8] sm:$0xf0] %v2683_v42  ;;  %v3116_v27 = vld [vmem:[#allocation3 + $0x240] sm:$0xff] }
 0x5db   : > { %v2772_v5 = vpop.permute.xlu1 %2771 }
 0x5dc   : > { %v2782_v14 = vsel %vm7774_vm12, %v2770_v38, %v2772_v5  ;;  %v6918_v39 = vpop.permute.xlu0 %2722  ;;  %vm7785_vm12 = vmmov %vm7776_vm2  ;;  %v3913_v38 = vld [vmem:[#allocation3 + $0x108] sm:$0xff] }
 0x5dd   : > { %2794 = vst [vmem:[#allocation3 + $0x1e8] sm:$0xf0] %v2782_v14  ;;  %v2731_v22 = vsel %vm7775_vm5, %v2721_v35, %v6918_v39  ;;  %vm3134_vm5 = vcmask 883712  }
 0x5de   : > { %2743 = vst [vmem:[#allocation3 + $0x1f8] sm:$0xf] %v2731_v22 }
 0x5df   : > { %v2871_v30 = vpop.permute.xlu1 %2870 }
 0x5e0   : > { %v2881_v40 = vsel %vm7776_vm2, %v2869_v41, %v2871_v30  ;;  %v6925_v8 = vpop.permute.xlu0 %2821  ;;  %v6927_v9 = vld [vmem:[#allocation3 + $0x1b8] sm:$0xff]  ;;  %v5351_v41 = vpack.c.bf16 %v3122_v29, %v3116_v27  ;;  %vm7786_vm2 = vcmask 629760  }
 0x5e1   : > { %2893 = vst [vmem:[#allocation3 + $0x218] sm:$0xf0] %v2881_v40  ;;  %v2830_v13 = vsel %vm7777_vm11, %v2820_v62, %v6925_v8  ;;  %v5340_v15 = vpack.c.bf16 %v6927_v9, %v6678_v57  ;;  %vm7787_vm11 = vmmov %vm7778_vm7 }
 0x5e2   : > { %2842 = vst [vmem:[#allocation3 + $0x228] sm:$0xf] %v2830_v13 }
 0x5e3   : > { %v2970_v16 = vpop.permute.xlu1 %2969  ;;  %5341 = vmatprep.subr.bf16.mxu0 %v5340_v15 }
 0x5e4   : > { %v2980_v18 = vsel %vm7778_vm7, %v2968_v51, %v2970_v16  ;;  %5343 = vmatpush1.bf16.msra.mxu0 %v5342_v60  ;;  %v2727_v19 = vpop.permute.xlu0 %2726  ;;  %v3105_v26 = vld [vmem:[#allocation3 + $0x1e8] sm:$0xff]  ;;  %vm7788_vm7 = vcmask 941056  }
 0x5e5   : > { %2992 = vst [vmem:[#allocation3 + $0x248] sm:$0xf0] %v2980_v18 }
 0x5e7   : > { %v2675_v50 = vpop.permute.xlu1 %2674 }
 0x5e8   : > { %v2684_v3 = vsel %vm7779_vm8, %v2673_v2, %v2675_v50  ;;  %v6937_v55 = vpop.permute.xlu0 %2825  ;;  %v3111_v23 = vld [vmem:[#allocation3 + $0x218] sm:$0xff]  ;;  %vm7789_vm8 = vmmov %vm7788_vm7 }
 0x5e9   : > { %2696 = vst [vmem:[#allocation3 + $0x1c0] sm:$0xf0] %v2684_v3  ;;  %v6939_v57 = vpack.c.bf16 %v3111_v23, %v3105_v26 }
 0x5eb   : > { %v2774_v34 = vpop.permute.xlu1 %2773  ;;  %5345 = vmatprep.subr.bf16.mxu0 %v6939_v57 }
 0x5ec   : > { %v2783_v31 = vsel %vm7780_vm14, %v2772_v5, %v2774_v34  ;;  %5347 = vmatpush1.bf16.msra.mxu0 %v6941_v1  ;;  %v6946_v32 = vpop.permute.xlu0 %2920  ;;  %v3117_v35 = vld [vmem:[#allocation3 + $0x248] sm:$0xff]  ;;  %vm7790_vm14 = vcmask 932864  }
 0x5ed   : > { %2795 = vst [vmem:[#allocation3 + $0x1f0] sm:$0xf0] %v2783_v31  ;;  %v2929_v0 = vsel %vm7784_vm6, %v2919_v47, %v6946_v32  ;;  %v5348_v62 = vpack.c.bf16 %v3123_v36, %v3117_v35  ;;  %vm7793_vm6 = vcmask 785408  }
 0x5ee   : > { %2941 = vst [vmem:[#allocation3 + $0x258] sm:$0xf] %v2929_v0 }
 0x5ef   : > { %v2873_v28 = vpop.permute.xlu1 %2872  ;;  %5350 = vmatprep.subr.msk.bf16.mxu0 %vm6949_vm3, %v5348_v62 }
 0x5f0   : > { %v2882_v44 = vsel %vm7785_vm12, %v2871_v30, %v2873_v28  ;;  %5353 = vmatpush1.bf16.msk.msra.mxu0 %vm6949_vm3, %v5351_v41  ;;  %v6960_v51 = vpop.permute.xlu0 %3019  ;;  %vm7794_vm12 = vmmov %vm7793_vm6  ;;  %v3095_v30 = vld [vmem:[#allocation3 + $0x198] sm:$0xff] }
 0x5f1   : > { %2894 = vst [vmem:[#allocation3 + $0x220] sm:$0xf0] %v2882_v44  ;;  %v3028_v47 = vsel %vm7786_vm2, %v6906_v52, %v6960_v51  ;;  %5385 = vmatprep.subr.bf16.mxu0 %v6735_v61  ;;  %vm7795_vm2 = vcmask 793600  }
 0x5f2   : > { %3040 = vst [vmem:[#allocation3 + $0x288] sm:$0xf] %v3028_v47 }
 0x5f3   : > { %v6968_v43 = vpop.permute.xlu1 %2971  ;;  %5230 = vmatmul.mubr.msk.f32.vlgmr.msra.gmra.mrb[4].mxu0 %vm3134_vm5, %v6962_v49 }
 0x5f4   : > { %v2981_v46 = vsel %vm7787_vm11, %v2970_v16, %v6968_v43  ;;  %5387 = vmatpush1.bf16.msra.mxu0 %v6737_v63  ;;  %v2925_v2 = vpop.permute.xlu0 %2924  ;;  %3362 = vmatprep.mubr.f32.mxu0 %v5879_v24  ;;  %vm7796_vm11 = vcmask 646144   ;;  %v3106_v35 = vld [vmem:[#allocation3 + $0x1f0] sm:$0xff] }
 0x5f5   : > { %2993 = vst [vmem:[#allocation3 + $0x250] sm:$0xf0] %v2981_v46  ;;  %5389 = vmatprep.subr.bf16.mxu0 %v6742_v12 }
 0x5f7   : > { %v2626_v52 = vpop.permute.xlu1 %2625 }
 0x5f8   : > { %v2633_v61 = vsel %vm7788_vm7, %v6910_v59, %v2626_v52  ;;  %v2634_v42 = vsel %vm7789_vm8, %v2626_v52, %v6915_v10  ;;  %5391 = vmatpush1.bf16.msra.mxu0 %v6750_v17  ;;  %v2677_v5 = vpop.permute.xlu0 %2676  ;;  %vm7797_vm7 = vmmov %vm7796_vm11  ;;  %vm7798_vm8 = vcmask 777216  }
 0x5f9   : > { %2645 = vst [vmem:[#allocation3 + $0x1d0] sm:$0xf] %v2633_v61  ;;  %2646 = vst [vmem:[#allocation3 + $0x1d8] sm:$0xf] %v2634_v42  ;;  %v2685_v63 = vsel %vm7790_vm14, %v2675_v50, %v2677_v5  ;;  %5393 = vmatprep.subr.bf16.mxu0 %v6762_v37 }
 0x5fa   : > { %2697 = vst [vmem:[#allocation3 + $0x1c8] sm:$0xf0] %v2685_v63 }
 0x5fb   : > { %v2725_v24 = vpop.permute.xlu1 %2724 }
 0x5fc   : > { %v2732_v12 = vsel %vm7791_vm13, %v6918_v39, %v2725_v24  ;;  %v2733_v14 = vsel %vm7792_vm15, %v2725_v24, %v2727_v19  ;;  %5395 = vmatpush1.bf16.msra.mxu0 %v6764_v48  ;;  %v2681_v59 = vpop.permute.xlu0 %2680  ;;  %v3100_v39 = vld [vmem:[#allocation3 + $0x1c0] sm:$0xff]  ;;  %vm7799_vm13 = vmmov %vm7790_vm14 }
 0x5fd   : > { %2744 = vst [vmem:[#allocation3 + $0x200] sm:$0xf] %v2732_v12  ;;  %2745 = vst [vmem:[#allocation3 + $0x208] sm:$0xf] %v2733_v14  ;;  %5397 = vmatprep.subr.bf16.mxu0 %v6774_v25  ;;  %v3094_v25 = vld [vmem:[#allocation3 + $0x190] sm:$0xff] }
 0x5fe   : > { %v6997_v60 = vpack.c.bf16 %v3100_v39, %v3094_v25  ;;  %vm7800_vm15 = vmmov %vm7795_vm2 }
 0x5ff   : > { %v2824_v17 = vpop.permute.xlu1 %2823 }
 0x600   : > { %v2831_v10 = vsel %vm7793_vm6, %v6925_v8, %v2824_v17  ;;  %v2832_v37 = vsel %vm7794_vm12, %v2824_v17, %v6937_v55  ;;  %5399 = vmatpush1.bf16.msra.mxu0 %v6776_v7  ;;  %v2776_v22 = vpop.permute.xlu0 %2775  ;;  %vm7801_vm6 = vmmov %vm7795_vm2 }
 0x601   : > { %2843 = vst [vmem:[#allocation3 + $0x230] sm:$0xf] %v2831_v10  ;;  %2844 = vst [vmem:[#allocation3 + $0x238] sm:$0xf] %v2832_v37  ;;  %v2784_v48 = vsel %vm7795_vm2, %v2774_v34, %v2776_v22  ;;  %v3101_v40 = vld [vmem:[#allocation3 + $0x1c8] sm:$0xff]  ;;  %v3112_v34 = vld [vmem:[#allocation3 + $0x220] sm:$0xff] }
 0x602   : > { %2796 = vst [vmem:[#allocation3 + $0x1f8] sm:$0xf0] %v2784_v48  ;;  %v6995_v13 = vpack.c.bf16 %v3101_v40, %v3095_v30  ;;  %v7011_v0 = vpack.c.bf16 %v3112_v34, %v3106_v35  ;;  %vm7802_vm12 = vmmov %vm7798_vm8  ;;  %v3887_v48 = vld [vmem:[#allocation3 + $0x38] sm:$0xff]  ;;  %v3124_v40 = vld [vmem:[#allocation3 + $0x280] sm:$0xf] }
 0x603   : > { %v2923_v15 = vpop.permute.xlu1 %2922  ;;  %vm7803_vm2 = vmmov %vm7798_vm8 }
 0x604   : > { %v2930_v8 = vsel %vm7796_vm11, %v6946_v32, %v2923_v15  ;;  %v2931_v7 = vsel %vm7797_vm7, %v2923_v15, %v2925_v2  ;;  %5371 = vmatprep.subr.bf16.mxu1 %v6995_v13  ;;  %v2875_v16 = vpop.permute.xlu0 %2874  ;;  %vm7804_vm11 = vcmask 637952   ;;  %v3881_v15 = vld [vmem:[#allocation3 + $0x8] sm:$0xff] }
 0x605   : > { %2942 = vst [vmem:[#allocation3 + $0x260] sm:$0xf] %v2930_v8  ;;  %2943 = vst [vmem:[#allocation3 + $0x268] sm:$0xf] %v2931_v7  ;;  %v2883_v18 = vsel %vm7798_vm8, %v2873_v28, %v2875_v16  ;;  %5373 = vmatpush1.bf16.msra.mxu1 %v6997_v60  ;;  %v3886_v8 = vld [vmem:[#allocation3 + $0x30] sm:$0xff]  ;;  %v3899_v7 = vld [vmem:[#allocation3 + $0x98] sm:$0xff] }
 0x606   : > { %2895 = vst [vmem:[#allocation3 + $0x228] sm:$0xf0] %v2883_v18  ;;  %vm7805_vm7 = vmmov %vm7804_vm11 }
 0x607   : > { %v2679_v19 = vpop.permute.xlu1 %2678  ;;  %vm7806_vm8 = vmmov %vm7805_vm7 }
 0x608   : > { %v2686_v50 = vsel %vm7790_vm14, %v2677_v5, %v2679_v19  ;;  %v2687_v21 = vsel %vm7799_vm13, %v2679_v19, %v2681_v59  ;;  %v2780_v3 = vpop.permute.xlu0 %2779  ;;  %vm7807_vm14 = vcmask 629760   ;;  %v3893_v19 = vld [vmem:[#allocation3 + $0x68] sm:$0xff] }
 0x609   : > { %2698 = vst [vmem:[#allocation3 + $0x1d0] sm:$0xf0] %v2686_v50  ;;  %2699 = vst [vmem:[#allocation3 + $0x1d8] sm:$0xf0] %v2687_v21  ;;  %v3107_v27 = vld [vmem:[#allocation3 + $0x1f8] sm:$0xff]  ;;  %v5418_v50 = vpack.c.bf16 %v3899_v7, %v3893_v19 }
 0x60a   : > { %vm7808_vm13 = vmmov %vm7807_vm14 }
 0x60b   : > { %v2778_v55 = vpop.permute.xlu1 %2777 }
 0x60c   : > { %v2785_v26 = vsel %vm7800_vm15, %v2776_v22, %v2778_v55  ;;  %v2786_v23 = vsel %vm7801_vm6, %v2778_v55, %v2780_v3  ;;  %v2879_v56 = vpop.permute.xlu0 %2878  ;;  %v3125_v22 = vld [vmem:[#allocation3 + $0x288] sm:$0xf]  ;;  %v3898_v3 = vld [vmem:[#allocation3 + $0x90] sm:$0xff]  ;;  %vm7809_vm15 = vcmp.eq.s32.totalorder %v6422_v45, 1  ;;  %vm7810_vm6 = vcmp.eq.s32.totalorder %v6434_v53, 1 }
 0x60d   : > { %2797 = vst [vmem:[#allocation3 + $0x200] sm:$0xf0] %v2785_v26  ;;  %2798 = vst [vmem:[#allocation3 + $0x208] sm:$0xf0] %v2786_v23  ;;  %v3113_v31 = vld [vmem:[#allocation3 + $0x228] sm:$0xff] }
 0x60e   : > { %v7009_v32 = vpack.c.bf16 %v3113_v31, %v3107_v27  ;;  %v3889_v55 = vld [vmem:[#allocation3 + $0x48] sm:$0xff]  ;;  %v3892_v31 = vld [vmem:[#allocation3 + $0x60] sm:$0xff] }
 0x60f   : > { %v2877_v36 = vpop.permute.xlu1 %2876 }
 0x610   : > { %v2884_v62 = vsel %vm7802_vm12, %v2875_v16, %v2877_v36  ;;  %v2885_v29 = vsel %vm7803_vm2, %v2877_v36, %v2879_v56  ;;  %5375 = vmatprep.subr.bf16.mxu1 %v7009_v32  ;;  %v2974_v41 = vpop.permute.xlu0 %2973  ;;  %v3103_v28 = vld [vmem:[#allocation3 + $0x1d8] sm:$0xff]  ;;  %v3102_v44 = vld [vmem:[#allocation3 + $0x1d0] sm:$0xff]  ;;  %v3880_v16 = vld [vmem:[#allocation3] sm:$0xff]  ;;  %v5420_v36 = vpack.c.bf16 %v3898_v3, %v3892_v31 }
 0x611   : > { %2896 = vst [vmem:[#allocation3 + $0x230] sm:$0xf0] %v2884_v62  ;;  %2897 = vst [vmem:[#allocation3 + $0x238] sm:$0xf0] %v2885_v29  ;;  %v2982_v47 = vsel %vm7804_vm11, %v6968_v43, %v2974_v41  ;;  %5377 = vmatpush1.bf16.msra.mxu1 %v7011_v0  ;;  %v5400_v46 = vpack.c.bf16 %v3103_v28, %v6780_v54  ;;  %v5402_v2 = vpack.c.bf16 %v3102_v44, %v6782_v58  ;;  %v3118_v43 = vld [vmem:[#allocation3 + $0x250] sm:$0xff]  ;;  %v3911_v56 = vld [vmem:[#allocation3 + $0xf8] sm:$0xff] }
 0x612   : > { %2994 = vst [vmem:[#allocation3 + $0x258] sm:$0xf0] %v2982_v47  ;;  %v5381_v25 = vpack.c.bf16 %v3124_v40, %v3118_v43  ;;  %v5416_v18 = vpack.c.bf16 %v3886_v8, %v3880_v16  ;;  %v3905_v62 = vld [vmem:[#allocation3 + $0xc8] sm:$0xff]  ;;  %v3883_v29 = vld [vmem:[#allocation3 + $0x18] sm:$0xff]  ;;  %v3910_v44 = vld [vmem:[#allocation3 + $0xf0] sm:$0xff]  ;;  %vm7811_vm11 = vcmp.eq.s32.totalorder %v6484_v6, 1 }
 0x613   : > { %v2976_v52 = vpop.permute.xlu1 %2975  ;;  %5401 = vmatprep.subr.bf16.mxu0 %v5400_v46  ;;  %v5450_v28 = vpack.c.bf16 %v3889_v55, %v3883_v29  ;;  %v3888_v47 = vld [vmem:[#allocation3 + $0x40] sm:$0xff]  ;;  %v3923_v46 = vld [vmem:[#allocation3 + $0x158] sm:$0xff] }
 0x614   : > { %v2983_v61 = vsel %vm7805_vm7, %v2974_v41, %v2976_v52  ;;  %5403 = vmatpush1.bf16.msra.mxu0 %v5402_v2  ;;  %v2978_v42 = vpop.permute.xlu0 %2977  ;;  %v3109_v24 = vld [vmem:[#allocation3 + $0x208] sm:$0xff]  ;;  %v3108_v58 = vld [vmem:[#allocation3 + $0x200] sm:$0xff]  ;;  %v5422_v41 = vpack.c.bf16 %v3911_v56, %v3905_v62  ;;  %v3919_v8 = vld [vmem:[#allocation3 + $0x138] sm:$0xff] }
 0x615   : > { %2995 = vst [vmem:[#allocation3 + $0x260] sm:$0xf0] %v2983_v61  ;;  %v2984_v5 = vsel %vm7806_vm8, %v2976_v52, %v2978_v42  ;;  %v3901_v2 = vld [vmem:[#allocation3 + $0xa8] sm:$0xff]  ;;  %v3904_v52 = vld [vmem:[#allocation3 + $0xc0] sm:$0xff]  ;;  %v3882_v61 = vld [vmem:[#allocation3 + $0x10] sm:$0xff] }
 0x616   : > { %2996 = vst [vmem:[#allocation3 + $0x268] sm:$0xf0] %v2984_v5  ;;  %v5424_v42 = vpack.c.bf16 %v3910_v44, %v3904_v52  ;;  %v5452_v5 = vpack.c.bf16 %v3888_v47, %v3882_v61  ;;  %v3928_v40 = vld [vmem:[#allocation3 + $0x180] sm:$0xff] }
 0x617   : > { %v3022_v63 = vpop.permute.xlu1 %3021  ;;  %v3924_v16 = vld [vmem:[#allocation3 + $0x160] sm:$0xff] }
 0x618   : > { %v3029_v12 = vsel %vm7807_vm14, %v6960_v51, %v3022_v63  ;;  %v3024_v54 = vpop.permute.xlu0 %3023  ;;  %v3115_v14 = vld [vmem:[#allocation3 + $0x238] sm:$0xff]  ;;  %v3114_v59 = vld [vmem:[#allocation3 + $0x230] sm:$0xff]  ;;  %v5414_v51 = vpack.c.bf16 %v3887_v48, %v3881_v15  ;;  %v5432_v15 = vpack.c.bf16 %v6922_v33, %v3928_v40  ;;  %vm7812_vm14 = vcmask 261120  }
 0x619   : > { %3041 = vst [vmem:[#allocation3 + $0x290] sm:$0xf] %v3029_v12  ;;  %v3030_v17 = vsel %vm7808_vm13, %v3022_v63, %v3024_v54  ;;  %v5404_v10 = vpack.c.bf16 %v3115_v14, %v3109_v24  ;;  %v3119_v37 = vld [vmem:[#allocation3 + $0x258] sm:$0xff]  ;;  %v5406_v39 = vpack.c.bf16 %v3114_v59, %v3108_v58  ;;  %v3917_v63 = vld [vmem:[#allocation3 + $0x128] sm:$0xff]  ;;  %v3922_v54 = vld [vmem:[#allocation3 + $0x150] sm:$0xff] }
 0x61a   : > { %3042 = vst [vmem:[#allocation3 + $0x298] sm:$0xf] %v3030_v17  ;;  %v5378_v30 = vpack.c.bf16 %v3125_v22, %v3119_v37  ;;  %v3895_v24 = vld [vmem:[#allocation3 + $0x78] sm:$0xff]  ;;  %v5426_v43 = vpack.c.bf16 %v3923_v46, %v3917_v63  ;;  %v3900_v14 = vld [vmem:[#allocation3 + $0xa0] sm:$0xff]  ;;  %v3894_v59 = vld [vmem:[#allocation3 + $0x70] sm:$0xff] }
 0x61b   : > { %5405 = vmatprep.subr.bf16.mxu0 %v5404_v10  ;;  %v5454_v12 = vpack.c.bf16 %v3901_v2, %v3895_v24  ;;  %v3916_v58 = vld [vmem:[#allocation3 + $0x120] sm:$0xff]  ;;  %v5456_v10 = vpack.c.bf16 %v3900_v14, %v3894_v59  ;;  %v3929_v37 = vld [vmem:[#allocation3 + $0x188] sm:$0xff]  ;;  %v3907_v22 = vld [vmem:[#allocation3 + $0xd8] sm:$0xff] }
 0x61c   : > { %5380 = vmatprep.subr.msk.bf16.mxu1 %vm6949_vm3, %v5378_v30  ;;  %5407 = vmatpush1.bf16.msra.mxu0 %v5406_v39  ;;  %v3120_v27 = vld [vmem:[#allocation3 + $0x260] sm:$0xff]  ;;  %v5428_v17 = vpack.c.bf16 %v3922_v54, %v3916_v58  ;;  %v5430_v39 = vpack.c.bf16 %v6927_v9, %v3929_v37  ;;  %v5458_v48 = vpack.c.bf16 %v3913_v38, %v3907_v22  ;;  %v3918_v9 = vld [vmem:[#allocation3 + $0x130] sm:$0xff] }
 0x61d   : > { %5383 = vmatpush1.bf16.msk.msra.mxu1 %vm6949_vm3, %v5381_v25  ;;  %v3121_v26 = vld [vmem:[#allocation3 + $0x268] sm:$0xff]  ;;  %v3912_v30 = vld [vmem:[#allocation3 + $0x100] sm:$0xff]  ;;  %v3906_v25 = vld [vmem:[#allocation3 + $0xd0] sm:$0xff] }
 0x61e   : > { %5415 = vmatprep.subr.bf16.mxu1 %v5414_v51  ;;  %v5460_v51 = vpack.c.bf16 %v3912_v30, %v3906_v25 }
 0x620   : > { %5233 = vmatmul.mubr.msk.f32.vlgmr.msra.gmra.mrb[8].mxu1 %vm3134_vm5, %v6962_v49  ;;  %v3126_v21 = vld [vmem:[#allocation3 + $0x290] sm:$0xf] }
 0x621   : > { %5417 = vmatpush1.bf16.msra.mxu1 %v5416_v18  ;;  %v3127_v23 = vld [vmem:[#allocation3 + $0x298] sm:$0xf]  ;;  %v5411_v35 = vpack.c.bf16 %v3126_v21, %v3120_v27  ;;  %v5464_v18 = vpack.c.bf16 %v3924_v16, %v3918_v9 }
 0x622   : > { %5419 = vmatprep.subr.bf16.mxu1 %v5418_v50  ;;  %v5408_v34 = vpack.c.bf16 %v3127_v23, %v3121_v26 }
 0x624   : > { %5410 = vmatprep.subr.msk.bf16.mxu0 %vm6949_vm3, %v5408_v34 }
 0x625   : > { %5413 = vmatpush1.bf16.msk.msra.mxu0 %vm6949_vm3, %v5411_v35  ;;  %5421 = vmatpush1.bf16.msra.mxu1 %v5420_v36 }
 0x626   : > { %5423 = vmatprep.subr.bf16.mxu1 %v5422_v41  ;;  %5451 = vmatprep.subr.bf16.mxu0 %v5450_v28 }
 0x628   : > { %5236 = vmatmul.mubr.msk.f32.vlgmr.msra.gmra.mrb[6].mxu0 %vm3134_vm5, %v6962_v49  ;;  %v3925_v49 = vld [vmem:[#allocation3 + $0x168] sm:$0xff]  ;;  %v3132_v33 = vpop.permute.xlu1 %3131 }
 0x629   : > { %5425 = vmatpush1.bf16.msra.mxu1 %v5424_v42  ;;  %5453 = vmatpush1.bf16.msra.mxu0 %v5452_v5  ;;  %v5462_v7 = vpack.c.bf16 %v3925_v49, %v3919_v8 }
 0x62a   : > { %5427 = vmatprep.subr.bf16.mxu1 %v5426_v43  ;;  %5455 = vmatprep.subr.bf16.mxu0 %v5454_v12 }
 0x62d   : > { %5429 = vmatpush1.bf16.msra.mxu1 %v5428_v17  ;;  %5457 = vmatpush1.bf16.msra.mxu0 %v5456_v10 }
 0x62e   : > { %5431 = vmatprep.subr.bf16.mxu1 %v5430_v39  ;;  %5459 = vmatprep.subr.bf16.mxu0 %v5458_v48 }
 0x631   : > { %5433 = vmatpush1.bf16.msra.mxu1 %v5432_v15  ;;  %5461 = vmatpush1.bf16.msra.mxu0 %v5460_v51 }
 0x632   : > { %5435 = vmatprep.subr.bf16.mxu1 %v6939_v57  ;;  %5463 = vmatprep.subr.bf16.mxu0 %v5462_v7 }
 0x635   : > { %5437 = vmatpush1.bf16.msra.mxu1 %v6941_v1  ;;  %5465 = vmatpush1.bf16.msra.mxu0 %v5464_v18 }
 0x636   : > { %5467 = vmatprep.subr.bf16.mxu0 %v6995_v13 }
 0x639   : > { %5469 = vmatpush1.bf16.msra.mxu0 %v6997_v60 }
 0x63a   : > { %5471 = vmatprep.subr.bf16.mxu0 %v7009_v32 }
 0x63d   : > { %5473 = vmatpush1.bf16.msra.mxu0 %v7011_v0 }
 0x6c6   : > { %v3222_v19 = vpop.f32.mrb[4].mxu0 }
 0x6c7   : > { %v3223_v50 = vadd.f32 %v3222_v19, %v3132_v33  ;;  %v3224_v21 = vpop.f32.mrb[5].mxu0 }
 0x6c8   : > { %v3225_v3 = vadd.f32 %v3224_v21, %v3132_v33 }
 0x6c9   : > { %vm3369_vm3 = vcmp.ge.f32.partialorder %v3223_v50, 0.0  ;;  %v3375_v57 = vmul.f32 0.2, %v3223_v50 }
 0x6ca   : > { %vm3370_vm5 = vcmp.ge.f32.partialorder %v3225_v3, 0.0  ;;  %v3376_v55 = vmul.f32 0.2, %v3225_v3 }
 0x6cb   : > { %v3381_v26 = vsel %vm3369_vm3, %v3223_v50, %v3375_v57 }
 0x6cc   : > { %v3387_v1 = vsel %vm7809_vm15, %v3381_v26, 0.0  ;;  %v3382_v13 = vsel %vm3370_vm5, %v3225_v3, %v3376_v55  ;;  %vm7817_vm15 = vcmask 924672  }
 0x6cd   : > { %v3399_v23 = vrot.slane %v3387_v1, 4  ;;  %v3388_v60 = vsel %vm7810_vm6, %v3382_v13, 0.0  ;;  %vm7818_vm6 = vcmask 785408  }
 0x6ce   : > { %v3400_v32 = vrot.slane %v3388_v60, 4 }
 0x6cf   : > { %3405 = vrot.lane.b32.xlu0 %v3399_v23, %s5869_s20 }
 0x6d0   : > { %3407 = vrot.lane.b32.xlu1 %v3400_v32, %s5869_s20 }
 0x6f3   : > { %v3293_v0 = vpop.f32.mrb[8].mxu1 }
 0x6f4   : > { %v3294_v56 = vadd.f32 %v3293_v0, %v3132_v33  ;;  %v3295_v34 = vpop.f32.mrb[9].mxu1 }
 0x6f5   : > { %v3296_v27 = vadd.f32 %v3295_v34, %v3132_v33 }
 0x6f6   : > { %vm3371_vm12 = vcmp.ge.f32.partialorder %v3294_v56, 0.0  ;;  %v3377_v31 = vmul.f32 0.2, %v3294_v56 }
 0x6f7   : > { %vm3372_vm2 = vcmp.ge.f32.partialorder %v3296_v27, 0.0  ;;  %v3378_v35 = vmul.f32 0.2, %v3296_v27 }
 0x6f8   : > { %v3383_v36 = vsel %vm3371_vm12, %v3294_v56, %v3377_v31  ;;  %vm7819_vm12 = vcmask 646144  }
 0x6f9   : > { %v3389_v62 = vsel %vm6503_vm0, %v3383_v36, 0.0  ;;  %v3384_v29 = vsel %vm3372_vm2, %v3296_v27, %v3378_v35  ;;  %vm7820_vm2 = vcmask 941056  }
 0x6fa   : > { %v3401_v41 = vrot.slane %v3389_v62, 4  ;;  %v3390_v28 = vsel %vm7811_vm11, %v3384_v29, 0.0  ;;  %vm7821_vm11 = vcmask 629760  }
 0x6fb   : > { %v3402_v44 = vrot.slane %v3390_v28, 4  ;;  %v3364_v47 = vpop.f32.mrb[6].mxu0 }
 0x6fc   : > { %v3365_v46 = vadd.f32 %v3364_v47, %v3132_v33  ;;  %3409 = vrot.lane.b32.xlu0 %v3401_v41, %s5869_s20  ;;  %v3366_v2 = vpop.f32.mrb[7].mxu0 }
 0x6fd   : > { %v3367_v52 = vadd.f32 %v3366_v2, %v3132_v33  ;;  %3411 = vrot.lane.b32.xlu1 %v3402_v44, %s5869_s20 }
 0x6fe   : > { %vm3373_vm7 = vcmp.ge.f32.partialorder %v3365_v46, 0.0  ;;  %v3379_v61 = vmul.f32 0.2, %v3365_v46 }
 0x6ff   : > { %vm3374_vm8 = vcmp.ge.f32.partialorder %v3367_v52, 0.0  ;;  %v3380_v42 = vmul.f32 0.2, %v3367_v52 }
 0x700   : > { %v3385_v5 = vsel %vm3373_vm7, %v3365_v46, %v3379_v61  ;;  %vm7822_vm7 = vcmask 932864  }
 0x701   : > { %v3391_v63 = vsel %vm1766_vm4, %v3385_v5, 0.0  ;;  %v3386_v24 = vsel %vm3374_vm8, %v3367_v52, %v3380_v42  ;;  %vm7823_vm8 = vcmask 793600  }
 0x702   : > { %v3403_v43 = vrot.slane %v3391_v63, 4  ;;  %v3392_v12 = vsel %vm6530_vm10, %v3386_v24, 0.0 }
 0x703   : > { %v3404_v54 = vrot.slane %v3392_v12, 4 }
 0x704   : > { %3413 = vrot.lane.b32.xlu0 %v3403_v43, %s5869_s20 }
 0x705   : > { %3415 = vrot.lane.b32.xlu1 %v3404_v54, %s5869_s20 }
 0x741   : > { %v3406_v14 = vpop.permute.xlu0 %3405 }
 0x742   : > { %3429 = vst.msk [vmem:[#allocation2 + $0x38] sm:$0xf0] %vm1810_vm1, %v3406_v14  ;;  %v3408_v38 = vpop.permute.xlu1 %3407  ;;  %vm7813_vm1 = vmmov %vm7812_vm14 }
 0x743   : > { %v3417_v58 = vsel %vm7812_vm14, %v3406_v14, %v3408_v38  ;;  %vm7814_vm13 = vmmov %vm7813_vm1  ;;  %vm7824_vm14 = vcmask 777216  }
 0x744   : > { %3430 = vst [vmem:[#allocation2 + $0x40] sm:$0xf0] %v3417_v58  ;;  %vm7815_vm3 = vmmov %vm7813_vm1  ;;  %v3879_v58 = vld [vmem:[#allocation7 + $0x18] sm:$0xf0] }
 0x745   : > { %vm7816_vm5 = vmmov %vm7813_vm1 }
 0x749   : > { %v3436_v59 = vld [vmem:[#allocation2 + $0x38] sm:$0xf0] }
 0x74a   : > { %3450 = vrot.lane.b32.xlu0 %v3436_v59, %s5870_s18  ;;  %v3535_v10 = vld [vmem:[#allocation2 + $0x38] sm:$0xf0]  ;;  %v7104_v59 = vrot.slane %v3879_v58, 4 }
 0x74b   : > { %v3536_v17 = vld [vmem:[#allocation2 + $0x40] sm:$0xf0]  ;;  %v3482_v22 = vld [vmem:[#allocation2 + $0x38] sm:$0xf0] }
 0x74c   : > { %3551 = vrot.lane.b32.xlu1 %v3536_v17, %s5872_s25  ;;  %v3635_v37 = vld [vmem:[#allocation2 + $0x40] sm:$0xf0]  ;;  %v3634_v39 = vld [vmem:[#allocation2 + $0x38] sm:$0xf0]  ;;  %v3496_v48 = vrot.slane %v3482_v22, 4 }
 0x74d   : > { %v3581_v30 = vld [vmem:[#allocation2 + $0x38] sm:$0xf0]  ;;  %v3734_v15 = vld [vmem:[#allocation2 + $0x40] sm:$0xf0] }
 0x74e   : > { %3549 = vrot.lane.b32.xlu0 %v3535_v10, %s5872_s25  ;;  %v3733_v49 = vld [vmem:[#allocation2 + $0x38] sm:$0xf0]  ;;  %v3595_v40 = vrot.slane %v3581_v30, 4  ;;  %v3437_v51 = vld [vmem:[#allocation2 + $0x40] sm:$0xf0] }
 0x74f   : > { %v3832_v25 = vld [vmem:[#allocation2 + $0x38] sm:$0xf0]  ;;  %v3833_v8 = vld [vmem:[#allocation2 + $0x40] sm:$0xf0] }
 0x750   : > { %3650 = vrot.lane.b32.xlu1 %v3635_v37, %s5874_s5  ;;  %v3680_v7 = vld [vmem:[#allocation2 + $0x38] sm:$0xf0]  ;;  %v3483_v33 = vld [vmem:[#allocation2 + $0x40] sm:$0xf0] }
 0x751   : > { %v3694_v16 = vrot.slane %v3680_v7, 4  ;;  %v3779_v9 = vld [vmem:[#allocation2 + $0x38] sm:$0xf0]  ;;  %v3497_v19 = vrot.slane %v3483_v33, 4  ;;  %v3582_v50 = vld [vmem:[#allocation2 + $0x40] sm:$0xf0] }
 0x752   : > { %3648 = vrot.lane.b32.xlu0 %v3634_v39, %s5874_s5  ;;  %v3793_v18 = vrot.slane %v3779_v9, 4  ;;  %v3596_v3 = vrot.slane %v3582_v50, 4  ;;  %v3681_v26 = vld [vmem:[#allocation2 + $0x40] sm:$0xf0] }
 0x753   : > { %v3695_v13 = vrot.slane %v3681_v26, 4  ;;  %v3780_v23 = vld [vmem:[#allocation2 + $0x40] sm:$0xf0] }
 0x754   : > { %3503 = vrot.lane.b32.xlu1 %v3496_v48, %s5871_s23  ;;  %v3794_v32 = vrot.slane %v3780_v23, 4 }
 0x756   : > { %3747 = vrot.lane.b32.xlu0 %v3733_v49, %s5876_s9 }
 0x758   : > { %3602 = vrot.lane.b32.xlu1 %v3595_v40, %s5873_s4 }
 0x75a   : > { %3846 = vrot.lane.b32.xlu0 %v3832_v25, %s5878_s11 }
 0x75c   : > { %3749 = vrot.lane.b32.xlu1 %v3734_v15, %s5876_s9 }
 0x75e   : > { %3452 = vrot.lane.b32.xlu0 %v3437_v51, %s5870_s18 }
 0x760   : > { %3848 = vrot.lane.b32.xlu1 %v3833_v8, %s5878_s11 }
 0x764   : > { %3701 = vrot.lane.b32.xlu1 %v3694_v16, %s5875_s8 }
 0x768   : > { %3800 = vrot.lane.b32.xlu1 %v3793_v18, %s5877_s10 }
 0x76c   : > { %3505 = vrot.lane.b32.xlu1 %v3497_v19, %s5871_s23 }
 0x76e   : > { %v3410_v21 = vpop.permute.xlu0 %3409 }
 0x76f   : > { %v3418_v57 = vsel %vm7813_vm1, %v3408_v38, %v3410_v21  ;;  %v3412_v55 = vpop.permute.xlu1 %3411  ;;  %vm7825_vm1 = vcmask 637952  }
 0x770   : > { %3431 = vst [vmem:[#allocation2 + $0x48] sm:$0xf0] %v3418_v57  ;;  %v3419_v1 = vsel %vm7814_vm13, %v3410_v21, %v3412_v55  ;;  %3604 = vrot.lane.b32.xlu1 %v3596_v3, %s5873_s4  ;;  %vm7826_vm13 = vmmov %vm7817_vm15 }
 0x771   : > { %3432 = vst [vmem:[#allocation2 + $0x50] sm:$0xf0] %v3419_v1 }
 0x774   : > { %3703 = vrot.lane.b32.xlu1 %v3695_v13, %s5875_s8 }
 0x776   : > { %v3414_v60 = vpop.permute.xlu0 %3413 }
 0x777   : > { %v3420_v0 = vsel %vm7815_vm3, %v3412_v55, %v3414_v60  ;;  %v3416_v56 = vpop.permute.xlu1 %3415  ;;  %v3537_v34 = vld [vmem:[#allocation2 + $0x48] sm:$0xf0]  ;;  %vm7827_vm3 = vmmov %vm7820_vm2 }
 0x778   : > { %3433 = vst [vmem:[#allocation2 + $0x58] sm:$0xf0] %v3420_v0  ;;  %v3421_v27 = vsel %vm7816_vm5, %v3414_v60, %v3416_v56  ;;  %3435 = vst.msk [vmem:[#allocation2 + $0x68] sm:$0xf0] %vm1817_vm9, %v3416_v56  ;;  %3802 = vrot.lane.b32.xlu1 %v3794_v32, %s5877_s10  ;;  %3553 = vrot.lane.b32.xlu0 %v3537_v34, %s5872_s25  ;;  %v3636_v31 = vld [vmem:[#allocation2 + $0x48] sm:$0xf0] }
 0x779   : > { %3434 = vst [vmem:[#allocation2 + $0x60] sm:$0xf0] %v3421_v27  ;;  %v3438_v35 = vld [vmem:[#allocation2 + $0x48] sm:$0xf0]  ;;  %v3439_v62 = vld [vmem:[#allocation2 + $0x50] sm:$0xf0]  ;;  %vm7828_vm5 = vmmov %vm7818_vm6 }
 0x77a   : > { %v3735_v36 = vld [vmem:[#allocation2 + $0x48] sm:$0xf0]  ;;  %v3538_v41 = vld [vmem:[#allocation2 + $0x50] sm:$0xf0]  ;;  %vm3999_vm9 = vcmask 130048  }
 0x77b   : > { %v3834_v29 = vld [vmem:[#allocation2 + $0x48] sm:$0xf0]  ;;  %v3637_v47 = vld [vmem:[#allocation2 + $0x50] sm:$0xf0]  ;;  %5237 = vmatprep.mubr.msk.f32.mxu1 %vm3999_vm9, %v7104_v59  ;;  %5238 = vmatprep.mubr.msk.f32.mxu0 %vm3999_vm9, %v7104_v59 }
 0x77c   : > { %3652 = vrot.lane.b32.xlu0 %v3636_v31, %s5874_s5  ;;  %3454 = vrot.lane.b32.xlu1 %v3438_v35, %s5870_s18  ;;  %v3484_v28 = vld [vmem:[#allocation2 + $0x48] sm:$0xf0]  ;;  %v3736_v52 = vld [vmem:[#allocation2 + $0x50] sm:$0xf0] }
 0x77d   : > { %v3498_v44 = vrot.slane %v3484_v28, 4  ;;  %v3583_v46 = vld [vmem:[#allocation2 + $0x48] sm:$0xf0]  ;;  %v3485_v14 = vld [vmem:[#allocation2 + $0x50] sm:$0xf0] }
 0x77e   : > { %v3597_v2 = vrot.slane %v3583_v46, 4  ;;  %v3682_v61 = vld [vmem:[#allocation2 + $0x48] sm:$0xf0]  ;;  %v3499_v17 = vrot.slane %v3485_v14, 4  ;;  %v3584_v37 = vld [vmem:[#allocation2 + $0x50] sm:$0xf0] }
 0x77f   : > { %v3486_v42 = vld [vmem:[#allocation2 + $0x58] sm:$0xf0]  ;;  %v3696_v5 = vrot.slane %v3682_v61, 4  ;;  %v3781_v24 = vld [vmem:[#allocation2 + $0x48] sm:$0xf0]  ;;  %v3598_v39 = vrot.slane %v3584_v37, 4 }
 0x780   : > { %3751 = vrot.lane.b32.xlu0 %v3735_v36, %s5876_s9  ;;  %3456 = vrot.lane.b32.xlu1 %v3439_v62, %s5870_s18  ;;  %v3500_v63 = vrot.slane %v3486_v42, 4  ;;  %v3585_v43 = vld [vmem:[#allocation2 + $0x58] sm:$0xf0]  ;;  %v3795_v12 = vrot.slane %v3781_v24, 4  ;;  %v3683_v30 = vld [vmem:[#allocation2 + $0x50] sm:$0xf0] }
 0x781   : > { %v3599_v54 = vrot.slane %v3585_v43, 4  ;;  %v3684_v38 = vld [vmem:[#allocation2 + $0x58] sm:$0xf0]  ;;  %v3697_v49 = vrot.slane %v3683_v30, 4  ;;  %v3835_v40 = vld [vmem:[#allocation2 + $0x50] sm:$0xf0] }
 0x782   : > { %v3698_v10 = vrot.slane %v3684_v38, 4  ;;  %v3783_v22 = vld [vmem:[#allocation2 + $0x58] sm:$0xf0]  ;;  %v3782_v25 = vld [vmem:[#allocation2 + $0x50] sm:$0xf0] }
 0x783   : > { %v3797_v48 = vrot.slane %v3783_v22, 4  ;;  %v3796_v15 = vrot.slane %v3782_v25, 4  ;;  %v3441_v51 = vld [vmem:[#allocation2 + $0x60] sm:$0xf0]  ;;  %v3440_v7 = vld [vmem:[#allocation2 + $0x58] sm:$0xf0] }
 0x784   : > { %3850 = vrot.lane.b32.xlu0 %v3834_v29, %s5878_s11  ;;  %3555 = vrot.lane.b32.xlu1 %v3538_v41, %s5872_s25  ;;  %v3540_v8 = vld [vmem:[#allocation2 + $0x60] sm:$0xf0]  ;;  %v3539_v9 = vld [vmem:[#allocation2 + $0x58] sm:$0xf0]  ;;  %v3442_v13 = vld [vmem:[#allocation2 + $0x68] sm:$0xf0] }
 0x785   : > { %v3639_v16 = vld [vmem:[#allocation2 + $0x60] sm:$0xf0]  ;;  %v3638_v33 = vld [vmem:[#allocation2 + $0x58] sm:$0xf0]  ;;  %v3541_v56 = vld [vmem:[#allocation2 + $0x68] sm:$0xf0] }
 0x786   : > { %v3738_v18 = vld [vmem:[#allocation2 + $0x60] sm:$0xf0]  ;;  %v3737_v21 = vld [vmem:[#allocation2 + $0x58] sm:$0xf0]  ;;  %v3640_v36 = vld [vmem:[#allocation2 + $0x68] sm:$0xf0] }
 0x787   : > { %v3487_v19 = vld [vmem:[#allocation2 + $0x60] sm:$0xf0]  ;;  %v3836_v55 = vld [vmem:[#allocation2 + $0x58] sm:$0xf0]  ;;  %v3988_v41 = vld [vmem:[%s7592_s2 + $0xc] sm:$0xf] }
 0x788   : > { %3507 = vrot.lane.b32.xlu0 %v3498_v44, %s5871_s23  ;;  %3654 = vrot.lane.b32.xlu1 %v3637_v47, %s5874_s5  ;;  %v3501_v50 = vrot.slane %v3487_v19, 4  ;;  %v3586_v3 = vld [vmem:[#allocation2 + $0x60] sm:$0xf0]  ;;  %v3739_v44 = vld [vmem:[#allocation2 + $0x68] sm:$0xf0] }
 0x789   : > { %v3600_v57 = vrot.slane %v3586_v3, 4  ;;  %v3685_v26 = vld [vmem:[#allocation2 + $0x60] sm:$0xf0]  ;;  %v3488_v47 = vld [vmem:[#allocation2 + $0x68] sm:$0xf0] }
 0x78a   : > { %v3699_v1 = vrot.slane %v3685_v26, 4  ;;  %v3784_v23 = vld [vmem:[#allocation2 + $0x60] sm:$0xf0]  ;;  %v3587_v61 = vld [vmem:[#allocation2 + $0x68] sm:$0xf0] }
 0x78b   : > { %v3798_v0 = vrot.slane %v3784_v23, 4  ;;  %v3837_v35 = vld [vmem:[#allocation2 + $0x60] sm:$0xf0]  ;;  %v3686_v43 = vld [vmem:[#allocation2 + $0x68] sm:$0xf0] }
 0x78c   : > { %3606 = vrot.lane.b32.xlu0 %v3597_v2, %s5873_s4  ;;  %3753 = vrot.lane.b32.xlu1 %v3736_v52, %s5876_s9  ;;  %v3502_v52 = vrot.slane %v3488_v47, 4  ;;  %v3700_v38 = vrot.slane %v3686_v43, 4 }
 0x790   : > { %3705 = vrot.lane.b32.xlu0 %v3696_v5, %s5875_s8  ;;  %3511 = vrot.lane.b32.xlu1 %v3500_v63, %s5871_s23  ;;  %v3601_v63 = vrot.slane %v3587_v61, 4 }
 0x794   : > { %3804 = vrot.lane.b32.xlu0 %v3795_v12, %s5877_s10  ;;  %3610 = vrot.lane.b32.xlu1 %v3599_v54, %s5873_s4 }
 0x798   : > { %3509 = vrot.lane.b32.xlu0 %v3499_v17, %s5871_s23  ;;  %3709 = vrot.lane.b32.xlu1 %v3698_v10, %s5875_s8  ;;  %v3785_v17 = vld [vmem:[#allocation2 + $0x68] sm:$0xf0] }
 0x799   : > { %v3799_v37 = vrot.slane %v3785_v17, 4 }
 0x79c   : > { %3608 = vrot.lane.b32.xlu0 %v3598_v39, %s5873_s4  ;;  %3808 = vrot.lane.b32.xlu1 %v3797_v48, %s5877_s10  ;;  %v3838_v39 = vld [vmem:[#allocation2 + $0x68] sm:$0xf0] }
 0x7a0   : > { %3707 = vrot.lane.b32.xlu0 %v3697_v49, %s5875_s8  ;;  %3852 = vrot.lane.b32.xlu1 %v3835_v40, %s5878_s11 }
 0x7a4   : > { %3806 = vrot.lane.b32.xlu0 %v3796_v15, %s5877_s10  ;;  %3460 = vrot.lane.b32.xlu1 %v3441_v51, %s5870_s18 }
 0x7a8   : > { %3559 = vrot.lane.b32.xlu1 %v3540_v8, %s5872_s25  ;;  %3458 = vrot.lane.b32.xlu0 %v3440_v7, %s5870_s18 }
 0x7ac   : > { %3658 = vrot.lane.b32.xlu1 %v3639_v16, %s5874_s5  ;;  %3557 = vrot.lane.b32.xlu0 %v3539_v9, %s5872_s25 }
 0x7b0   : > { %3757 = vrot.lane.b32.xlu1 %v3738_v18, %s5876_s9  ;;  %3656 = vrot.lane.b32.xlu0 %v3638_v33, %s5874_s5 }
 0x7b4   : > { %3513 = vrot.lane.b32.xlu1 %v3501_v50, %s5871_s23  ;;  %3755 = vrot.lane.b32.xlu0 %v3737_v21, %s5876_s9 }
 0x7b8   : > { %3612 = vrot.lane.b32.xlu1 %v3600_v57, %s5873_s4  ;;  %3854 = vrot.lane.b32.xlu0 %v3836_v55, %s5878_s11 }
 0x7bc   : > { %3711 = vrot.lane.b32.xlu1 %v3699_v1, %s5875_s8  ;;  %3462 = vrot.lane.b32.xlu0 %v3442_v13, %s5870_s18  ;;  %v3451_v60 = vpop.permute.xlu0 %3450 }
 0x7be   : > { %v3552_v32 = vpop.permute.xlu1 %3551 }
 0x7c0   : > { %3810 = vrot.lane.b32.xlu1 %v3798_v0, %s5877_s10  ;;  %3561 = vrot.lane.b32.xlu0 %v3541_v56, %s5872_s25  ;;  %v3550_v34 = vpop.permute.xlu0 %3549  ;;  %v3952_v56 = vld [vmem:[#allocation3 + $0x240] sm:$0xff] }
 0x7c1   : > { %v3563_v27 = vsel %vm7817_vm15, %v3550_v34, %v3552_v32  ;;  %vm7829_vm15 = vmmov %vm7820_vm2 }
 0x7c2   : > { %3575 = vst [vmem:[#allocation3 + $0x2a0] sm:$0xf0] %v3563_v27  ;;  %v3651_v31 = vpop.permute.xlu1 %3650 }
 0x7c4   : > { %3856 = vrot.lane.b32.xlu1 %v3837_v35, %s5878_s11  ;;  %3660 = vrot.lane.b32.xlu0 %v3640_v36, %s5874_s5  ;;  %v3649_v62 = vpop.permute.xlu0 %3648 }
 0x7c5   : > { %v3662_v29 = vsel %vm7818_vm6, %v3649_v62, %v3651_v31  ;;  %vm7830_vm6 = vmmov %vm7819_vm12 }
 0x7c6   : > { %3674 = vst [vmem:[#allocation3 + $0x2d0] sm:$0xf0] %v3662_v29  ;;  %v3504_v28 = vpop.permute.xlu1 %3503 }
 0x7c8   : > { %3991 = vperm.xlu1 %5730, %v3988_v41   ;;  %3759 = vrot.lane.b32.xlu0 %v3739_v44, %s5876_s9  ;;  %v3748_v46 = vpop.permute.xlu0 %3747 }
 0x7ca   : > { %v3603_v2 = vpop.permute.xlu1 %3602 }
 0x7cc   : > { %3515 = vrot.lane.b32.xlu0 %v3502_v52, %s5871_s23  ;;  %v3847_v42 = vpop.permute.xlu0 %3846 }
 0x7ce   : > { %v3750_v5 = vpop.permute.xlu1 %3749 }
 0x7cf   : > { %v3761_v24 = vsel %vm7819_vm12, %v3748_v46, %v3750_v5  ;;  %vm7831_vm12 = vmmov %vm7826_vm13 }
 0x7d0   : > { %3773 = vst [vmem:[#allocation3 + $0x300] sm:$0xf0] %v3761_v24  ;;  %3614 = vrot.lane.b32.xlu0 %v3601_v63, %s5873_s4  ;;  %v3453_v12 = vpop.permute.xlu0 %3452 }
 0x7d1   : > { %v3464_v54 = vsel %vm7820_vm2, %v3451_v60, %v3453_v12  ;;  %vm7832_vm2 = vmmov %vm7821_vm11  ;;  %v3953_v60 = vld [vmem:[#allocation3 + $0x248] sm:$0xff] }
 0x7d2   : > { %3476 = vst [vmem:[#allocation3 + $0x270] sm:$0xf0] %v3464_v54  ;;  %v3849_v14 = vpop.permute.xlu1 %3848 }
 0x7d3   : > { %v3860_v58 = vsel %vm7821_vm11, %v3847_v42, %v3849_v14  ;;  %vm7833_vm11 = vmmov %vm7828_vm5 }
 0x7d4   : > { %3872 = vst [vmem:[#allocation3 + $0x330] sm:$0xf0] %v3860_v58  ;;  %3713 = vrot.lane.b32.xlu0 %v3700_v38, %s5875_s8 }
 0x7d6   : > { %v3702_v10 = vpop.permute.xlu1 %3701 }
 0x7d8   : > { %3812 = vrot.lane.b32.xlu0 %v3799_v37, %s5877_s10 }
 0x7d9   : > { %v3958_v1 = vld [vmem:[#allocation3 + $0x270] sm:$0xff] }
 0x7da   : > { %v3801_v22 = vpop.permute.xlu1 %3800  ;;  %v7170_v34 = vpack.c.bf16 %v3958_v1, %v3952_v56  ;;  %v3884_v1 = vld [vmem:[#allocation3 + $0x20] sm:$0xff]  ;;  %v3902_v56 = vld [vmem:[#allocation3 + $0xb0] sm:$0xff] }
 0x7dc   : > { %3858 = vrot.lane.b32.xlu0 %v3838_v39, %s5878_s11 }
 0x7de   : > { %v3506_v48 = vpop.permute.xlu1 %3505 }
 0x7df   : > { %v3517_v30 = vsel %vm7822_vm7, %v3504_v28, %v3506_v48 }
 0x7e0   : > { %3529 = vst [vmem:[#allocation3 + $0x2a0] sm:$0xf] %v3517_v30 }
 0x7e2   : > { %v3605_v49 = vpop.permute.xlu1 %3604 }
 0x7e3   : > { %v3616_v40 = vsel %vm7823_vm8, %v3603_v2, %v3605_v49  ;;  %vm7834_vm8 = vmmov %vm7830_vm6 }
 0x7e4   : > { %3628 = vst [vmem:[#allocation3 + $0x2d0] sm:$0xf] %v3616_v40  ;;  %v3878_v40 = vld [vmem:[#allocation7 + $0x10] sm:$0xf0] }
 0x7e6   : > { %v3704_v25 = vpop.permute.xlu1 %3703 }
 0x7e7   : > { %v3715_v15 = vsel %vm7824_vm14, %v3702_v10, %v3704_v25  ;;  %vm7835_vm14 = vcmask 793600   ;;  %v3964_v43 = vld [vmem:[#allocation3 + $0x2a0] sm:$0xff] }
 0x7e8   : > { %3727 = vst [vmem:[#allocation3 + $0x300] sm:$0xf] %v3715_v15 }
 0x7ea   : > { %v3803_v51 = vpop.permute.xlu1 %3802  ;;  %v3554_v8 = vpop.permute.xlu0 %3553 }
 0x7eb   : > { %v3814_v7 = vsel %vm7825_vm1, %v3801_v22, %v3803_v51  ;;  %v3564_v16 = vsel %vm7826_vm13, %v3552_v32, %v3554_v8  ;;  %vm7836_vm1 = vcmask 777216   ;;  %v3970_v61 = vld [vmem:[#allocation3 + $0x2d0] sm:$0xff]  ;;  %vm7837_vm13 = vcmask 637952   ;;  %v3891_v22 = vld [vmem:[#allocation3 + $0x58] sm:$0xff] }
 0x7ec   : > { %3826 = vst [vmem:[#allocation3 + $0x330] sm:$0xf] %v3814_v7  ;;  %3576 = vst [vmem:[#allocation3 + $0x2a8] sm:$0xf0] %v3564_v16 }
 0x7ee   : > { %v3455_v9 = vpop.permute.xlu1 %3454  ;;  %v3653_v18 = vpop.permute.xlu0 %3652 }
 0x7ef   : > { %v3465_v33 = vsel %vm7827_vm3, %v3453_v12, %v3455_v9  ;;  %v3663_v19 = vsel %vm7828_vm5, %v3651_v31, %v3653_v18  ;;  %v7192_v12 = vpack.c.bf16 %v3970_v61, %v3964_v43  ;;  %vm7838_vm3 = vmmov %vm7822_vm7  ;;  %v3976_v15 = vld [vmem:[#allocation3 + $0x300] sm:$0xff] }
 0x7f0   : > { %3477 = vst [vmem:[#allocation3 + $0x278] sm:$0xf0] %v3465_v33  ;;  %3675 = vst [vmem:[#allocation3 + $0x2d8] sm:$0xf0] %v3663_v19  ;;  %v3890_v33 = vld [vmem:[#allocation3 + $0x50] sm:$0xff] }
 0x7f1   : > { %vm7839_vm5 = vmmov %vm7838_vm3 }
 0x7f2   : > { %v7155_v50 = vpop.permute.xlu1 %3456  ;;  %v3752_v21 = vpop.permute.xlu0 %3751 }
 0x7f3   : > { %v3466_v3 = vsel %vm7829_vm15, %v3455_v9, %v7155_v50  ;;  %v3762_v57 = vsel %vm7830_vm6, %v3750_v5, %v3752_v21  ;;  %v3982_v37 = vld [vmem:[#allocation3 + $0x330] sm:$0xff]  ;;  %vm7840_vm15 = vmmov %vm7835_vm14 }
 0x7f4   : > { %3478 = vst [vmem:[#allocation3 + $0x280] sm:$0xf0] %v3466_v3  ;;  %3774 = vst [vmem:[#allocation3 + $0x308] sm:$0xf0] %v3762_v57  ;;  %v3903_v57 = vld [vmem:[#allocation3 + $0xb8] sm:$0xff] }
 0x7f5   : > { %vm7841_vm6 = vmmov %vm7835_vm14 }
 0x7f6   : > { %v7160_v55 = vpop.permute.xlu1 %3555  ;;  %v7162_v26 = vpop.permute.xlu0 %3850 }
 0x7f7   : > { %v3565_v13 = vsel %vm7831_vm12, %v3554_v8, %v7160_v55  ;;  %v3861_v23 = vsel %vm7832_vm2, %v3849_v14, %v7162_v26  ;;  %v3959_v32 = vld [vmem:[#allocation3 + $0x278] sm:$0xff]  ;;  %v3885_v8 = vld [vmem:[#allocation3 + $0x28] sm:$0xff]  ;;  %vm7842_vm12 = vmmov %vm7832_vm2 }
 0x7f8   : > { %3577 = vst [vmem:[#allocation3 + $0x2b0] sm:$0xf0] %v3565_v13  ;;  %3873 = vst [vmem:[#allocation3 + $0x338] sm:$0xf0] %v3861_v23  ;;  %v7168_v0 = vpack.c.bf16 %v3959_v32, %v3953_v60  ;;  %v5486_v9 = vpack.c.bf16 %v3891_v22, %v3885_v8  ;;  %v5488_v13 = vpack.c.bf16 %v3890_v33, %v3884_v1  ;;  %v3897_v23 = vld [vmem:[#allocation3 + $0x88] sm:$0xff]  ;;  %v3954_v1 = vld [vmem:[#allocation3 + $0x250] sm:$0xff] }
 0x7f9   : > { %vm7843_vm2 = vmmov %vm7836_vm1  ;;  %v5490_v32 = vpack.c.bf16 %v3903_v57, %v3897_v23 }
 0x7fa   : > { %v7172_v27 = vpop.permute.xlu1 %3654  ;;  %5439 = vmatprep.subr.bf16.mxu1 %v7168_v0  ;;  %v3508_v31 = vpop.permute.xlu0 %3507 }
 0x7fb   : > { %v3664_v35 = vsel %vm7833_vm11, %v3653_v18, %v7172_v27  ;;  %v3518_v36 = vsel %vm7822_vm7, %v3506_v48, %v3508_v31  ;;  %5441 = vmatpush1.bf16.msra.mxu1 %v7170_v34  ;;  %v7213_v18 = vrot.slane %v3878_v40, 4  ;;  %vm7844_vm11 = vmmov %vm7836_vm1 }
 0x7fc   : > { %3676 = vst [vmem:[#allocation3 + $0x2e0] sm:$0xf0] %v3664_v35  ;;  %3530 = vst [vmem:[#allocation3 + $0x2a8] sm:$0xf] %v3518_v36  ;;  %v3915_v36 = vld [vmem:[#allocation3 + $0x118] sm:$0xff] }
 0x7fd   : > { %vm7845_vm7 = vmmov %vm7837_vm13 }
 0x7fe   : > { %v7179_v62 = vpop.permute.xlu1 %3753  ;;  %v3607_v29 = vpop.permute.xlu0 %3606 }
 0x7ff   : > { %v3763_v41 = vsel %vm7834_vm8, %v3752_v21, %v7179_v62  ;;  %v3617_v28 = vsel %vm7835_vm14, %v3605_v49, %v3607_v29  ;;  %vm7846_vm8 = vmmov %vm7845_vm7  ;;  %vm7847_vm14 = vcmask 941056  }
 0x800   : > { %3775 = vst [vmem:[#allocation3 + $0x310] sm:$0xf0] %v3763_v41  ;;  %3629 = vst [vmem:[#allocation3 + $0x2d8] sm:$0xf] %v3617_v28  ;;  %v3909_v28 = vld [vmem:[#allocation3 + $0xe8] sm:$0xff] }
 0x801   : > { %v5494_v61 = vpack.c.bf16 %v3915_v36, %v3909_v28  ;;  %v3944_v28 = vld [vmem:[#allocation3 + $0x200] sm:$0xff] }
 0x802   : > { %v7184_v44 = vpop.permute.xlu1 %3511  ;;  %v3706_v47 = vpop.permute.xlu0 %3705 }
 0x803   : > { %v3716_v46 = vsel %vm7836_vm1, %v3704_v25, %v3706_v47  ;;  %v3965_v5 = vld [vmem:[#allocation3 + $0x2a8] sm:$0xff]  ;;  %vm7848_vm1 = vmmov %vm7847_vm14 }
 0x804   : > { %3728 = vst [vmem:[#allocation3 + $0x308] sm:$0xf] %v3716_v46 }
 0x806   : > { %v7187_v2 = vpop.permute.xlu1 %3610  ;;  %v3805_v52 = vpop.permute.xlu0 %3804 }
 0x807   : > { %v3815_v42 = vsel %vm7837_vm13, %v3803_v51, %v3805_v52  ;;  %v3971_v63 = vld [vmem:[#allocation3 + $0x2d8] sm:$0xff]  ;;  %v7208_v51 = vpack.c.bf16 %v3982_v37, %v3976_v15  ;;  %v3926_v37 = vld [vmem:[#allocation3 + $0x170] sm:$0xff] }
 0x808   : > { %3827 = vst [vmem:[#allocation3 + $0x338] sm:$0xf] %v3815_v42  ;;  %v7190_v24 = vpack.c.bf16 %v3971_v63, %v3965_v5  ;;  %v3914_v42 = vld [vmem:[#allocation3 + $0x110] sm:$0xff]  ;;  %v3927_v63 = vld [vmem:[#allocation3 + $0x178] sm:$0xff] }
 0x80a   : > { %v7194_v54 = vpop.permute.xlu1 %3709  ;;  %5443 = vmatprep.subr.bf16.mxu1 %v7190_v24  ;;  %v3510_v14 = vpop.permute.xlu0 %3509 }
 0x80b   : > { %v3519_v38 = vsel %vm7838_vm3, %v3508_v31, %v3510_v14  ;;  %v3520_v58 = vsel %vm7839_vm5, %v3510_v14, %v7184_v44  ;;  %5445 = vmatpush1.bf16.msra.mxu1 %v7192_v12  ;;  %v3977_v30 = vld [vmem:[#allocation3 + $0x308] sm:$0xff]  ;;  %vm7851_vm3 = vcmask 785408  }
 0x80c   : > { %3531 = vst [vmem:[#allocation3 + $0x2b0] sm:$0xf] %v3519_v38  ;;  %3532 = vst [vmem:[#allocation3 + $0x2b8] sm:$0xf] %v3520_v58  ;;  %v3921_v14 = vld [vmem:[#allocation3 + $0x148] sm:$0xff] }
 0x80d   : > { %vm7852_vm5 = vmmov %vm7851_vm3 }
 0x80e   : > { %v7201_v17 = vpop.permute.xlu1 %3808  ;;  %v3609_v10 = vpop.permute.xlu0 %3608 }
 0x80f   : > { %v3618_v39 = vsel %vm7840_vm15, %v3607_v29, %v3609_v10  ;;  %v3619_v48 = vsel %vm7841_vm6, %v3609_v10, %v7187_v2  ;;  %v3983_v49 = vld [vmem:[#allocation3 + $0x338] sm:$0xff]  ;;  %v3896_v29 = vld [vmem:[#allocation3 + $0x80] sm:$0xff]  ;;  %v5498_v10 = vpack.c.bf16 %v3927_v63, %v3921_v14  ;;  %vm7853_vm15 = vcmask 932864  }
 0x810   : > { %3630 = vst [vmem:[#allocation3 + $0x2e0] sm:$0xf] %v3618_v39  ;;  %3631 = vst [vmem:[#allocation3 + $0x2e8] sm:$0xf] %v3619_v48  ;;  %v7206_v25 = vpack.c.bf16 %v3983_v49, %v3977_v30  ;;  %v5492_v41 = vpack.c.bf16 %v3902_v56, %v3896_v29  ;;  %v3939_v39 = vld [vmem:[#allocation3 + $0x1d8] sm:$0xff]  ;;  %v3920_v48 = vld [vmem:[#allocation3 + $0x140] sm:$0xff] }
 0x811   : > { %v5500_v30 = vpack.c.bf16 %v3926_v37, %v3920_v48  ;;  %v3933_v49 = vld [vmem:[#allocation3 + $0x1a8] sm:$0xff]  ;;  %vm7854_vm6 = vcmask 646144  }
 0x812   : > { %v7210_v7 = vpop.permute.xlu1 %3852  ;;  %5447 = vmatprep.subr.bf16.mxu1 %v7206_v25  ;;  %v3708_v16 = vpop.permute.xlu0 %3707  ;;  %v5502_v8 = vpack.c.bf16 %v3939_v39, %v3933_v49  ;;  %v4727_v49 = vld [vmem:[#allocation3 + $0x38] sm:$0xff] }
 0x813   : > { %v3862_v19 = vsel %vm7842_vm12, %v7162_v26, %v7210_v7  ;;  %v3717_v21 = vsel %vm7843_vm2, %v3706_v47, %v3708_v16  ;;  %v3718_v3 = vsel %vm7844_vm11, %v3708_v16, %v7194_v54  ;;  %5449 = vmatpush1.bf16.msra.mxu1 %v7208_v51  ;;  %v3960_v16 = vld [vmem:[#allocation3 + $0x280] sm:$0xff]  ;;  %vm7855_vm12 = vmmov %vm7854_vm6  ;;  %vm7856_vm2 = vcmask 793600  }
 0x814   : > { %3874 = vst [vmem:[#allocation3 + $0x340] sm:$0xf0] %v3862_v19  ;;  %3729 = vst [vmem:[#allocation3 + $0x310] sm:$0xf] %v3717_v21  ;;  %5487 = vmatprep.subr.bf16.mxu1 %v5486_v9  ;;  %v3938_v9 = vld [vmem:[#allocation3 + $0x1d0] sm:$0xff]  ;;  %v3955_v19 = vld [vmem:[#allocation3 + $0x258] sm:$0xff]  ;;  %v7250_v23 = vpack.c.bf16 %v3960_v16, %v3954_v1 }
 0x815   : > { %3730 = vst [vmem:[#allocation3 + $0x318] sm:$0xf] %v3718_v3  ;;  %v3951_v3 = vld [vmem:[#allocation3 + $0x238] sm:$0xff]  ;;  %vm7857_vm11 = vcmask 629760   ;;  %v4721_v16 = vld [vmem:[#allocation3 + $0x8] sm:$0xff] }
 0x816   : > { %v7222_v60 = vpop.permute.xlu1 %3460  ;;  %4067 = vmatmul.mubr.f32.vlgmr.msra.gmra.mrb[10].mxu1 %v7213_v18  ;;  %v3807_v26 = vpop.permute.xlu0 %3806 }
 0x817   : > { %v3816_v31 = vsel %vm7845_vm7, %v3805_v52, %v3807_v26  ;;  %v3817_v35 = vsel %vm7846_vm8, %v3807_v26, %v7201_v17  ;;  %5489 = vmatpush1.bf16.msra.mxu1 %v5488_v13  ;;  %5239 = vmatprep.mubr.msk.f32.mxu1 %vm3999_vm9, %v7104_v59  ;;  %v3908_v59 = vld [vmem:[#allocation3 + $0xe0] sm:$0xff]  ;;  %vm7849_vm9 = vcmask 924672   ;;  %vm7858_vm7 = vcmask 777216   ;;  %vm7859_vm8 = vmmov %vm7848_vm1 }
 0x818   : > { %3828 = vst [vmem:[#allocation3 + $0x340] sm:$0xf] %v3816_v31  ;;  %3829 = vst [vmem:[#allocation3 + $0x348] sm:$0xf] %v3817_v35  ;;  %5491 = vmatprep.subr.bf16.mxu1 %v5490_v32  ;;  %v5496_v43 = vpack.c.bf16 %v3914_v42, %v3908_v59  ;;  %v3932_v13 = vld [vmem:[#allocation3 + $0x1a0] sm:$0xff]  ;;  %v3945_v32 = vld [vmem:[#allocation3 + $0x208] sm:$0xff] }
 0x819   : > { %vm7850_vm13 = vmmov %vm7849_vm9  ;;  %v5504_v26 = vpack.c.bf16 %v3938_v9, %v3932_v13  ;;  %v5506_v31 = vpack.c.bf16 %v3951_v3, %v3945_v32  ;;  %v3950_v35 = vld [vmem:[#allocation3 + $0x230] sm:$0xff]  ;;  %v3957_v3 = vld [vmem:[#allocation3 + $0x268] sm:$0xff] }
 0x81a   : > { %v7230_v47 = vpop.permute.xlu1 %3559  ;;  %v3459_v46 = vpop.permute.xlu0 %3458  ;;  %v4739_v13 = vld [vmem:[#allocation3 + $0x98] sm:$0xff]  ;;  %v3956_v32 = vld [vmem:[#allocation3 + $0x260] sm:$0xff] }
 0x81b   : > { %v3467_v52 = vsel %vm7847_vm14, %v7155_v50, %v3459_v46  ;;  %v3468_v5 = vsel %vm7848_vm1, %v3459_v46, %v7222_v60  ;;  %5493 = vmatpush1.bf16.msra.mxu1 %v5492_v41  ;;  %v5508_v46 = vpack.c.bf16 %v3950_v35, %v3944_v28  ;;  %vm7860_vm14 = vcmask 637952   ;;  %vm7861_vm1 = vmmov %vm7849_vm9 }
 0x81c   : > { %3479 = vst [vmem:[#allocation3 + $0x288] sm:$0xf0] %v3467_v52  ;;  %3480 = vst [vmem:[#allocation3 + $0x290] sm:$0xf0] %v3468_v5  ;;  %5495 = vmatprep.subr.bf16.mxu1 %v5494_v61  ;;  %v3972_v52 = vld [vmem:[#allocation3 + $0x2e0] sm:$0xff] }
 0x81e   : > { %v7236_v38 = vpop.permute.xlu1 %3658  ;;  %v3558_v58 = vpop.permute.xlu0 %3557 }
 0x81f   : > { %v3566_v22 = vsel %vm7849_vm9, %v7160_v55, %v3558_v58  ;;  %v3567_v50 = vsel %vm7850_vm13, %v3558_v58, %v7230_v47  ;;  %5497 = vmatpush1.bf16.msra.mxu1 %v5496_v43  ;;  %v3966_v43 = vld [vmem:[#allocation3 + $0x2b0] sm:$0xff]  ;;  %vm7862_vm9 = vmmov %vm7857_vm11 }
 0x820   : > { %3578 = vst [vmem:[#allocation3 + $0x2b8] sm:$0xf0] %v3566_v22  ;;  %3579 = vst [vmem:[#allocation3 + $0x2c0] sm:$0xf0] %v3567_v50  ;;  %5499 = vmatprep.subr.bf16.mxu1 %v5498_v10  ;;  %v7272_v14 = vpack.c.bf16 %v3972_v52, %v3966_v43  ;;  %v3984_v50 = vld [vmem:[#allocation3 + $0x340] sm:$0xff] }
 0x821   : > { %vm7863_vm13 = vmmov %vm7851_vm3 }
 0x822   : > { %v7242_v40 = vpop.permute.xlu1 %3757  ;;  %v3657_v15 = vpop.permute.xlu0 %3656 }
 0x823   : > { %v3665_v55 = vsel %vm7851_vm3, %v7172_v27, %v3657_v15  ;;  %v3666_v33 = vsel %vm7852_vm5, %v3657_v15, %v7236_v38  ;;  %5501 = vmatpush1.bf16.msra.mxu1 %v5500_v30  ;;  %v3961_v21 = vld [vmem:[#allocation3 + $0x288] sm:$0xff]  ;;  %v3978_v15 = vld [vmem:[#allocation3 + $0x310] sm:$0xff]  ;;  %vm7864_vm3 = vmmov %vm7854_vm6 }
 0x824   : > { %3677 = vst [vmem:[#allocation3 + $0x2e8] sm:$0xf0] %v3665_v55  ;;  %3678 = vst [vmem:[#allocation3 + $0x2f0] sm:$0xf0] %v3666_v33  ;;  %5503 = vmatprep.subr.bf16.mxu1 %v5502_v8  ;;  %v7248_v57 = vpack.c.bf16 %v3961_v21, %v3955_v19  ;;  %v7292_v8 = vpack.c.bf16 %v3984_v50, %v3978_v15  ;;  %v3962_v33 = vld [vmem:[#allocation3 + $0x290] sm:$0xff] }
 0x825   : > { %v4726_v19 = vld [vmem:[#allocation3 + $0x30] sm:$0xff]  ;;  %vm7865_vm5 = vmmov %vm7853_vm15 }
 0x826   : > { %v7252_v56 = vpop.permute.xlu1 %3513  ;;  %5475 = vmatprep.subr.bf16.mxu0 %v7248_v57  ;;  %v3756_v27 = vpop.permute.xlu0 %3755 }
 0x827   : > { %v3521_v36 = vsel %vm7853_vm15, %v7184_v44, %v7252_v56  ;;  %v3764_v29 = vsel %vm7854_vm6, %v7179_v62, %v3756_v27  ;;  %v3765_v41 = vsel %vm7855_vm12, %v3756_v27, %v7242_v40  ;;  %5477 = vmatpush1.bf16.msra.mxu0 %v7250_v23  ;;  %5505 = vmatpush1.bf16.msra.mxu1 %v5504_v26  ;;  %v3967_v5 = vld [vmem:[#allocation3 + $0x2b8] sm:$0xff]  ;;  %v4720_v27 = vld [vmem:[#allocation3] sm:$0xff]  ;;  %vm7866_vm15 = vmmov %vm7856_vm2 }
 0x828   : > { %3533 = vst [vmem:[#allocation3 + $0x2c0] sm:$0xf] %v3521_v36  ;;  %3776 = vst [vmem:[#allocation3 + $0x318] sm:$0xf0] %v3764_v29  ;;  %5507 = vmatprep.subr.bf16.mxu1 %v5506_v31  ;;  %v5512_v31 = vpack.c.bf16 %v3962_v33, %v3956_v32  ;;  %v5524_v35 = vpack.c.bf16 %v4726_v19, %v4720_v27  ;;  %v4733_v36 = vld [vmem:[#allocation3 + $0x68] sm:$0xff]  ;;  %v4787_v33 = vld [vmem:[#allocation3 + $0x218] sm:$0xff] }
 0x829   : > { %3777 = vst [vmem:[#allocation3 + $0x320] sm:$0xf0] %v3765_v41  ;;  %v5526_v41 = vpack.c.bf16 %v4739_v13, %v4733_v36  ;;  %vm7867_vm6 = vmmov %vm7858_vm7  ;;  %v4768_v19 = vld [vmem:[#allocation3 + $0x180] sm:$0xff]  ;;  %v4786_v13 = vld [vmem:[#allocation3 + $0x210] sm:$0xff] }
 0x82a   : > { %v7263_v61 = vpop.permute.xlu1 %3612  ;;  %v3855_v42 = vpop.permute.xlu0 %3854  ;;  %vm7868_vm12 = vmmov %vm7860_vm14 }
 0x82b   : > { %v3620_v62 = vsel %vm7856_vm2, %v7187_v2, %v7263_v61  ;;  %v3863_v44 = vsel %vm7857_vm11, %v7210_v7, %v3855_v42  ;;  %5509 = vmatpush1.bf16.msra.mxu1 %v5508_v46  ;;  %v3973_v63 = vld [vmem:[#allocation3 + $0x2e8] sm:$0xff]  ;;  %v4751_v46 = vld [vmem:[#allocation3 + $0xf8] sm:$0xff]  ;;  %vm7869_vm2 = vmmov %vm7862_vm9 }
 0x82c   : > { %3632 = vst [vmem:[#allocation3 + $0x2f0] sm:$0xf] %v3620_v62  ;;  %3875 = vst [vmem:[#allocation3 + $0x348] sm:$0xf0] %v3863_v44  ;;  %v7270_v59 = vpack.c.bf16 %v3973_v63, %v3967_v5  ;;  %v4745_v62 = vld [vmem:[#allocation3 + $0xc8] sm:$0xff]  ;;  %v4750_v63 = vld [vmem:[#allocation3 + $0xf0] sm:$0xff] }
 0x82d   : > { %v5530_v5 = vpack.c.bf16 %v4751_v46, %v4745_v62 }
 0x82e   : > { %v7274_v58 = vpop.permute.xlu1 %3711  ;;  %5479 = vmatprep.subr.bf16.mxu0 %v7270_v59  ;;  %v3463_v10 = vpop.permute.xlu0 %3462 }
 0x82f   : > { %v3719_v2 = vsel %vm7858_vm7, %v7194_v54, %v7274_v58  ;;  %v3469_v7 = vsel %vm7859_vm8, %v7222_v60, %v3463_v10  ;;  %5481 = vmatpush1.bf16.msra.mxu0 %v7272_v14  ;;  %v3979_v30 = vld [vmem:[#allocation3 + $0x318] sm:$0xff]  ;;  %vm7870_vm8 = vcmp.eq.s32.totalorder %v6422_v45, 1 }
 0x830   : > { %3731 = vst [vmem:[#allocation3 + $0x320] sm:$0xf] %v3719_v2  ;;  %3481 = vst [vmem:[#allocation3 + $0x298] sm:$0xf0] %v3469_v7  ;;  %v4763_v10 = vld [vmem:[#allocation3 + $0x158] sm:$0xff]  ;;  %v4744_v2 = vld [vmem:[#allocation3 + $0xc0] sm:$0xff] }
 0x831   : > { %v4757_v7 = vld [vmem:[#allocation3 + $0x128] sm:$0xff] }
 0x832   : > { %v7283_v37 = vpop.permute.xlu1 %3810  ;;  %v3562_v22 = vpop.permute.xlu0 %3561  ;;  %v5534_v50 = vpack.c.bf16 %v4763_v10, %v4757_v7  ;;  %v4740_v10 = vld [vmem:[#allocation3 + $0xa0] sm:$0xff]  ;;  %v4747_v7 = vld [vmem:[#allocation3 + $0xd8] sm:$0xff] }
 0x833   : > { %v3818_v39 = vsel %vm7860_vm14, %v7201_v17, %v7283_v37  ;;  %v3568_v48 = vsel %vm7861_vm1, %v7230_v47, %v3562_v22  ;;  %v3985_v54 = vld [vmem:[#allocation3 + $0x348] sm:$0xff]  ;;  %v5522_v17 = vpack.c.bf16 %v4727_v49, %v4721_v16  ;;  %vm7871_vm14 = vcmp.eq.s32.totalorder %v6434_v53, 1 }
 0x834   : > { %3830 = vst [vmem:[#allocation3 + $0x350] sm:$0xf] %v3818_v39  ;;  %3580 = vst [vmem:[#allocation3 + $0x2c8] sm:$0xf0] %v3568_v48  ;;  %v7290_v60 = vpack.c.bf16 %v3985_v54, %v3979_v30  ;;  %v4762_v39 = vld [vmem:[#allocation3 + $0x150] sm:$0xff]  ;;  %v4775_v30 = vld [vmem:[#allocation3 + $0x1b8] sm:$0xff] }
 0x835   : > { %v4756_v54 = vld [vmem:[#allocation3 + $0x120] sm:$0xff] }
 0x836   : > { %v7294_v9 = vpop.permute.xlu1 %3856  ;;  %5483 = vmatprep.subr.bf16.mxu0 %v7290_v60  ;;  %v3661_v55 = vpop.permute.xlu0 %3660  ;;  %v5536_v49 = vpack.c.bf16 %v4762_v39, %v4756_v54  ;;  %v4765_v39 = vld [vmem:[#allocation3 + $0x168] sm:$0xff] }
 0x837   : > { %v3864_v47 = vsel %vm7862_vm9, %v3855_v42, %v7294_v9  ;;  %v3667_v21 = vsel %vm7863_vm13, %v7236_v38, %v3661_v55  ;;  %5485 = vmatpush1.bf16.msra.mxu0 %v7292_v8  ;;  %v3963_v1 = vld [vmem:[#allocation3 + $0x298] sm:$0xff]  ;;  %v4738_v38 = vld [vmem:[#allocation3 + $0x90] sm:$0xff]  ;;  %v4732_v42 = vld [vmem:[#allocation3 + $0x60] sm:$0xff]  ;;  %vm7872_vm13 = vcmp.eq.s32.totalorder %v6484_v6, 1 }
 0x838   : > { %3876 = vst [vmem:[#allocation3 + $0x350] sm:$0xf0] %v3864_v47  ;;  %3679 = vst [vmem:[#allocation3 + $0x2f8] sm:$0xf0] %v3667_v21  ;;  %5523 = vmatprep.subr.bf16.mxu0 %v5522_v17  ;;  %v5510_v26 = vpack.c.bf16 %v3963_v1, %v3957_v3  ;;  %v5528_v52 = vpack.c.bf16 %v4738_v38, %v4732_v42  ;;  %v4774_v55 = vld [vmem:[#allocation3 + $0x1b0] sm:$0xff]  ;;  %v4729_v42 = vld [vmem:[#allocation3 + $0x48] sm:$0xff] }
 0x839   : > { %v5540_v47 = vpack.c.bf16 %v4774_v55, %v4768_v19  ;;  %v3974_v1 = vld [vmem:[#allocation3 + $0x2f0] sm:$0xff]  ;;  %v3980_v62 = vld [vmem:[#allocation3 + $0x320] sm:$0xff] }
 0x83a   : > { %4138 = vmatmul.mubr.f32.vlgmr.msra.gmra.mrb[8].mxu0 %v7213_v18  ;;  %5511 = vmatprep.subr.bf16.mxu1 %v5510_v26  ;;  %v3760_v29 = vpop.permute.xlu0 %3759  ;;  %v4770_v19 = vld [vmem:[#allocation3 + $0x190] sm:$0xff] }
 0x83b   : > { %v3766_v28 = vsel %vm7864_vm3, %v7242_v40, %v3760_v29  ;;  %5513 = vmatpush1.bf16.msra.mxu1 %v5512_v31  ;;  %5525 = vmatpush1.bf16.msra.mxu0 %v5524_v35  ;;  %v5532_v40 = vpack.c.bf16 %v4750_v63, %v4744_v2  ;;  %v3968_v31 = vld [vmem:[#allocation3 + $0x2c0] sm:$0xff]  ;;  %v4734_v2 = vld [vmem:[#allocation3 + $0x70] sm:$0xff] }
 0x83c   : > { %3778 = vst [vmem:[#allocation3 + $0x328] sm:$0xf0] %v3766_v28  ;;  %5527 = vmatprep.subr.bf16.mxu0 %v5526_v41  ;;  %v4780_v35 = vld [vmem:[#allocation3 + $0x1e0] sm:$0xff]  ;;  %v5516_v36 = vpack.c.bf16 %v3974_v1, %v3968_v31  ;;  %v4782_v1 = vld [vmem:[#allocation3 + $0x1f0] sm:$0xff] }
 0x83d   : > { %v5544_v29 = vpack.c.bf16 %v4786_v13, %v4780_v35  ;;  %v4728_v63 = vld [vmem:[#allocation3 + $0x40] sm:$0xff] }
 0x83e   : > { %v3516_v44 = vpop.permute.xlu0 %3515 }
 0x83f   : > { %v3522_v43 = vsel %vm7865_vm5, %v7252_v56, %v3516_v44  ;;  %5529 = vmatpush1.bf16.msra.mxu0 %v5528_v52  ;;  %v4769_v56 = vld [vmem:[#allocation3 + $0x188] sm:$0xff]  ;;  %v4723_v44 = vld [vmem:[#allocation3 + $0x18] sm:$0xff] }
 0x840   : > { %3534 = vst [vmem:[#allocation3 + $0x2c8] sm:$0xf] %v3522_v43  ;;  %5531 = vmatprep.subr.bf16.mxu0 %v5530_v5  ;;  %v5538_v16 = vpack.c.bf16 %v4775_v30, %v4769_v56  ;;  %v5566_v5 = vpack.c.bf16 %v4729_v42, %v4723_v44  ;;  %v4759_v30 = vld [vmem:[#allocation3 + $0x138] sm:$0xff]  ;;  %v4758_v56 = vld [vmem:[#allocation3 + $0x130] sm:$0xff] }
 0x841   : > { %v5578_v54 = vpack.c.bf16 %v4765_v39, %v4759_v30 }
 0x842   : > { %v3615_v22 = vpop.permute.xlu0 %3614 }
 0x843   : > { %v3621_v48 = vsel %vm7866_vm15, %v7263_v61, %v3615_v22  ;;  %5533 = vmatpush1.bf16.msra.mxu0 %v5532_v40  ;;  %v4781_v61 = vld [vmem:[#allocation3 + $0x1e8] sm:$0xff]  ;;  %v5572_v40 = vpack.c.bf16 %v4740_v10, %v4734_v2  ;;  %vm7874_vm15 = vcmask 261120  }
 0x844   : > { %3633 = vst [vmem:[#allocation3 + $0x2f8] sm:$0xf] %v3621_v48  ;;  %5535 = vmatprep.subr.bf16.mxu0 %v5534_v50  ;;  %v5542_v3 = vpack.c.bf16 %v4787_v33, %v4781_v61  ;;  %v4752_v50 = vld [vmem:[#allocation3 + $0x100] sm:$0xff]  ;;  %v4789_v33 = vld [vmem:[#allocation3 + $0x228] sm:$0xff]  ;;  %v4783_v61 = vld [vmem:[#allocation3 + $0x1f8] sm:$0xff] }
 0x846   : > { %v3714_v15 = vpop.permute.xlu0 %3713 }
 0x847   : > { %v3720_v17 = vsel %vm7867_vm6, %v7274_v58, %v3714_v15  ;;  %5537 = vmatpush1.bf16.msra.mxu0 %v5536_v49  ;;  %v3969_v32 = vld [vmem:[#allocation3 + $0x2c8] sm:$0xff]  ;;  %v4764_v49 = vld [vmem:[#allocation3 + $0x160] sm:$0xff] }
 0x848   : > { %3732 = vst [vmem:[#allocation3 + $0x328] sm:$0xf] %v3720_v17  ;;  %5539 = vmatprep.subr.bf16.mxu0 %v5538_v16  ;;  %v5580_v15 = vpack.c.bf16 %v4764_v49, %v4758_v56  ;;  %v4771_v16 = vld [vmem:[#allocation3 + $0x198] sm:$0xff]  ;;  %v4776_v17 = vld [vmem:[#allocation3 + $0x1c0] sm:$0xff] }
 0x84a   : > { %v3813_v21 = vpop.permute.xlu0 %3812 }
 0x84b   : > { %v3819_v26 = vsel %vm7868_vm12, %v7283_v37, %v3813_v21  ;;  %5541 = vmatpush1.bf16.msra.mxu0 %v5540_v47  ;;  %v3975_v27 = vld [vmem:[#allocation3 + $0x2f8] sm:$0xff]  ;;  %v3986_v37 = vld [vmem:[#allocation3 + $0x350] sm:$0xff]  ;;  %v5584_v47 = vpack.c.bf16 %v4776_v17, %v4770_v19  ;;  %v5586_v21 = vpack.c.bf16 %v4789_v33, %v4783_v61 }
 0x84c   : > { %3831 = vst [vmem:[#allocation3 + $0x358] sm:$0xf] %v3819_v26  ;;  %5543 = vmatprep.subr.bf16.mxu0 %v5542_v3  ;;  %v5514_v58 = vpack.c.bf16 %v3975_v27, %v3969_v32  ;;  %v4788_v3 = vld [vmem:[#allocation3 + $0x220] sm:$0xff]  ;;  %v3992_v26 = vpop.permute.xlu1 %3991 }
 0x84d   : > { %v5588_v13 = vpack.c.bf16 %v4788_v3, %v4782_v1 }
 0x84e   : > { %5515 = vmatprep.subr.bf16.mxu1 %v5514_v58  ;;  %v3859_v41 = vpop.permute.xlu0 %3858 }
 0x84f   : > { %v3865_v38 = vsel %vm7869_vm2, %v7294_v9, %v3859_v41  ;;  %5517 = vmatpush1.bf16.msra.mxu1 %v5516_v36  ;;  %5545 = vmatpush1.bf16.msra.mxu0 %v5544_v29  ;;  %v3981_v28 = vld [vmem:[#allocation3 + $0x328] sm:$0xff]  ;;  %v5520_v9 = vpack.c.bf16 %v3986_v37, %v3980_v62  ;;  %vm7879_vm2 = vcmask 257024  }
 0x850   : > { %3877 = vst [vmem:[#allocation3 + $0x358] sm:$0xf0] %v3865_v38  ;;  %5547 = vmatprep.subr.bf16.mxu0 %v7168_v0  ;;  %v4741_v0 = vld [vmem:[#allocation3 + $0xa8] sm:$0xff] }
 0x853   : > { %5549 = vmatpush1.bf16.msra.mxu0 %v7170_v34  ;;  %v4722_v34 = vld [vmem:[#allocation3 + $0x10] sm:$0xff] }
 0x854   : > { %5551 = vmatprep.subr.bf16.mxu0 %v7190_v24  ;;  %v5568_v24 = vpack.c.bf16 %v4728_v63, %v4722_v34 }
 0x857   : > { %5553 = vmatpush1.bf16.msra.mxu0 %v7192_v12  ;;  %v3987_v46 = vld [vmem:[#allocation3 + $0x358] sm:$0xff] }
 0x858   : > { %5555 = vmatprep.subr.bf16.mxu0 %v7206_v25  ;;  %v5518_v52 = vpack.c.bf16 %v3987_v46, %v3981_v28  ;;  %v4735_v12 = vld [vmem:[#allocation3 + $0x78] sm:$0xff]  ;;  %v4753_v25 = vld [vmem:[#allocation3 + $0x108] sm:$0xff] }
 0x859   : > { %v5570_v43 = vpack.c.bf16 %v4741_v0, %v4735_v12  ;;  %v5574_v22 = vpack.c.bf16 %v4753_v25, %v4747_v7 }
 0x85a   : > { %5519 = vmatprep.subr.bf16.mxu1 %v5518_v52 }
 0x85b   : > { %5521 = vmatpush1.bf16.msra.mxu1 %v5520_v9  ;;  %5557 = vmatpush1.bf16.msra.mxu0 %v7208_v51  ;;  %v4746_v51 = vld [vmem:[#allocation3 + $0xd0] sm:$0xff] }
 0x85c   : > { %5567 = vmatprep.subr.bf16.mxu1 %v5566_v5  ;;  %v5576_v48 = vpack.c.bf16 %v4752_v50, %v4746_v51 }
 0x85e   : > { %4209 = vmatmul.mubr.f32.vlgmr.msra.gmra.mrb[12].mxu1 %v7213_v18  ;;  %v4777_v18 = vld [vmem:[#allocation3 + $0x1c8] sm:$0xff] }
 0x85f   : > { %5569 = vmatpush1.bf16.msra.mxu1 %v5568_v24  ;;  %v5582_v55 = vpack.c.bf16 %v4777_v18, %v4771_v16 }
 0x860   : > { %5571 = vmatprep.subr.bf16.mxu1 %v5570_v43 }
 0x863   : > { %5573 = vmatpush1.bf16.msra.mxu1 %v5572_v40 }
 0x864   : > { %5575 = vmatprep.subr.bf16.mxu1 %v5574_v22 }
 0x867   : > { %5577 = vmatpush1.bf16.msra.mxu1 %v5576_v48 }
 0x868   : > { %5579 = vmatprep.subr.bf16.mxu1 %v5578_v54 }
 0x86b   : > { %5581 = vmatpush1.bf16.msra.mxu1 %v5580_v15 }
 0x86c   : > { %5583 = vmatprep.subr.bf16.mxu1 %v5582_v55 }
 0x86f   : > { %5585 = vmatpush1.bf16.msra.mxu1 %v5584_v47 }
 0x870   : > { %5587 = vmatprep.subr.bf16.mxu1 %v5586_v21 }
 0x873   : > { %5589 = vmatpush1.bf16.msra.mxu1 %v5588_v13 }
 0x874   : > { %5591 = vmatprep.subr.bf16.mxu1 %v7248_v57 }
 0x877   : > { %5593 = vmatpush1.bf16.msra.mxu1 %v7250_v23 }
 0x878   : > { %5595 = vmatprep.subr.bf16.mxu1 %v7270_v59 }
 0x87b   : > { %5597 = vmatpush1.bf16.msra.mxu1 %v7272_v14 }
 0x87c   : > { %5599 = vmatprep.subr.bf16.mxu1 %v7290_v60 }
 0x87f   : > { %5601 = vmatpush1.bf16.msra.mxu1 %v7292_v8 }
 0x8e9   : > { %v4068_v32 = vpop.f32.mrb[10].mxu1 }
 0x8ea   : > { %v4069_v27 = vadd.f32 %v4068_v32, %v3992_v26  ;;  %v4070_v58 = vpop.f32.mrb[11].mxu1 }
 0x8eb   : > { %v4071_v31 = vadd.f32 %v4070_v58, %v3992_v26 }
 0x8ec   : > { %vm4215_vm11 = vcmp.ge.f32.partialorder %v4069_v27, 0.0  ;;  %v4221_v35 = vmul.f32 0.2, %v4069_v27 }
 0x8ed   : > { %vm4216_vm7 = vcmp.ge.f32.partialorder %v4071_v31, 0.0  ;;  %v4222_v36 = vmul.f32 0.2, %v4071_v31 }
 0x8ee   : > { %v4227_v57 = vsel %vm4215_vm11, %v4069_v27, %v4221_v35  ;;  %vm4864_vm11 = vcmask 424960  }
 0x8ef   : > { %v4233_v23 = vsel %vm7870_vm8, %v4227_v57, 0.0  ;;  %v4228_v59 = vsel %vm4216_vm7, %v4071_v31, %v4222_v36  ;;  %vm7880_vm7 = vcmask 941056   ;;  %vm7881_vm8 = vcmask 924672  }
 0x8f0   : > { %4245 = vrot.lane.b32.xlu0 %v4233_v23, %s5869_s20  ;;  %v4234_v14 = vsel %vm7871_vm14, %v4228_v59, 0.0  ;;  %vm7882_vm14 = vcmask 785408  }
 0x8f1   : > { %4247 = vrot.lane.b32.xlu1 %v4234_v14, %s5869_s20 }
 0x90d   : > { %v4139_v60 = vpop.f32.mrb[8].mxu0 }
 0x90e   : > { %v4140_v8 = vadd.f32 %v4139_v60, %v3992_v26  ;;  %v4141_v29 = vpop.f32.mrb[9].mxu0 }
 0x90f   : > { %v4142_v41 = vadd.f32 %v4141_v29, %v3992_v26 }
 0x910   : > { %vm4217_vm1 = vcmp.ge.f32.partialorder %v4140_v8, 0.0  ;;  %v4223_v38 = vmul.f32 0.2, %v4140_v8 }
 0x911   : > { %vm4218_vm9 = vcmp.ge.f32.partialorder %v4142_v41, 0.0  ;;  %v4224_v37 = vmul.f32 0.2, %v4142_v41 }
 0x912   : > { %v4229_v28 = vsel %vm4217_vm1, %v4140_v8, %v4223_v38  ;;  %vm7883_vm1 = vcmask 646144  }
 0x913   : > { %v4235_v45 = vsel %vm6503_vm0, %v4229_v28, 0.0  ;;  %v4230_v46 = vsel %vm4218_vm9, %v4142_v41, %v4224_v37  ;;  %vm7873_vm0 = vcmask 1043712   ;;  %vm7884_vm9 = vcmask 629760  }
 0x914   : > { %4249 = vrot.lane.b32.xlu0 %v4235_v45, %s5869_s20  ;;  %v4236_v53 = vsel %vm7872_vm13, %v4230_v46, 0.0  ;;  %vm7885_vm13 = vmmov %vm7880_vm7 }
 0x915   : > { %4251 = vrot.lane.b32.xlu1 %v4236_v53, %s5869_s20 }
 0x931   : > { %v4210_v42 = vpop.f32.mrb[12].mxu1 }
 0x932   : > { %v4211_v52 = vadd.f32 %v4210_v42, %v3992_v26  ;;  %v4212_v62 = vpop.f32.mrb[13].mxu1 }
 0x933   : > { %v4213_v9 = vadd.f32 %v4212_v62, %v3992_v26 }
 0x934   : > { %vm4219_vm3 = vcmp.ge.f32.partialorder %v4211_v52, 0.0  ;;  %v4225_v44 = vmul.f32 0.2, %v4211_v52 }
 0x935   : > { %vm4220_vm5 = vcmp.ge.f32.partialorder %v4213_v9, 0.0  ;;  %v4226_v5 = vmul.f32 0.2, %v4213_v9 }
 0x936   : > { %v4231_v63 = vsel %vm4219_vm3, %v4211_v52, %v4225_v44  ;;  %vm7886_vm3 = vcmask 932864  }
 0x937   : > { %v4237_v11 = vsel %vm1766_vm4, %v4231_v63, 0.0  ;;  %v4232_v0 = vsel %vm4220_vm5, %v4213_v9, %v4226_v5  ;;  %vm7875_vm4 = vmmov %vm7874_vm15 }
 0x938   : > { %4253 = vrot.lane.b32.xlu0 %v4237_v11, %s5869_s20  ;;  %v4238_v6 = vsel %vm6530_vm10, %v4232_v0, 0.0  ;;  %vm7876_vm10 = vmmov %vm7875_vm4  ;;  %v7390_v0 = vld [vmem:[#allocation7 + $0x28] sm:$0xf] }
 0x939   : > { %4255 = vrot.lane.b32.xlu1 %v4238_v6, %s5869_s20  ;;  %vm7877_vm6 = vmmov %vm7875_vm4  ;;  %5242 = vmatprep.mubr.msk.f32.mxu0 %vm4864_vm11, %v7390_v0 }
 0x93a   : > { %vm7878_vm12 = vmmov %vm7875_vm4  ;;  %5245 = vmatprep.mubr.msk.f32.mxu1 %vm4864_vm11, %v7390_v0 }
 0x93b   : > { %vm7887_vm5 = vmmov %vm7881_vm8 }
 0x962   : > { %v4246_v34 = vpop.permute.xlu0 %4245 }
 0x963   : > { %4269 = vst.msk [vmem:[#allocation2 + $0x70] sm:$0xf] %vm7873_vm0, %v4246_v34  ;;  %v4248_v24 = vpop.permute.xlu1 %4247  ;;  %vm7888_vm0 = vcmask 793600  }
 0x964   : > { %v4257_v12 = vsel %vm7874_vm15, %v4246_v34, %v4248_v24  ;;  %vm7889_vm15 = vmmov %vm7882_vm14 }
 0x965   : > { %4270 = vst [vmem:[#allocation2 + $0x78] sm:$0xf] %v4257_v12 }
 0x96a   : > { %v4276_v43 = vld [vmem:[#allocation2 + $0x70] sm:$0xf] }
 0x96b   : > { %v4322_v10 = vld [vmem:[#allocation2 + $0x70] sm:$0xf]  ;;  %4290 = vrot.lane.b32.xlu0 %v4276_v43, %s5870_s18 }
 0x96c   : > { %v4336_v20 = vrot.slane %v4322_v10, 4  ;;  %v4421_v25 = vld [vmem:[#allocation2 + $0x70] sm:$0xf]  ;;  %v4277_v30 = vld [vmem:[#allocation2 + $0x78] sm:$0xf] }
 0x96d   : > { %v4375_v2 = vld [vmem:[#allocation2 + $0x70] sm:$0xf]  ;;  %v4435_v4 = vrot.slane %v4421_v25, 4  ;;  %v4376_v54 = vld [vmem:[#allocation2 + $0x78] sm:$0xf] }
 0x96e   : > { %4343 = vrot.lane.b32.xlu1 %v4336_v20, %s5871_s23  ;;  %v4520_v40 = vld [vmem:[#allocation2 + $0x70] sm:$0xf]  ;;  %v4475_v18 = vld [vmem:[#allocation2 + $0x78] sm:$0xf] }
 0x96f   : > { %4389 = vrot.lane.b32.xlu0 %v4375_v2, %s5872_s25  ;;  %v4474_v7 = vld [vmem:[#allocation2 + $0x70] sm:$0xf]  ;;  %v4534_v22 = vrot.slane %v4520_v40, 4  ;;  %v4574_v55 = vld [vmem:[#allocation2 + $0x78] sm:$0xf] }
 0x970   : > { %v4619_v50 = vld [vmem:[#allocation2 + $0x70] sm:$0xf]  ;;  %v4673_v17 = vld [vmem:[#allocation2 + $0x78] sm:$0xf] }
 0x971   : > { %v4573_v39 = vld [vmem:[#allocation2 + $0x70] sm:$0xf]  ;;  %v4633_v51 = vrot.slane %v4619_v50, 4  ;;  %v4323_v33 = vld [vmem:[#allocation2 + $0x78] sm:$0xf] }
 0x972   : > { %4442 = vrot.lane.b32.xlu1 %v4435_v4, %s5873_s4  ;;  %v4672_v48 = vld [vmem:[#allocation2 + $0x70] sm:$0xf]  ;;  %v4337_v47 = vrot.slane %v4323_v33, 4  ;;  %v4422_v61 = vld [vmem:[#allocation2 + $0x78] sm:$0xf] }
 0x973   : > { %4488 = vrot.lane.b32.xlu0 %v4474_v7, %s5874_s5  ;;  %v4436_v3 = vrot.slane %v4422_v61, 4  ;;  %v4521_v1 = vld [vmem:[#allocation2 + $0x78] sm:$0xf] }
 0x974   : > { %v4535_v26 = vrot.slane %v4521_v1, 4  ;;  %v4620_v32 = vld [vmem:[#allocation2 + $0x78] sm:$0xf] }
 0x975   : > { %v4634_v58 = vrot.slane %v4620_v32, 4 }
 0x976   : > { %4541 = vrot.lane.b32.xlu1 %v4534_v22, %s5875_s8 }
 0x977   : > { %4587 = vrot.lane.b32.xlu0 %v4573_v39, %s5876_s9 }
 0x97a   : > { %4640 = vrot.lane.b32.xlu1 %v4633_v51, %s5877_s10 }
 0x97b   : > { %4686 = vrot.lane.b32.xlu0 %v4672_v48, %s5878_s11 }
 0x97f   : > { %4292 = vrot.lane.b32.xlu0 %v4277_v30, %s5870_s18 }
 0x983   : > { %4391 = vrot.lane.b32.xlu0 %v4376_v54, %s5872_s25 }
 0x986   : > { %v4250_v49 = vpop.permute.xlu0 %4249 }
 0x987   : > { %v4258_v56 = vsel %vm7875_vm4, %v4248_v24, %v4250_v49  ;;  %v4252_v15 = vpop.permute.xlu1 %4251  ;;  %4490 = vrot.lane.b32.xlu0 %v4475_v18, %s5874_s5  ;;  %vm7890_vm4 = vcmask 777216  }
 0x988   : > { %4271 = vst [vmem:[#allocation2 + $0x80] sm:$0xf] %v4258_v56  ;;  %v4259_v16 = vsel %vm7876_vm10, %v4250_v49, %v4252_v15  ;;  %vm7891_vm10 = vmmov %vm7883_vm1 }
 0x989   : > { %4272 = vst [vmem:[#allocation2 + $0x88] sm:$0xf] %v4259_v16 }
 0x98b   : > { %4589 = vrot.lane.b32.xlu0 %v4574_v55, %s5876_s9 }
 0x98f   : > { %4688 = vrot.lane.b32.xlu0 %v4673_v17, %s5878_s11  ;;  %v4278_v19 = vld [vmem:[#allocation2 + $0x80] sm:$0xf] }
 0x990   : > { %4294 = vrot.lane.b32.xlu1 %v4278_v19, %s5870_s18  ;;  %v4377_v21 = vld [vmem:[#allocation2 + $0x80] sm:$0xf]  ;;  %v4279_v35 = vld [vmem:[#allocation2 + $0x88] sm:$0xf] }
 0x991   : > { %v4476_v13 = vld [vmem:[#allocation2 + $0x80] sm:$0xf]  ;;  %v4378_v36 = vld [vmem:[#allocation2 + $0x88] sm:$0xf] }
 0x992   : > { %v4575_v27 = vld [vmem:[#allocation2 + $0x80] sm:$0xf]  ;;  %v4477_v14 = vld [vmem:[#allocation2 + $0x88] sm:$0xf] }
 0x993   : > { %4345 = vrot.lane.b32.xlu0 %v4337_v47, %s5871_s23  ;;  %v4674_v31 = vld [vmem:[#allocation2 + $0x80] sm:$0xf]  ;;  %v4576_v8 = vld [vmem:[#allocation2 + $0x88] sm:$0xf] }
 0x994   : > { %4393 = vrot.lane.b32.xlu1 %v4377_v21, %s5872_s25  ;;  %v4324_v29 = vld [vmem:[#allocation2 + $0x80] sm:$0xf]  ;;  %v4325_v44 = vld [vmem:[#allocation2 + $0x88] sm:$0xf] }
 0x995   : > { %v4338_v41 = vrot.slane %v4324_v29, 4  ;;  %v4423_v37 = vld [vmem:[#allocation2 + $0x80] sm:$0xf]  ;;  %v4339_v5 = vrot.slane %v4325_v44, 4  ;;  %v4424_v11 = vld [vmem:[#allocation2 + $0x88] sm:$0xf] }
 0x996   : > { %v4437_v28 = vrot.slane %v4423_v37, 4  ;;  %v4522_v46 = vld [vmem:[#allocation2 + $0x80] sm:$0xf]  ;;  %v4438_v6 = vrot.slane %v4424_v11, 4  ;;  %v4523_v24 = vld [vmem:[#allocation2 + $0x88] sm:$0xf] }
 0x997   : > { %4444 = vrot.lane.b32.xlu0 %v4436_v3, %s5873_s4  ;;  %v4536_v53 = vrot.slane %v4522_v46, 4  ;;  %v4621_v52 = vld [vmem:[#allocation2 + $0x80] sm:$0xf]  ;;  %v4537_v12 = vrot.slane %v4523_v24, 4  ;;  %v4622_v10 = vld [vmem:[#allocation2 + $0x88] sm:$0xf] }
 0x998   : > { %4492 = vrot.lane.b32.xlu1 %v4476_v13, %s5874_s5  ;;  %v4635_v62 = vrot.slane %v4621_v52, 4  ;;  %v4636_v20 = vrot.slane %v4622_v10, 4  ;;  %v4858_v46 = vld [vmem:[%s7592_s2 + $0x10] sm:$0xf] }
 0x99b   : > { %4543 = vrot.lane.b32.xlu0 %v4535_v26, %s5875_s8 }
 0x99c   : > { %4591 = vrot.lane.b32.xlu1 %v4575_v27, %s5876_s9 }
 0x99f   : > { %4642 = vrot.lane.b32.xlu0 %v4634_v58, %s5877_s10 }
 0x9a0   : > { %4690 = vrot.lane.b32.xlu1 %v4674_v31, %s5878_s11 }
 0x9a4   : > { %4296 = vrot.lane.b32.xlu1 %v4279_v35, %s5870_s18 }
 0x9a8   : > { %4395 = vrot.lane.b32.xlu1 %v4378_v36, %s5872_s25 }
 0x9aa   : > { %v4254_v57 = vpop.permute.xlu0 %4253 }
 0x9ab   : > { %v4260_v23 = vsel %vm7877_vm6, %v4252_v15, %v4254_v57  ;;  %v4256_v59 = vpop.permute.xlu1 %4255  ;;  %vm7892_vm6 = vcmask 637952  }
 0x9ac   : > { %4273 = vst [vmem:[#allocation2 + $0x90] sm:$0xf] %v4260_v23  ;;  %v4261_v60 = vsel %vm7878_vm12, %v4254_v57, %v4256_v59  ;;  %4275 = vst.msk [vmem:[#allocation2 + $0xa0] sm:$0xf] %vm7879_vm2, %v4256_v59  ;;  %4494 = vrot.lane.b32.xlu1 %v4477_v14, %s5874_s5 }
 0x9ad   : > { %4274 = vst [vmem:[#allocation2 + $0x98] sm:$0xf] %v4261_v60  ;;  %v4675_v60 = vld [vmem:[#allocation2 + $0x88] sm:$0xf]  ;;  %vm7893_vm12 = vmmov %vm7884_vm9 }
 0x9ae   : > { %vm7894_vm2 = vmmov %vm7880_vm7 }
 0x9b0   : > { %4593 = vrot.lane.b32.xlu1 %v4576_v8, %s5876_s9 }
 0x9b3   : > { %v4280_v38 = vld [vmem:[#allocation2 + $0x90] sm:$0xf]  ;;  %v4282_v45 = vld [vmem:[#allocation2 + $0xa0] sm:$0xf] }
 0x9b4   : > { %4347 = vrot.lane.b32.xlu1 %v4338_v41, %s5871_s23  ;;  %4298 = vrot.lane.b32.xlu0 %v4280_v38, %s5870_s18  ;;  %v4379_v42 = vld [vmem:[#allocation2 + $0x90] sm:$0xf]  ;;  %v4381_v9 = vld [vmem:[#allocation2 + $0xa0] sm:$0xf]  ;;  %v4281_v40 = vld [vmem:[#allocation2 + $0x98] sm:$0xf] }
 0x9b5   : > { %v4478_v63 = vld [vmem:[#allocation2 + $0x90] sm:$0xf]  ;;  %v4480_v34 = vld [vmem:[#allocation2 + $0xa0] sm:$0xf]  ;;  %v4380_v50 = vld [vmem:[#allocation2 + $0x98] sm:$0xf] }
 0x9b6   : > { %v4577_v43 = vld [vmem:[#allocation2 + $0x90] sm:$0xf]  ;;  %v4579_v25 = vld [vmem:[#allocation2 + $0xa0] sm:$0xf]  ;;  %v4479_v48 = vld [vmem:[#allocation2 + $0x98] sm:$0xf] }
 0x9b7   : > { %v4326_v2 = vld [vmem:[#allocation2 + $0x90] sm:$0xf]  ;;  %v4328_v7 = vld [vmem:[#allocation2 + $0xa0] sm:$0xf]  ;;  %v4578_v18 = vld [vmem:[#allocation2 + $0x98] sm:$0xf] }
 0x9b8   : > { %4446 = vrot.lane.b32.xlu1 %v4437_v28, %s5873_s4  ;;  %4302 = vrot.lane.b32.xlu0 %v4282_v45, %s5870_s18  ;;  %v4340_v4 = vrot.slane %v4326_v2, 4  ;;  %v4342_v22 = vrot.slane %v4328_v7, 4  ;;  %v4425_v39 = vld [vmem:[#allocation2 + $0x90] sm:$0xf]  ;;  %v4427_v30 = vld [vmem:[#allocation2 + $0xa0] sm:$0xf] }
 0x9b9   : > { %v4439_v51 = vrot.slane %v4425_v39, 4  ;;  %v4441_v49 = vrot.slane %v4427_v30, 4  ;;  %v4327_v56 = vld [vmem:[#allocation2 + $0x98] sm:$0xf]  ;;  %v4524_v15 = vld [vmem:[#allocation2 + $0x90] sm:$0xf] }
 0x9ba   : > { %v4341_v55 = vrot.slane %v4327_v56, 4  ;;  %v4538_v17 = vrot.slane %v4524_v15, 4  ;;  %v4426_v33 = vld [vmem:[#allocation2 + $0x98] sm:$0xf]  ;;  %v4526_v19 = vld [vmem:[#allocation2 + $0xa0] sm:$0xf] }
 0x9bb   : > { %v4440_v61 = vrot.slane %v4426_v33, 4  ;;  %v4540_v21 = vrot.slane %v4526_v19, 4  ;;  %v4525_v3 = vld [vmem:[#allocation2 + $0x98] sm:$0xf]  ;;  %v4623_v1 = vld [vmem:[#allocation2 + $0x90] sm:$0xf] }
 0x9bc   : > { %4545 = vrot.lane.b32.xlu1 %v4536_v53, %s5875_s8  ;;  %4397 = vrot.lane.b32.xlu0 %v4379_v42, %s5872_s25  ;;  %v4539_v26 = vrot.slane %v4525_v3, 4  ;;  %v4637_v32 = vrot.slane %v4623_v1, 4  ;;  %v4624_v27 = vld [vmem:[#allocation2 + $0x98] sm:$0xf]  ;;  %v4625_v58 = vld [vmem:[#allocation2 + $0xa0] sm:$0xf] }
 0x9bd   : > { %v4638_v36 = vrot.slane %v4624_v27, 4  ;;  %v4639_v57 = vrot.slane %v4625_v58, 4  ;;  %v4676_v8 = vld [vmem:[#allocation2 + $0x90] sm:$0xf]  ;;  %v4677_v38 = vld [vmem:[#allocation2 + $0x98] sm:$0xf] }
 0x9be   : > { %v4678_v37 = vld [vmem:[#allocation2 + $0xa0] sm:$0xf] }
 0x9c0   : > { %4644 = vrot.lane.b32.xlu1 %v4635_v62, %s5877_s10  ;;  %4401 = vrot.lane.b32.xlu0 %v4381_v9, %s5872_s25 }
 0x9c4   : > { %4349 = vrot.lane.b32.xlu1 %v4339_v5, %s5871_s23  ;;  %4496 = vrot.lane.b32.xlu0 %v4478_v63, %s5874_s5 }
 0x9c8   : > { %4448 = vrot.lane.b32.xlu1 %v4438_v6, %s5873_s4  ;;  %4500 = vrot.lane.b32.xlu0 %v4480_v34, %s5874_s5 }
 0x9cc   : > { %4547 = vrot.lane.b32.xlu1 %v4537_v12, %s5875_s8  ;;  %4595 = vrot.lane.b32.xlu0 %v4577_v43, %s5876_s9 }
 0x9d0   : > { %4646 = vrot.lane.b32.xlu1 %v4636_v20, %s5877_s10  ;;  %4599 = vrot.lane.b32.xlu0 %v4579_v25, %s5876_s9 }
 0x9d4   : > { %4300 = vrot.lane.b32.xlu1 %v4281_v40, %s5870_s18  ;;  %4351 = vrot.lane.b32.xlu0 %v4340_v4, %s5871_s23 }
 0x9d8   : > { %4399 = vrot.lane.b32.xlu1 %v4380_v50, %s5872_s25  ;;  %4355 = vrot.lane.b32.xlu0 %v4342_v22, %s5871_s23  ;;  %s5657_s25 = smul.u32 384, %s5924_s16  ;;  %s5882_s16 = smov [#allocation9]  }
 0x9dc   : > { %4498 = vrot.lane.b32.xlu1 %v4479_v48, %s5874_s5  ;;  %4450 = vrot.lane.b32.xlu0 %v4439_v51, %s5873_s4 }
 0x9dd   : > { %v4291_v54 = vpop.permute.xlu0 %4290 }
 0x9e0   : > { %4597 = vrot.lane.b32.xlu1 %v4578_v18, %s5876_s9  ;;  %4454 = vrot.lane.b32.xlu0 %v4441_v49, %s5873_s4  ;;  %v4344_v31 = vpop.permute.xlu1 %4343  ;;  %s5115_s9 = scalar_lea.sflag [#allocation6], %s6039_s26 }
 0x9e1   : > { %v4390_v16 = vpop.permute.xlu0 %4389 }
 0x9e4   : > { %4353 = vrot.lane.b32.xlu1 %v4341_v55, %s5871_s23  ;;  %4549 = vrot.lane.b32.xlu0 %v4538_v17, %s5875_s8  ;;  %v4443_v59 = vpop.permute.xlu1 %4442  ;;  %s201_s23 = scalar_lea.vmem [#allocation9], %s5656_s30  ;;  %s7546_s30 = scalar_lea.hbm %s7593_s3, %s5657_s25 }
 0x9e5   : > { %v4489_v47 = vpop.permute.xlu0 %4488 }
 0x9e8   : > { %4452 = vrot.lane.b32.xlu1 %v4440_v61, %s5873_s4  ;;  %4553 = vrot.lane.b32.xlu0 %v4540_v21, %s5875_s8  ;;  %v4542_v28 = vpop.permute.xlu1 %4541  ;;  %s5129_s4 = sshll.u32 %s201_s23, 4  ;;  %s7548_s4 = int_to_ptr.vmem [resolvable:$true] %s5129_s4 }
 0x9e9   : > { %v4588_v13 = vpop.permute.xlu0 %4587 }
 0x9ec   : > { %4551 = vrot.lane.b32.xlu1 %v4539_v26, %s5875_s8  ;;  %4648 = vrot.lane.b32.xlu0 %v4637_v32, %s5877_s10  ;;  %v4641_v52 = vpop.permute.xlu1 %4640 }
 0x9ed   : > { %v4687_v35 = vpop.permute.xlu0 %4686 }
 0x9f0   : > { %4650 = vrot.lane.b32.xlu1 %v4638_v36, %s5877_s10  ;;  %4652 = vrot.lane.b32.xlu0 %v4639_v57, %s5877_s10  ;;  %s5793_s10 = scalar_lea.vmem %s7548_s4, 384 }
 0x9f1   : > { %v4293_v23 = vpop.permute.xlu0 %4292  ;;  %p5794_p4 = scmp.ne.s32.totalorder %s7548_s4, %s5793_s10 }
 0x9f2   : > { %v4304_v14 = vsel %vm7880_vm7, %v4291_v54, %v4293_v23  ;;  %vm7895_vm7 = vmmov %vm7887_vm5 }
 0x9f3   : > { %4316 = vst [vmem:[#allocation3 + $0x360] sm:$0xf] %v4304_v14  ;;  %p5795_p6 = pnand %p5794_p4, %p5994_p12 }
 0x9f4   : > { %4692 = vrot.lane.b32.xlu1 %v4675_v60, %s5878_s11  ;;  %4694 = vrot.lane.b32.xlu0 %v4676_v8, %s5878_s11 }
 0x9f5   : > { %v4392_v29 = vpop.permute.xlu0 %4391  ;;  %p5796_p8 = pneg %p5795_p6 }
 0x9f6   : > { %v4403_v41 = vsel %vm7881_vm8, %v4390_v16, %v4392_v29  ;;  %vm7896_vm8 = vmmov %vm7882_vm14 }
 0x9f7   : > { %4415 = vst [vmem:[#allocation3 + $0x390] sm:$0xf] %v4403_v41 }
 0x9f8   : > { %4696 = vrot.lane.b32.xlu1 %v4677_v38, %s5878_s11  ;;  %4698 = vrot.lane.b32.xlu0 %v4678_v37, %s5878_s11  ;;  %s5797_s11 = sshll.u32 %s5882_s16, 4  ;;  %s5798_s11 = int_to_ptr.vmem [resolvable:$false] %s5797_s11 }
 0x9f9   : > { %v4491_v45 = vpop.permute.xlu0 %4490  ;;  %s5799_s29 = scalar_lea.vmem %s5798_s11, 768  ;;  %p5800_p10 = scmp.lt.s32.totalorder %s7548_s4, %s5798_s11 }
 0x9fa   : > { %v4502_v53 = vsel %vm7882_vm14, %v4489_v47, %v4491_v45  ;;  %vm7897_vm14 = vmmov %vm7883_vm1  ;;  %p5801_p11 = scmp.lt.s32.totalorder %s5799_s29, %s5793_s10 }
 0x9fb   : > { %4514 = vst [vmem:[#allocation3 + $0x3c0] sm:$0xf] %v4502_v53 }
 0x9fc   : > { %4861 = vperm.xlu1 %5730, %v4858_v46   ;;  %p5802_p3 = por %p5801_p11, %p5800_p10 }
 0x9fd   : > { %v4590_v42 = vpop.permute.xlu0 %4589 }
 0x9fe   : > { %v4601_v62 = vsel %vm7883_vm1, %v4588_v13, %v4590_v42  ;;  %vm7898_vm1 = vmmov %vm7886_vm3  ;;  %p5803_p7 = pnand %p5802_p3, %p5796_p8 }
 0x9ff   : > { %4613 = vst [vmem:[#allocation3 + $0x3f0] sm:$0xf] %v4601_v62 }
 0xa01   : > { %v4689_v9 = vpop.permute.xlu0 %4688 }
 0xa02   : > { %v4700_v44 = vsel %vm7884_vm9, %v4687_v35, %v4689_v9  ;;  %v4295_v5 = vpop.permute.xlu1 %4294  ;;  %vm7899_vm9 = vmmov %vm7894_vm2 }
 0xa03   : > { %4712 = vst [vmem:[#allocation3 + $0x420] sm:$0xf] %v4700_v44  ;;  %v4305_v63 = vsel %vm7885_vm13, %v4293_v23, %v4295_v5  ;;  %vm7900_vm13 = vmmov %vm7888_vm0 }
 0xa04   : > { %4317 = vst [vmem:[#allocation3 + $0x368] sm:$0xf] %v4305_v63  ;;  %v4731_v63 = vld [vmem:[#allocation3 + $0x58] sm:$0xff] }
 0xa05   : > { %v4346_v11 = vpop.permute.xlu0 %4345 }
 0xa06   : > { %v4357_v6 = vsel %vm7886_vm3, %v4344_v31, %v4346_v11  ;;  %v4394_v34 = vpop.permute.xlu1 %4393  ;;  %vm7901_vm3 = vmmov %vm7890_vm4 }
 0xa07   : > { %4369 = vst [vmem:[#allocation3 + $0x360] sm:$0xf0] %v4357_v6  ;;  %v4404_v24 = vsel %vm7887_vm5, %v4392_v29, %v4394_v34  ;;  %v7482_v6 = vld [vmem:[#allocation7 + $0x20] sm:$0xf] }
 0xa08   : > { %4416 = vst [vmem:[#allocation3 + $0x398] sm:$0xf] %v4404_v24  ;;  %v4743_v24 = vld [vmem:[#allocation3 + $0xb8] sm:$0xff] }
 0xa09   : > { %v4445_v12 = vpop.permute.xlu0 %4444 }
 0xa0a   : > { %v4456_v43 = vsel %vm7888_vm0, %v4443_v59, %v4445_v12  ;;  %v4493_v10 = vpop.permute.xlu1 %4492  ;;  %vm7902_vm0 = vmmov %vm7892_vm6 }
 0xa0b   : > { %4468 = vst [vmem:[#allocation3 + $0x390] sm:$0xf0] %v4456_v43  ;;  %v4503_v20 = vsel %vm7889_vm15, %v4491_v45, %v4493_v10  ;;  %vm7903_vm15 = vmmov %vm7898_vm1 }
 0xa0c   : > { %4515 = vst [vmem:[#allocation3 + $0x3c8] sm:$0xf] %v4503_v20 }
 0xa0d   : > { %v4544_v25 = vpop.permute.xlu0 %4543 }
 0xa0e   : > { %v4555_v2 = vsel %vm7890_vm4, %v4542_v28, %v4544_v25  ;;  %v4592_v4 = vpop.permute.xlu1 %4591  ;;  %v4828_v57 = vld [vmem:[#allocation3 + $0x360] sm:$0xff]  ;;  %vm7904_vm4 = vmmov %vm7896_vm8 }
 0xa0f   : > { %4567 = vst [vmem:[#allocation3 + $0x3c0] sm:$0xf0] %v4555_v2  ;;  %v4602_v40 = vsel %vm7891_vm10, %v4590_v42, %v4592_v4  ;;  %vm7905_vm10 = vmmov %vm7900_vm13 }
 0xa10   : > { %4614 = vst [vmem:[#allocation3 + $0x3f8] sm:$0xf] %v4602_v40  ;;  %v4737_v40 = vld [vmem:[#allocation3 + $0x88] sm:$0xff] }
 0xa11   : > { %v4643_v7 = vpop.permute.xlu0 %4642 }
 0xa12   : > { %v4654_v22 = vsel %vm7892_vm6, %v4641_v52, %v4643_v7  ;;  %v7438_v50 = vpop.permute.xlu1 %4690  ;;  %v4834_v27 = vld [vmem:[#allocation3 + $0x390] sm:$0xff]  ;;  %vm7906_vm6 = vmmov %vm7901_vm3 }
 0xa13   : > { %4666 = vst [vmem:[#allocation3 + $0x3f0] sm:$0xf0] %v4654_v22  ;;  %v4701_v39 = vsel %vm7893_vm12, %v4689_v9, %v7438_v50  ;;  %v5560_v23 = vpack.c.bf16 %v4834_v27, %v4828_v57  ;;  %vm7907_vm12 = vmmov %vm7897_vm14  ;;  %v4742_v22 = vld [vmem:[#allocation3 + $0xb0] sm:$0xff]  ;;  %v4779_v27 = vld [vmem:[#allocation3 + $0x1d8] sm:$0xff] }
 0xa14   : > { %4713 = vst [vmem:[#allocation3 + $0x428] sm:$0xf] %v4701_v39  ;;  %v4755_v39 = vld [vmem:[#allocation3 + $0x118] sm:$0xff] }
 0xa16   : > { %v4297_v51 = vpop.permute.xlu1 %4296  ;;  %v4840_v53 = vld [vmem:[#allocation3 + $0x3c0] sm:$0xff] }
 0xa17   : > { %v4306_v48 = vsel %vm7894_vm2, %v4295_v5, %v4297_v51  ;;  %vm7908_vm2 = vcmask 1043456  }
 0xa18   : > { %4318 = vst [vmem:[#allocation3 + $0x370] sm:$0xf] %v4306_v48 }
 0xa1a   : > { %v4396_v30 = vpop.permute.xlu1 %4395  ;;  %v4846_v38 = vld [vmem:[#allocation3 + $0x3f0] sm:$0xff] }
 0xa1b   : > { %v4405_v54 = vsel %vm7895_vm7, %v4394_v34, %v4396_v30  ;;  %v5564_v42 = vpack.c.bf16 %v4846_v38, %v4840_v53  ;;  %v4853_v5 = vld [vmem:[#allocation3 + $0x428] sm:$0xf]  ;;  %vm7909_vm7 = vmmov %vm7902_vm0  ;;  %v4790_v53 = vld [vmem:[#allocation3 + $0x230] sm:$0xff] }
 0xa1c   : > { %4417 = vst [vmem:[#allocation3 + $0x3a0] sm:$0xf] %v4405_v54  ;;  %v4725_v34 = vld [vmem:[#allocation3 + $0x28] sm:$0xff] }
 0xa1d   : > { %v5610_v20 = vpack.c.bf16 %v4731_v63, %v4725_v34 }
 0xa1e   : > { %v4495_v49 = vpop.permute.xlu1 %4494 }
 0xa1f   : > { %v4504_v18 = vsel %vm7896_vm8, %v4493_v10, %v4495_v49  ;;  %v4852_v10 = vld [vmem:[#allocation3 + $0x420] sm:$0xf]  ;;  %vm7910_vm8 = vmmov %vm7908_vm2 }
 0xa20   : > { %4516 = vst [vmem:[#allocation3 + $0x3d0] sm:$0xf] %v4504_v18 }
 0xa22   : > { %v4594_v56 = vpop.permute.xlu1 %4593 }
 0xa23   : > { %v4603_v15 = vsel %vm7897_vm14, %v4592_v4, %v4594_v56  ;;  %vm7911_vm14 = vmmov %vm7899_vm9 }
 0xa24   : > { %4615 = vst [vmem:[#allocation3 + $0x400] sm:$0xf] %v4603_v15  ;;  %v4749_v15 = vld [vmem:[#allocation3 + $0xe8] sm:$0xff] }
 0xa26   : > { %v4348_v16 = vpop.permute.xlu1 %4347  ;;  %v7446_v55 = vpop.permute.xlu0 %4298 }
 0xa27   : > { %v4358_v17 = vsel %vm7898_vm1, %v4346_v11, %v4348_v16  ;;  %v4307_v33 = vsel %vm7899_vm9, %v4297_v51, %v7446_v55  ;;  %v4730_v11 = vld [vmem:[#allocation3 + $0x50] sm:$0xff]  ;;  %vm7912_vm1 = vmmov %vm7899_vm9 }
 0xa28   : > { %4370 = vst [vmem:[#allocation3 + $0x368] sm:$0xf0] %v4358_v17  ;;  %4319 = vst [vmem:[#allocation3 + $0x378] sm:$0xf] %v4307_v33  ;;  %v4767_v17 = vld [vmem:[#allocation3 + $0x178] sm:$0xff] }
 0xa29   : > { %vm7913_vm9 = vmmov %vm7903_vm15 }
 0xa2a   : > { %v4447_v19 = vpop.permute.xlu1 %4446  ;;  %v7451_v47 = vpop.permute.xlu0 %4302 }
 0xa2b   : > { %v4457_v61 = vsel %vm7900_vm13, %v4445_v12, %v4447_v19  ;;  %vm7915_vm13 = vmmov %vm7887_vm5 }
 0xa2c   : > { %4469 = vst [vmem:[#allocation3 + $0x398] sm:$0xf0] %v4457_v61  ;;  %v4748_v61 = vld [vmem:[#allocation3 + $0xe0] sm:$0xff] }
 0xa2e   : > { %v4546_v21 = vpop.permute.xlu1 %4545  ;;  %v7454_v3 = vpop.permute.xlu0 %4397 }
 0xa2f   : > { %v4556_v1 = vsel %vm7901_vm3, %v4544_v25, %v4546_v21  ;;  %v4406_v13 = vsel %vm7887_vm5, %v4396_v30, %v7454_v3  ;;  %v4829_v31 = vld [vmem:[#allocation3 + $0x368] sm:$0xff]  ;;  %v4724_v25 = vld [vmem:[#allocation3 + $0x20] sm:$0xff]  ;;  %vm7916_vm3 = vmmov %vm7904_vm4 }
 0xa30   : > { %4568 = vst [vmem:[#allocation3 + $0x3c8] sm:$0xf0] %v4556_v1  ;;  %4418 = vst [vmem:[#allocation3 + $0x3a8] sm:$0xf] %v4406_v13  ;;  %v5612_v4 = vpack.c.bf16 %v4730_v11, %v4724_v25  ;;  %v4736_v30 = vld [vmem:[#allocation3 + $0x80] sm:$0xff]  ;;  %v4761_v1 = vld [vmem:[#allocation3 + $0x148] sm:$0xff] }
 0xa31   : > { %v5622_v13 = vpack.c.bf16 %v4767_v17, %v4761_v1  ;;  %v4808_v17 = vld [vmem:[#allocation3 + $0x2c0] sm:$0xff]  ;;  %v4826_v1 = vld [vmem:[#allocation3 + $0x350] sm:$0xff] }
 0xa32   : > { %v4645_v26 = vpop.permute.xlu1 %4644  ;;  %v7459_v32 = vpop.permute.xlu0 %4401 }
 0xa33   : > { %v4655_v58 = vsel %vm7902_vm0, %v4643_v7, %v4645_v26  ;;  %v4835_v35 = vld [vmem:[#allocation3 + $0x398] sm:$0xff]  ;;  %v5614_v7 = vpack.c.bf16 %v4743_v24, %v4737_v40  ;;  %vm7918_vm0 = vmmov %vm7905_vm10  ;;  %v4802_v40 = vld [vmem:[#allocation3 + $0x290] sm:$0xff] }
 0xa34   : > { %4667 = vst [vmem:[#allocation3 + $0x3f8] sm:$0xf0] %v4655_v58  ;;  %v5558_v36 = vpack.c.bf16 %v4835_v35, %v4829_v31  ;;  %v4760_v35 = vld [vmem:[#allocation3 + $0x140] sm:$0xff] }
 0xa36   : > { %v4350_v59 = vpop.permute.xlu1 %4349  ;;  %5559 = vmatprep.subr.bf16.mxu0 %v5558_v36  ;;  %v7462_v14 = vpop.permute.xlu0 %4496 }
 0xa37   : > { %v4359_v60 = vsel %vm7903_vm15, %v4348_v16, %v4350_v59  ;;  %v4505_v8 = vsel %vm7904_vm4, %v4495_v49, %v7462_v14  ;;  %5561 = vmatpush1.bf16.msra.mxu0 %v5560_v23  ;;  %v4841_v28 = vld [vmem:[#allocation3 + $0x3c8] sm:$0xff]  ;;  %v4754_v16 = vld [vmem:[#allocation3 + $0x110] sm:$0xff]  ;;  %vm7919_vm15 = vmmov %vm7907_vm12 }
 0xa38   : > { %4371 = vst [vmem:[#allocation3 + $0x370] sm:$0xf0] %v4359_v60  ;;  %4517 = vst [vmem:[#allocation3 + $0x3d8] sm:$0xf] %v4505_v8  ;;  %v4773_v23 = vld [vmem:[#allocation3 + $0x1a8] sm:$0xff]  ;;  %v4778_v60 = vld [vmem:[#allocation3 + $0x1d0] sm:$0xff] }
 0xa39   : > { %v4791_v8 = vld [vmem:[#allocation3 + $0x238] sm:$0xff]  ;;  %vm7920_vm4 = vmmov %vm7907_vm12 }
 0xa3a   : > { %v7467_v29 = vpop.permute.xlu1 %4448  ;;  %v7469_v41 = vpop.permute.xlu0 %4500 }
 0xa3b   : > { %v4458_v37 = vsel %vm7905_vm10, %v4447_v19, %v7467_v29  ;;  %v4847_v45 = vld [vmem:[#allocation3 + $0x3f8] sm:$0xff]  ;;  %vm7921_vm10 = vmmov %vm7913_vm9 }
 0xa3c   : > { %4470 = vst [vmem:[#allocation3 + $0x3a0] sm:$0xf0] %v4458_v37  ;;  %v5562_v46 = vpack.c.bf16 %v4847_v45, %v4841_v28  ;;  %v4772_v28 = vld [vmem:[#allocation3 + $0x1a0] sm:$0xff]  ;;  %v4785_v45 = vld [vmem:[#allocation3 + $0x208] sm:$0xff] }
 0xa3e   : > { %v7473_v52 = vpop.permute.xlu1 %4547  ;;  %5563 = vmatprep.subr.bf16.mxu0 %v5562_v46  ;;  %v7475_v62 = vpop.permute.xlu0 %4595  ;;  %v5630_v46 = vpack.c.bf16 %v4791_v8, %v4785_v45 }
 0xa3f   : > { %v4557_v9 = vsel %vm7906_vm6, %v4546_v21, %v7473_v52  ;;  %v4604_v44 = vsel %vm7907_vm12, %v4594_v56, %v7475_v62  ;;  %5565 = vmatpush1.bf16.msra.mxu0 %v5564_v42  ;;  %v5616_v56 = vpack.c.bf16 %v4742_v22, %v4736_v30  ;;  %v5620_v21 = vpack.c.bf16 %v4754_v16, %v4748_v61  ;;  %v4803_v42 = vld [vmem:[#allocation3 + $0x298] sm:$0xff]  ;;  %vm7922_vm6 = vmmov %vm7913_vm9 }
 0xa40   : > { %4569 = vst [vmem:[#allocation3 + $0x3d0] sm:$0xf0] %v4557_v9  ;;  %4616 = vst [vmem:[#allocation3 + $0x408] sm:$0xf] %v4604_v44  ;;  %5240 = vmatprep.subr.msk.mxu0 %vm7908_vm2, %v4853_v5  ;;  %v4784_v5 = vld [vmem:[#allocation3 + $0x200] sm:$0xff]  ;;  %vm7923_vm12 = vcmask 777216  }
 0xa41   : > { %v5632_v24 = vpack.c.bf16 %v4790_v53, %v4784_v5  ;;  %v4815_v22 = vld [vmem:[#allocation3 + $0x2f8] sm:$0xff]  ;;  %vm7924_vm2 = vmmov %vm7918_vm0 }
 0xa42   : > { %v7484_v12 = vpop.permute.xlu1 %4646  ;;  %v7486_v43 = vpop.permute.xlu0 %4599 }
 0xa43   : > { %v4656_v2 = vsel %vm7909_vm7, %v4645_v26, %v7484_v12  ;;  %5241 = vmatpush1.msk.msra.mxu0 %vm7910_vm8, %v4852_v10  ;;  %v4766_v26 = vld [vmem:[#allocation3 + $0x170] sm:$0xff]  ;;  %v4836_v63 = vld [vmem:[#allocation3 + $0x3a0] sm:$0xff]  ;;  %vm7925_vm7 = vmmov %vm7918_vm0 }
 0xa44   : > { %4668 = vst [vmem:[#allocation3 + $0x400] sm:$0xf0] %v4656_v2  ;;  %4951 = vmatmul.mubr.f32.vlgmr.msra.gmra.mrb[10].mxu0 %v7482_v6  ;;  %5611 = vmatprep.subr.bf16.mxu0 %v5610_v20  ;;  %v5624_v57 = vpack.c.bf16 %v4766_v26, %v4760_v35  ;;  %v4797_v20 = vld [vmem:[#allocation3 + $0x268] sm:$0xff]  ;;  %vm7926_vm8 = vmmov %vm7923_vm12 }
 0xa45   : > { %5613 = vmatpush1.bf16.msra.mxu0 %v5612_v4  ;;  %5248 = vmatprep.mubr.msk.f32.mxu0 %vm4864_vm11, %v7390_v0  ;;  %v5618_v0 = vpack.c.bf16 %v4755_v39, %v4749_v15  ;;  %vm7914_vm11 = vmmov %vm7887_vm5  ;;  %v5634_v2 = vpack.c.bf16 %v4803_v42, %v4797_v20  ;;  %v4830_v4 = vld [vmem:[#allocation3 + $0x370] sm:$0xff]  ;;  %v4827_v15 = vld [vmem:[#allocation3 + $0x358] sm:$0xff] }
 0xa46   : > { %v4301_v51 = vpop.permute.xlu1 %4300  ;;  %5615 = vmatprep.subr.bf16.mxu0 %v5614_v7  ;;  %v7494_v48 = vpop.permute.xlu0 %4351  ;;  %vm7917_vm5 = vmmov %vm7916_vm3  ;;  %v5604_v7 = vpack.c.bf16 %v4836_v63, %v4830_v4 }
 0xa47   : > { %v4308_v54 = vsel %vm7911_vm14, %v7446_v55, %v4301_v51  ;;  %v4309_v49 = vsel %vm7912_vm1, %v4301_v51, %v7451_v47  ;;  %v4360_v18 = vsel %vm7913_vm9, %v4350_v59, %v7494_v48  ;;  %v5626_v59 = vpack.c.bf16 %v4779_v27, %v4773_v23  ;;  %vm7927_vm14 = vmmov %vm7926_vm8  ;;  %v4820_v27 = vld [vmem:[#allocation3 + $0x320] sm:$0xff] }
 0xa48   : > { %4320 = vst [vmem:[#allocation3 + $0x380] sm:$0xf] %v4308_v54  ;;  %4321 = vst [vmem:[#allocation3 + $0x388] sm:$0xf] %v4309_v49  ;;  %v4809_v49 = vld [vmem:[#allocation3 + $0x2c8] sm:$0xff]  ;;  %vm7928_vm1 = vcmask 637952   ;;  %v5644_v35 = vpack.c.bf16 %v4826_v1, %v4820_v27 }
 0xa49   : > { %4372 = vst [vmem:[#allocation3 + $0x378] sm:$0xf0] %v4360_v18  ;;  %5617 = vmatpush1.bf16.msra.mxu0 %v5616_v56  ;;  %v5638_v18 = vpack.c.bf16 %v4815_v22, %v4809_v49  ;;  %v4814_v56 = vld [vmem:[#allocation3 + $0x2f0] sm:$0xff]  ;;  %vm7929_vm9 = vmmov %vm7928_vm1 }
 0xa4a   : > { %v4400_v33 = vpop.permute.xlu1 %4399  ;;  %5619 = vmatprep.subr.bf16.mxu0 %v5618_v0  ;;  %v4356_v19 = vpop.permute.xlu0 %4355 }
 0xa4b   : > { %v4407_v55 = vsel %vm7914_vm11, %v7454_v3, %v4400_v33  ;;  %v4408_v47 = vsel %vm7915_vm13, %v4400_v33, %v7459_v32  ;;  %vm7930_vm11 = vmmov %vm7928_vm1  ;;  %vm7931_vm13 = vcmask 629760  }
 0xa4c   : > { %4419 = vst [vmem:[#allocation3 + $0x3b0] sm:$0xf] %v4407_v55  ;;  %4420 = vst [vmem:[#allocation3 + $0x3b8] sm:$0xf] %v4408_v47  ;;  %v5640_v55 = vpack.c.bf16 %v4814_v56, %v4808_v17  ;;  %v4821_v47 = vld [vmem:[#allocation3 + $0x328] sm:$0xff] }
 0xa4d   : > { %5621 = vmatpush1.bf16.msra.mxu0 %v5620_v21  ;;  %v5642_v21 = vpack.c.bf16 %v4827_v15, %v4821_v47 }
 0xa4e   : > { %v4499_v58 = vpop.permute.xlu1 %4498  ;;  %5623 = vmatprep.subr.bf16.mxu0 %v5622_v13  ;;  %v4451_v31 = vpop.permute.xlu0 %4450 }
 0xa4f   : > { %v4506_v36 = vsel %vm7916_vm3, %v7462_v14, %v4499_v58  ;;  %v4507_v3 = vsel %vm7917_vm5, %v4499_v58, %v7469_v41  ;;  %v4459_v32 = vsel %vm7918_vm0, %v7467_v29, %v4451_v31  ;;  %v5628_v29 = vpack.c.bf16 %v4778_v60, %v4772_v28  ;;  %v4848_v60 = vld [vmem:[#allocation3 + $0x400] sm:$0xff]  ;;  %vm7932_vm3 = vmmov %vm7931_vm13 }
 0xa50   : > { %4518 = vst [vmem:[#allocation3 + $0x3e0] sm:$0xf] %v4506_v36  ;;  %4519 = vst [vmem:[#allocation3 + $0x3e8] sm:$0xf] %v4507_v3 }
 0xa51   : > { %4471 = vst [vmem:[#allocation3 + $0x3a8] sm:$0xf0] %v4459_v32  ;;  %5625 = vmatpush1.bf16.msra.mxu0 %v5624_v57  ;;  %vm7933_vm5 = vmmov %vm7932_vm3 }
 0xa52   : > { %v4598_v38 = vpop.permute.xlu1 %4597  ;;  %5627 = vmatprep.subr.bf16.mxu0 %v5626_v59  ;;  %v4455_v37 = vpop.permute.xlu0 %4454  ;;  %vm7934_vm0 = vmmov %vm7932_vm3 }
 0xa53   : > { %v4605_v14 = vsel %vm7919_vm15, %v7475_v62, %v4598_v38  ;;  %v4606_v41 = vsel %vm7920_vm4, %v4598_v38, %v7486_v43  ;;  %v4831_v43 = vld [vmem:[#allocation3 + $0x378] sm:$0xff]  ;;  %vm7935_vm15 = vcmask 1043456  }
 0xa54   : > { %4617 = vst [vmem:[#allocation3 + $0x410] sm:$0xf] %v4605_v14  ;;  %4618 = vst [vmem:[#allocation3 + $0x418] sm:$0xf] %v4606_v41 }
 0xa55   : > { %5629 = vmatpush1.bf16.msra.mxu0 %v5628_v29  ;;  %v4842_v29 = vld [vmem:[#allocation3 + $0x3d0] sm:$0xff]  ;;  %vm7936_vm4 = vmmov %vm7935_vm15 }
 0xa56   : > { %v4354_v9 = vpop.permute.xlu1 %4353  ;;  %5631 = vmatprep.subr.bf16.mxu0 %v5630_v46  ;;  %v4550_v44 = vpop.permute.xlu0 %4549  ;;  %v5608_v45 = vpack.c.bf16 %v4848_v60, %v4842_v29 }
 0xa57   : > { %v4361_v11 = vsel %vm7921_vm10, %v7494_v48, %v4354_v9  ;;  %v4362_v62 = vsel %vm7922_vm6, %v4354_v9, %v4356_v19  ;;  %v4558_v34 = vsel %vm7923_vm12, %v7473_v52, %v4550_v44  ;;  %v4796_v48 = vld [vmem:[#allocation3 + $0x260] sm:$0xff]  ;;  %vm7937_vm10 = vmmov %vm7936_vm4 }
 0xa58   : > { %v4837_v10 = vld [vmem:[#allocation3 + $0x3a8] sm:$0xff]  ;;  %4373 = vst [vmem:[#allocation3 + $0x380] sm:$0xf0] %v4361_v11  ;;  %4374 = vst [vmem:[#allocation3 + $0x388] sm:$0xf0] %v4362_v62  ;;  %v5636_v54 = vpack.c.bf16 %v4802_v40, %v4796_v48 }
 0xa59   : > { %4570 = vst [vmem:[#allocation3 + $0x3d8] sm:$0xf0] %v4558_v34  ;;  %v5602_v25 = vpack.c.bf16 %v4837_v10, %v4831_v43  ;;  %5633 = vmatpush1.bf16.msra.mxu0 %v5632_v24  ;;  %vm7938_vm6 = vmmov %vm7936_vm4 }
 0xa5a   : > { %v4453_v39 = vpop.permute.xlu1 %4452  ;;  %5635 = vmatprep.subr.bf16.mxu0 %v5634_v2  ;;  %v4554_v51 = vpop.permute.xlu0 %4553 }
 0xa5b   : > { %5603 = vmatprep.subr.bf16.mxu1 %v5602_v25  ;;  %v4460_v52 = vsel %vm7924_vm2, %v4451_v31, %v4453_v39  ;;  %v4461_v30 = vsel %vm7925_vm7, %v4453_v39, %v4455_v37 }
 0xa5c   : > { %5605 = vmatpush1.bf16.msra.mxu1 %v5604_v7  ;;  %4472 = vst [vmem:[#allocation3 + $0x3b0] sm:$0xf0] %v4460_v52  ;;  %4473 = vst [vmem:[#allocation3 + $0x3b8] sm:$0xf0] %v4461_v30 }
 0xa5d   : > { %5637 = vmatpush1.bf16.msra.mxu0 %v5636_v54 }
 0xa5e   : > { %v4552_v0 = vpop.permute.xlu1 %4551  ;;  %5639 = vmatprep.subr.bf16.mxu0 %v5638_v18  ;;  %v4649_v16 = vpop.permute.xlu0 %4648 }
 0xa5f   : > { %v4559_v33 = vsel %vm7926_vm8, %v4550_v44, %v4552_v0  ;;  %v4560_v19 = vsel %vm7927_vm14, %v4552_v0, %v4554_v51  ;;  %v4657_v61 = vsel %vm7928_vm1, %v7484_v12, %v4649_v16  ;;  %v4833_v36 = vld [vmem:[#allocation3 + $0x388] sm:$0xff]  ;;  %v4832_v59 = vld [vmem:[#allocation3 + $0x380] sm:$0xff] }
 0xa60   : > { %4571 = vst [vmem:[#allocation3 + $0x3e0] sm:$0xf0] %v4559_v33  ;;  %4572 = vst [vmem:[#allocation3 + $0x3e8] sm:$0xf0] %v4560_v19  ;;  %v4843_v28 = vld [vmem:[#allocation3 + $0x3d8] sm:$0xff] }
 0xa61   : > { %4669 = vst [vmem:[#allocation3 + $0x408] sm:$0xf0] %v4657_v61  ;;  %5641 = vmatpush1.bf16.msra.mxu0 %v5640_v55 }
 0xa62   : > { %v4651_v13 = vpop.permute.xlu1 %4650  ;;  %5643 = vmatprep.subr.bf16.mxu0 %v5642_v21  ;;  %v4653_v26 = vpop.permute.xlu0 %4652 }
 0xa63   : > { %v4658_v58 = vsel %vm7929_vm9, %v4649_v16, %v4651_v13  ;;  %v4659_v31 = vsel %vm7930_vm11, %v4651_v13, %v4653_v26  ;;  %v4839_v3 = vld [vmem:[#allocation3 + $0x3b8] sm:$0xff]  ;;  %v4838_v32 = vld [vmem:[#allocation3 + $0x3b0] sm:$0xff] }
 0xa64   : > { %4670 = vst [vmem:[#allocation3 + $0x410] sm:$0xf0] %v4658_v58  ;;  %4671 = vst [vmem:[#allocation3 + $0x418] sm:$0xf0] %v4659_v31  ;;  %v5646_v12 = vpack.c.bf16 %v4839_v3, %v4833_v36  ;;  %v5648_v37 = vpack.c.bf16 %v4838_v32, %v4832_v59 }
 0xa65   : > { %5645 = vmatpush1.bf16.msra.mxu0 %v5644_v35 }
 0xa66   : > { %v4693_v57 = vpop.permute.xlu1 %4692  ;;  %5647 = vmatprep.subr.bf16.mxu0 %v5646_v12  ;;  %v4695_v23 = vpop.permute.xlu0 %4694 }
 0xa67   : > { %v4702_v8 = vsel %vm7931_vm13, %v7438_v50, %v4693_v57  ;;  %v4703_v38 = vsel %vm7932_vm3, %v4693_v57, %v4695_v23  ;;  %v4845_v42 = vld [vmem:[#allocation3 + $0x3e8] sm:$0xff]  ;;  %v4844_v5 = vld [vmem:[#allocation3 + $0x3e0] sm:$0xff] }
 0xa68   : > { %v4849_v14 = vld [vmem:[#allocation3 + $0x408] sm:$0xff]  ;;  %4714 = vst [vmem:[#allocation3 + $0x430] sm:$0xf] %v4702_v8  ;;  %4715 = vst [vmem:[#allocation3 + $0x438] sm:$0xf] %v4703_v38 }
 0xa69   : > { %v5606_v41 = vpack.c.bf16 %v4849_v14, %v4843_v28  ;;  %5649 = vmatpush1.bf16.msra.mxu0 %v5648_v37 }
 0xa6a   : > { %v4697_v46 = vpop.permute.xlu1 %4696  ;;  %v4699_v53 = vpop.permute.xlu0 %4698 }
 0xa6b   : > { %5607 = vmatprep.subr.bf16.mxu1 %v5606_v41  ;;  %v4704_v9 = vsel %vm7933_vm5, %v4695_v23, %v4697_v46  ;;  %v4705_v44 = vsel %vm7934_vm0, %v4697_v46, %v4699_v53  ;;  %v4851_v50 = vld [vmem:[#allocation3 + $0x418] sm:$0xff]  ;;  %v4850_v63 = vld [vmem:[#allocation3 + $0x410] sm:$0xff] }
 0xa6c   : > { %5609 = vmatpush1.bf16.msra.mxu1 %v5608_v45  ;;  %4716 = vst [vmem:[#allocation3 + $0x440] sm:$0xf] %v4704_v9  ;;  %4717 = vst [vmem:[#allocation3 + $0x448] sm:$0xf] %v4705_v44  ;;  %v5650_v11 = vpack.c.bf16 %v4851_v50, %v4845_v42  ;;  %v5652_v62 = vpack.c.bf16 %v4850_v63, %v4844_v5 }
 0xa6e   : > { %5651 = vmatprep.subr.bf16.mxu0 %v5650_v11 }
 0xa6f   : > { %5653 = vmatpush1.bf16.msra.mxu0 %v5652_v62  ;;  %v4855_v34 = vld [vmem:[#allocation3 + $0x438] sm:$0xf]  ;;  %v4854_v24 = vld [vmem:[#allocation3 + $0x430] sm:$0xf] }
 0xa70   : > { %5243 = vmatprep.subr.msk.mxu1 %vm7935_vm15, %v4855_v34 }
 0xa71   : > { %5244 = vmatpush1.msk.msra.mxu1 %vm7936_vm4, %v4854_v24 }
 0xa72   : > { %5022 = vmatmul.mubr.f32.vlgmr.msra.gmra.mrb[14].mxu1 %v7482_v6 }
 0xa73   : > { %v4857_v43 = vld [vmem:[#allocation3 + $0x448] sm:$0xf]  ;;  %v4856_v10 = vld [vmem:[#allocation3 + $0x440] sm:$0xf] }
 0xa74   : > { %5246 = vmatprep.subr.msk.mxu0 %vm7937_vm10, %v4857_v43 }
 0xa75   : > { %5247 = vmatpush1.msk.msra.mxu0 %vm7938_vm6, %v4856_v10 }
 0xa76   : > { %5093 = vmatmul.mubr.f32.vlgmr.msra.gmra.mrb[12].mxu0 %v7482_v6 }
 0xa7b   : > { %v4862_v20 = vpop.permute.xlu1 %4861 }
 0xb17   : > { %v4952_v25 = vpop.f32.mrb[10].mxu0 }
 0xb18   : > { %v4953_v2 = vadd.f32 %v4952_v25, %v4862_v20  ;;  %v4954_v4 = vpop.f32.mrb[11].mxu0 }
 0xb19   : > { %v4955_v40 = vadd.f32 %v4954_v4, %v4862_v20 }
 0xb1b   : > { %v5105_v7 = vcombine.low %v4953_v2, %v4955_v40 }
 0xb1d   : > { %5111 = vst [vmem:[%s201_s23] sm:$0xff] %v5105_v7 }
 0xb45   : > { %v5023_v22 = vpop.f32.mrb[14].mxu1 }
 0xb46   : > { %v5024_v39 = vadd.f32 %v5023_v22, %v4862_v20  ;;  %v5025_v51 = vpop.f32.mrb[15].mxu1 }
 0xb47   : > { %v5026_v48 = vadd.f32 %v5025_v51, %v4862_v20 }
 0xb49   : > { %v5106_v52 = vcombine.low %v5024_v39, %v5026_v48  ;;  %v5094_v30 = vpop.f32.mrb[12].mxu0 }
 0xb4a   : > { %v5095_v54 = vadd.f32 %v5094_v30, %v4862_v20  ;;  %v5096_v6 = vpop.f32.mrb[13].mxu0 }
 0xb4b   : > { %5112 = vst [vmem:[%s201_s23 + $0x8] sm:$0xff] %v5106_v52  ;;  %v5097_v49 = vadd.f32 %v5096_v6, %v4862_v20 }
 0xb4d   : > { %v5107_v18 = vcombine.low %v5095_v54, %v5097_v49 }
 0xb4f   : > { %5113 = vst [vmem:[%s201_s23 + $0x10] sm:$0xff] %v5107_v18 }
 0xb50   : > { %5806 = shalt.err (!%p5803_p7)
}
 0xb51   : > { %s5807_s26 = scalar_lea.hbm %s7546_s30, 384  ;;  %s5811_s7 = scalar_lea.hbm %s7593_s3, 768 }
 0xb52   : > { %p5808_p9 = scmp.ne.s32.totalorder %s7546_s30, %s5807_s26  ;;  %p5812_p0 = scmp.lt.u32.totalorder %s7546_s30, %s7593_s3 }
 0xb53   : > { %p5813_p13 = scmp.lt.u32.totalorder %s5811_s7, %s5807_s26  ;;  %p5815_p4 = scmp.lt.u32.totalorder %s5807_s26, %s7546_s30 }
 0xb54   : > { %p5809_p2 = pnand %p5808_p9, %p5994_p12 }
 0xb55   : > { %p5814_p1 = por %p5813_p13, %p5812_p0 }
 0xb56   : > { %p5810_p5 = pneg %p5809_p2 }
 0xb57   : > { %p5816_p6 = por %p5815_p4, %p5814_p1 }
 0xb59   : > { %p5817_p8 = pnand %p5816_p6, %p5810_p5 }
 0xb5b   : > { %5820 = shalt.err (!%p5817_p8)
}
 0xb5c   : > { %5664 = dma.vmem_to_hbm [thread:$0]  (%p5994_p12), %s7548_s4, 384, %s7546_s30, %s5115_s9  }
 0xb5d PF: > { %s5141_s20 = sand.u32 1, %s5851_s12   ;;  %p7939_p10 = scmp.ne.s32.totalorder %s7615_s19, 0 }
 0xb5e   : > { %p7940_p11 = scmp.ge.s32.totalorder %s5863_s15, 2  ;;  %s5142_s18 = scalar_lea.sflag [#allocation6], %s5141_s20 }
 0xb60   : > { %p5675_p3 = pnand %p7940_p11, %p7939_p10 }
 0xb62   : > { %5846 = dma.done.wait (!%p5675_p3), %s5142_s18, 384  }
 0xb63   : > { %5848 = vsyncadd (!%p5675_p3), %s5142_s18, 4294966912  ;;  %p17_p7 = scmp.ge.s32.totalorder %s5959_s24, 4   ;;  %s7941_s12 = smov %s5855_s13 }
 0xb64   : > { %s7942_s13 = smov %s5859_s14  ;;  %s7943_s14 = smov %s5990_s17 }
 0xb65   : > { %s7944_s15 = smov %s5959_s24  ;;  %19 = sbr.rel (!%p17_p7) target bundleno = 6 (0x6), region = 81 }
 0xb6c   :  { %5147 = vsyncpa [#allocation5], 1 }
 0xb6d   :  { %5149 = vsyncpa [#allocation5 + $0x1], 1 }
 0xb6e   :  { %5150 = vsyncpa [#allocation8], 1 }
 0xb6f   :  { %5151 = vsyncpa [#allocation6], 1 }
 0xb70   :  { %5153 = vsyncpa [#allocation6 + $0x1], 1 }

</bundles_post_ra>
